<compile_context>
chip_gen: v6e
topology: v6e:2x2x1
jax: 0.10.0
libtpu: 0.0.40
codegen_flags: <defaults>
</compile_context>

<pallas_src>
import functools

import jax
import jax.numpy as jnp
from jax.experimental import pallas as pl
from jax.experimental.pallas import tpu as pltpu

_EPS = 1e-5


# ---------------------------------------------------------------------------
# Fused Block kernel (one grid step = one batch image through the whole Block)
# ---------------------------------------------------------------------------

def _block_kernel(*refs, depth, in_ch, out_ch, stride, H, W, Hp, Wp):
    Ho = (H - 1) // stride + 1
    Wo = (W - 1) // stride + 1
    M = Ho * Wo
    KK = 3

    it = iter(refs)
    xp_ref = next(it)                       # (1, stride*stride, Hp, Wp, in_ch)
    d_s0 = next(it); d_b0 = next(it)        # (1, in_ch)
    d_w0 = next(it)                         # (9*in_ch, out_ch)
    d_wds = next(it)                        # (in_ch, out_ch)
    d_s1 = next(it); d_b1 = next(it)        # (1, out_ch)
    d_w1 = next(it)                         # (9*out_ch, out_ch)
    basics = [tuple(next(it) for _ in range(6)) for _ in range(depth)]
    o_ref = next(it)                        # (1, M, out_ch)
    act_ref = next(it)                      # scratch (stride*stride, Hp, Wp, in_ch)
    pad_ref = next(it)                      # scratch (Ho+2, Wo+2, out_ch)

    # Zero the padded scratch every step (borders must be exact zeros; no
    # program_id gating so it is also correct when grid steps land on
    # different cores, e.g. v7x with 2 TensorCores).
    pad_ref[...] = jnp.zeros_like(pad_ref)

    # ---- DownsampleUnit.norm_act: BN+ReLU on the parity planes of the padded
    # input. The zero-pad border must stay zero (the conv pads AFTER the
    # normalization in the reference module), so mask it back to zero.
    s0 = d_s0[...]
    b0 = d_b0[...]
    for a in range(stride):
        for b in range(stride):
            r_pad = jax.lax.broadcasted_iota(jnp.int32, (Hp, Wp, in_ch), 0) * stride + a
            c_pad = jax.lax.broadcasted_iota(jnp.int32, (Hp, Wp, in_ch), 1) * stride + b
            ok = (r_pad >= 1) & (r_pad <= H) & (c_pad >= 1) & (c_pad <= W)
            p = xp_ref[0, a * stride + b]                    # (Hp, Wp, in_ch)
            act = jnp.maximum(p * s0 + b0, 0.0)
            act_ref[a * stride + b] = jnp.where(ok, act, 0.0)

    # 3x3 conv with stride `stride`: all 9 taps folded into one matmul
    # (K = 9*in_ch); every tap is a unit-stride slice of a parity plane.
    def conv3x3_strided(w_ref):
        cols = []
        for kh in range(KK):
            pa, ro = kh % stride, kh // stride
            for kw in range(KK):
                pb, co = kw % stride, kw // stride
                sl = act_ref[pa * stride + pb, ro:ro + Ho, co:co + Wo, :]
                cols.append(sl.reshape(M, in_ch))
            # taps ordered (kh, kw) to match w.reshape(9*in_ch, out_ch)
        patches = jnp.concatenate(cols, axis=-1)             # (M, 9*in_ch)
        return jnp.dot(patches, w_ref[...], preferred_element_type=jnp.float32)

    # 1x1 downsample branch (stride `stride`, padding 0).
    pa1, off1 = 1 % stride, 1 // stride
    xs = act_ref[pa1 * stride + pa1, off1:off1 + Ho, off1:off1 + Wo, :]
    ds = jnp.dot(xs.reshape(M, in_ch), d_wds[...],
                 preferred_element_type=jnp.float32)          # (M, out_ch)

    # stride-1 3x3 conv on an in-kernel activation: write the interior of a
    # zero-bordered VMEM scratch, slice 9 taps, one matmul with K = 9*out_ch.
    def conv3x3_s1(h2d, w_ref):
        pad_ref[1:Ho + 1, 1:Wo + 1, :] = h2d.reshape(Ho, Wo, out_ch)
        cols = []
        for kh in range(KK):
            for kw in range(KK):
                sl = pad_ref[kh:kh + Ho, kw:kw + Wo, :]
                cols.append(sl.reshape(M, out_ch))
        patches = jnp.concatenate(cols, axis=-1)              # (M, 9*out_ch)
        return jnp.dot(patches, w_ref[...], preferred_element_type=jnp.float32)

    # ---- DownsampleUnit.block + residual
    h = conv3x3_strided(d_w0)                                 # (M, out_ch)
    h = jnp.maximum(h * d_s1[...] + d_b1[...], 0.0)           # BN+ReLU (dropout=id)
    x_cur = conv3x3_s1(h, d_w1) + ds

    # ---- BasicUnits
    for (s0b, b0b, w0b, s1b, b1b, w1b) in basics:
        t = jnp.maximum(x_cur * s0b[...] + b0b[...], 0.0)
        t = conv3x3_s1(t, w0b)
        t = jnp.maximum(t * s1b[...] + b1b[...], 0.0)         # dropout = identity
        x_cur = x_cur + conv3x3_s1(t, w1b)

    o_ref[0] = x_cur.astype(o_ref.dtype)


# ---------------------------------------------------------------------------
# Wrapper (parameter folding, parity-plane construction, single pallas_call)
# ---------------------------------------------------------------------------

def _fold_bn(p, prefix):
    scale = p[prefix + "_gamma"] * jax.lax.rsqrt(p[prefix + "_var"] + _EPS)
    shift = p[prefix + "_beta"] - p[prefix + "_mean"] * scale
    return scale.reshape(1, -1), shift.reshape(1, -1)


def _const_index_map(rank):
    zeros = (0,) * rank
    return lambda n: zeros


def block_forward(x_nchw, params, stride):
    # PyTorch boundary: NCHW in / NCHW out.
    x = jnp.transpose(x_nchw, (0, 2, 3, 1)).astype(jnp.float32)   # NHWC
    N, H, W, in_ch = x.shape
    down = params["down"]
    out_ch = down["w0"].shape[-1]
    depth = len(params["basic"])
    Ho = (H - 1) // stride + 1
    Wo = (W - 1) // stride + 1
    M = Ho * Wo
    S2 = stride * stride

    # Parity-plane decomposition of the zero-padded input (same total bytes as
    # x — no 9x im2col in HBM). Inside the kernel every conv tap of the strided
    # 3x3 conv (and the 1x1 downsample) is a unit-stride slice of one plane.
    pad = 1
    xp = jnp.pad(x, ((0, 0), (pad, pad), (pad, pad), (0, 0)))
    Hp = -(-(H + 2 * pad) // stride)
    Wp = -(-(W + 2 * pad) // stride)
    xp = jnp.pad(xp, ((0, 0), (0, Hp * stride - (H + 2 * pad)),
                      (0, Wp * stride - (W + 2 * pad)), (0, 0)))
    planes = [xp[:, a::stride, b::stride, :]
              for a in range(stride) for b in range(stride)]
    xplanes = jnp.stack(planes, axis=1)                  # (N, S2, Hp, Wp, in_ch)

    # Fold BN into per-channel scale/shift; flatten conv weights so the 9 taps
    # become one MXU contraction (K = 9*Cin).
    d_s0, d_b0 = _fold_bn(down, "bn0")
    d_s1, d_b1 = _fold_bn(down, "bn1")
    args = [xplanes, d_s0, d_b0,
            down["w0"].reshape(9 * in_ch, out_ch),
            down["w_ds"].reshape(in_ch, out_ch),
            d_s1, d_b1,
            down["w1"].reshape(9 * out_ch, out_ch)]
    for bp in params["basic"]:
        s0, b0 = _fold_bn(bp, "bn0")
        s1, b1 = _fold_bn(bp, "bn1")
        args += [s0, b0, bp["w0"].reshape(9 * out_ch, out_ch),
                 s1, b1, bp["w1"].reshape(9 * out_ch, out_ch)]

    in_specs = [pl.BlockSpec((1, S2, Hp, Wp, in_ch),
                             lambda n: (n, 0, 0, 0, 0))]
    in_specs += [pl.BlockSpec(a.shape, _const_index_map(a.ndim)) for a in args[1:]]

    kern = functools.partial(_block_kernel, depth=depth, in_ch=in_ch,
                             out_ch=out_ch, stride=stride, H=H, W=W,
                             Hp=Hp, Wp=Wp)
    out2d = pl.pallas_call(
        kern,
        out_shape=jax.ShapeDtypeStruct((N, M, out_ch), jnp.float32),
        grid=(N,),
        in_specs=in_specs,
        out_specs=pl.BlockSpec((1, M, out_ch), lambda n: (n, 0, 0)),
        scratch_shapes=[pltpu.VMEM((S2, Hp, Wp, in_ch), jnp.float32),
                        pltpu.VMEM((Ho + 2, Wo + 2, out_ch), jnp.float32)],
        compiler_params=pltpu.CompilerParams(
            dimension_semantics=("parallel",)),    # both TCs get work on v7x
    )(*args)

    out = out2d.reshape(N, Ho, Wo, out_ch)
    return jnp.transpose(out, (0, 3, 1, 2))              # -> NCHW


# ---------------------------------------------------------------------------
# Deterministic parameter construction
# ---------------------------------------------------------------------------

def _bn_params(key, c, prefix):
    k1, k2, k3, k4 = jax.random.split(key, 4)
    return {
        prefix + "_gamma": 1.0 + 0.1 * jax.random.normal(k1, (c,), jnp.float32),
        prefix + "_beta": 0.1 * jax.random.normal(k2, (c,), jnp.float32),
        prefix + "_mean": 0.1 * jax.random.normal(k3, (c,), jnp.float32),
        prefix + "_var": 1.0 + 0.1 * jax.random.uniform(k4, (c,), jnp.float32),
    }


def _conv_w(key, kh, kw, cin, cout):
    return 0.1 * jax.random.normal(key, (kh, kw, cin, cout), jnp.float32)


def make_params(key, in_ch, out_ch, depth):
    keys = jax.random.split(key, 5 + 5 * depth)
    down = {}
    down.update(_bn_params(keys[0], in_ch, "bn0"))
    down.update(_bn_params(keys[1], out_ch, "bn1"))
    down["w0"] = _conv_w(keys[2], 3, 3, in_ch, out_ch)
    down["w1"] = _conv_w(keys[3], 3, 3, out_ch, out_ch)
    down["w_ds"] = _conv_w(keys[4], 1, 1, in_ch, out_ch)
    basic = []
    for d in range(depth):
        kk = keys[5 + 5 * d:10 + 5 * d]
        bp = {}
        bp.update(_bn_params(kk[0], out_ch, "bn0"))
        bp.update(_bn_params(kk[1], out_ch, "bn1"))
        bp["w0"] = _conv_w(kk[2], 3, 3, out_ch, out_ch)
        bp["w1"] = _conv_w(kk[3], 3, 3, out_ch, out_ch)
        basic.append(bp)
    return {"down": down, "basic": basic}


# ---------------------------------------------------------------------------
# Pure-JAX reference (correctness check)
# ---------------------------------------------------------------------------

def _ref_conv(x, w, stride, padding):
    return jax.lax.conv_general_dilated(
        x, w, window_strides=(stride, stride),
        padding=((padding, padding), (padding, padding)),
        dimension_numbers=("NHWC", "HWIO", "NHWC"))


def _ref_bn_relu(x, scale, shift):
    return jnp.maximum(x * scale.reshape(1, 1, 1, -1) + shift.reshape(1, 1, 1, -1), 0.0)


def ref_block_forward(x_nchw, params, stride):
    x = jnp.transpose(x_nchw, (0, 2, 3, 1))
    p = params["down"]
    s0, b0 = _fold_bn(p, "bn0")
    xa = _ref_bn_relu(x, s0, b0)
    ds = _ref_conv(xa, p["w_ds"], stride, 0)
    h = _ref_conv(xa, p["w0"], stride, 1)
    s1, b1 = _fold_bn(p, "bn1")
    h = _ref_bn_relu(h, s1, b1)
    x = _ref_conv(h, p["w1"], 1, 1) + ds
    for p in params["basic"]:
        s0, b0 = _fold_bn(p, "bn0")
        h = _ref_bn_relu(x, s0, b0)
        h = _ref_conv(h, p["w0"], 1, 1)
        s1, b1 = _fold_bn(p, "bn1")
        h = _ref_bn_relu(h, s1, b1)
        x = x + _ref_conv(h, p["w1"], 1, 1)
    return jnp.transpose(x, (0, 3, 1, 2))


# ---------------------------------------------------------------------------
# Main
# ---------------------------------------------------------------------------

if __name__ == "__main__":
    # Block(in_channels=8, out_channels=16, stride=2, depth=2, dropout=0.1)
    IN_CH, OUT_CH, STRIDE, DEPTH = 8, 16, 2, 2
    N, H, W = 2, 16, 16

    root = jax.random.PRNGKey(0)
    kx, kp = jax.random.split(root)
    x = jax.random.normal(kx, (N, IN_CH, H, W), jnp.float32)   # NCHW like PyTorch
    params = make_params(kp, IN_CH, OUT_CH, DEPTH)

    fwd = jax.jit(functools.partial(block_forward, stride=STRIDE))
    out = jax.block_until_ready(fwd(x, params))

    ref = jax.block_until_ready(ref_block_forward(x, params, STRIDE))
    assert out.shape == (N, OUT_CH, H // STRIDE, W // STRIDE), out.shape
    err = float(jnp.max(jnp.abs(out - ref)))
    assert jnp.allclose(out, ref, rtol=1e-3, atol=1e-3), err

    print("KERNEL_OK")
</pallas_src>

<mosaic_0001>
module attributes {stable_mosaic.version = 11 : i64} {
  func.func @_block_kernel(%arg0: i32, %arg1: memref<1x4x9x9x8xf32, #tpu.memory_space<vmem>>, %arg2: memref<1x8xf32, #tpu.memory_space<vmem>>, %arg3: memref<1x8xf32, #tpu.memory_space<vmem>>, %arg4: memref<72x16xf32, #tpu.memory_space<vmem>>, %arg5: memref<8x16xf32, #tpu.memory_space<vmem>>, %arg6: memref<1x16xf32, #tpu.memory_space<vmem>>, %arg7: memref<1x16xf32, #tpu.memory_space<vmem>>, %arg8: memref<144x16xf32, #tpu.memory_space<vmem>>, %arg9: memref<1x16xf32, #tpu.memory_space<vmem>>, %arg10: memref<1x16xf32, #tpu.memory_space<vmem>>, %arg11: memref<144x16xf32, #tpu.memory_space<vmem>>, %arg12: memref<1x16xf32, #tpu.memory_space<vmem>>, %arg13: memref<1x16xf32, #tpu.memory_space<vmem>>, %arg14: memref<144x16xf32, #tpu.memory_space<vmem>>, %arg15: memref<1x16xf32, #tpu.memory_space<vmem>>, %arg16: memref<1x16xf32, #tpu.memory_space<vmem>>, %arg17: memref<144x16xf32, #tpu.memory_space<vmem>>, %arg18: memref<1x16xf32, #tpu.memory_space<vmem>>, %arg19: memref<1x16xf32, #tpu.memory_space<vmem>>, %arg20: memref<144x16xf32, #tpu.memory_space<vmem>>, %arg21: memref<1x64x16xf32, #tpu.memory_space<vmem>>, %arg22: memref<4x9x9x8xf32, #tpu.memory_space<vmem>>, %arg23: memref<10x10x16xf32, #tpu.memory_space<vmem>>) attributes {dimension_semantics = [#tpu.dimension_semantics<parallel>], iteration_bounds = array<i64: 2>, scalar_prefetch = 0 : i64, scratch_operands = 2 : i64, tpu.core_type = #tpu.core_type<tc>, window_params = [{transform_indices = @transform_0, window_bounds = array<i64: 1, 4, 9, 9, 8>}, {pipeline_mode = #tpu.pipeline_mode<synchronous>, transform_indices = @transform_1, window_bounds = array<i64: 1, 8>}, {pipeline_mode = #tpu.pipeline_mode<synchronous>, transform_indices = @transform_2, window_bounds = array<i64: 1, 8>}, {pipeline_mode = #tpu.pipeline_mode<synchronous>, transform_indices = @transform_3, window_bounds = array<i64: 72, 16>}, {pipeline_mode = #tpu.pipeline_mode<synchronous>, transform_indices = @transform_4, window_bounds = array<i64: 8, 16>}, {pipeline_mode = #tpu.pipeline_mode<synchronous>, transform_indices = @transform_5, window_bounds = array<i64: 1, 16>}, {pipeline_mode = #tpu.pipeline_mode<synchronous>, transform_indices = @transform_6, window_bounds = array<i64: 1, 16>}, {pipeline_mode = #tpu.pipeline_mode<synchronous>, transform_indices = @transform_7, window_bounds = array<i64: 144, 16>}, {pipeline_mode = #tpu.pipeline_mode<synchronous>, transform_indices = @transform_8, window_bounds = array<i64: 1, 16>}, {pipeline_mode = #tpu.pipeline_mode<synchronous>, transform_indices = @transform_9, window_bounds = array<i64: 1, 16>}, {pipeline_mode = #tpu.pipeline_mode<synchronous>, transform_indices = @transform_10, window_bounds = array<i64: 144, 16>}, {pipeline_mode = #tpu.pipeline_mode<synchronous>, transform_indices = @transform_11, window_bounds = array<i64: 1, 16>}, {pipeline_mode = #tpu.pipeline_mode<synchronous>, transform_indices = @transform_12, window_bounds = array<i64: 1, 16>}, {pipeline_mode = #tpu.pipeline_mode<synchronous>, transform_indices = @transform_13, window_bounds = array<i64: 144, 16>}, {pipeline_mode = #tpu.pipeline_mode<synchronous>, transform_indices = @transform_14, window_bounds = array<i64: 1, 16>}, {pipeline_mode = #tpu.pipeline_mode<synchronous>, transform_indices = @transform_15, window_bounds = array<i64: 1, 16>}, {pipeline_mode = #tpu.pipeline_mode<synchronous>, transform_indices = @transform_16, window_bounds = array<i64: 144, 16>}, {pipeline_mode = #tpu.pipeline_mode<synchronous>, transform_indices = @transform_17, window_bounds = array<i64: 1, 16>}, {pipeline_mode = #tpu.pipeline_mode<synchronous>, transform_indices = @transform_18, window_bounds = array<i64: 1, 16>}, {pipeline_mode = #tpu.pipeline_mode<synchronous>, transform_indices = @transform_19, window_bounds = array<i64: 144, 16>}, {transform_indices = @transform_20, window_bounds = array<i64: 1, 64, 16>}]} {
    %cst = arith.constant 0.000000e+00 : f32
    %0 = vector.broadcast %cst : f32 to vector<10x10x16xf32>
    %c0 = arith.constant 0 : index
    %c0_0 = arith.constant 0 : index
    %c0_1 = arith.constant 0 : index
    %1 = vector.load %arg23[%c0, %c0_0, %c0_1] : memref<10x10x16xf32, #tpu.memory_space<vmem>>, vector<10x10x16xf32>
    tpu.vector_store %arg23[%c0, %c0_0, %c0_1], %0 {strides = array<i32>} : memref<10x10x16xf32, #tpu.memory_space<vmem>>, vector<10x10x16xf32>,
    %c0_2 = arith.constant 0 : index
    %c0_3 = arith.constant 0 : index
    %2 = vector.load %arg2[%c0_2, %c0_3] : memref<1x8xf32, #tpu.memory_space<vmem>>, vector<1x8xf32>
    %c0_4 = arith.constant 0 : index
    %c0_5 = arith.constant 0 : index
    %3 = vector.load %arg3[%c0_4, %c0_5] : memref<1x8xf32, #tpu.memory_space<vmem>>, vector<1x8xf32>
    %4 = tpu.iota {dimensions = array<i32: 0>} : vector<9x9x8xi32>
    %c2_i32 = arith.constant 2 : i32
    %5 = vector.broadcast %c2_i32 : i32 to vector<9x9x8xi32>
    %6 = arith.muli %4, %5 : vector<9x9x8xi32>
    %c0_i32 = arith.constant 0 : i32
    %7 = vector.broadcast %c0_i32 : i32 to vector<9x9x8xi32>
    %8 = arith.addi %6, %7 : vector<9x9x8xi32>
    %9 = tpu.iota {dimensions = array<i32: 1>} : vector<9x9x8xi32>
    %c2_i32_6 = arith.constant 2 : i32
    %10 = vector.broadcast %c2_i32_6 : i32 to vector<9x9x8xi32>
    %11 = arith.muli %9, %10 : vector<9x9x8xi32>
    %c0_i32_7 = arith.constant 0 : i32
    %12 = vector.broadcast %c0_i32_7 : i32 to vector<9x9x8xi32>
    %13 = arith.addi %11, %12 : vector<9x9x8xi32>
    %c1_i32 = arith.constant 1 : i32
    %14 = vector.broadcast %c1_i32 : i32 to vector<9x9x8xi32>
    %15 = arith.cmpi sge, %8, %14 : vector<9x9x8xi32>
    %c16_i32 = arith.constant 16 : i32
    %16 = vector.broadcast %c16_i32 : i32 to vector<9x9x8xi32>
    %17 = arith.cmpi sle, %8, %16 : vector<9x9x8xi32>
    %18 = arith.andi %15, %17 : vector<9x9x8xi1>
    %c1_i32_8 = arith.constant 1 : i32
    %19 = vector.broadcast %c1_i32_8 : i32 to vector<9x9x8xi32>
    %20 = arith.cmpi sge, %13, %19 : vector<9x9x8xi32>
    %21 = arith.andi %18, %20 : vector<9x9x8xi1>
    %c16_i32_9 = arith.constant 16 : i32
    %22 = vector.broadcast %c16_i32_9 : i32 to vector<9x9x8xi32>
    %23 = arith.cmpi sle, %13, %22 : vector<9x9x8xi32>
    %24 = arith.andi %21, %23 : vector<9x9x8xi1>
    %c0_10 = arith.constant 0 : index
    %c0_11 = arith.constant 0 : index
    %c0_12 = arith.constant 0 : index
    %c0_13 = arith.constant 0 : index
    %c0_14 = arith.constant 0 : index
    %25 = vector.load %arg1[%c0_10, %c0_11, %c0_12, %c0_13, %c0_14] : memref<1x4x9x9x8xf32, #tpu.memory_space<vmem>>, vector<1x1x9x9x8xf32>
    %26 = vector.shape_cast %25 : vector<1x1x9x9x8xf32> to vector<9x9x8xf32>
    %27 = vector.shape_cast %2 : vector<1x8xf32> to vector<1x1x8xf32>
    %28 = vector.broadcast %27 : vector<1x1x8xf32> to vector<9x9x8xf32>
    %29 = arith.mulf %26, %28 : vector<9x9x8xf32>
    %30 = vector.shape_cast %3 : vector<1x8xf32> to vector<1x1x8xf32>
    %31 = vector.broadcast %30 : vector<1x1x8xf32> to vector<9x9x8xf32>
    %32 = arith.addf %29, %31 : vector<9x9x8xf32>
    %cst_15 = arith.constant 0.000000e+00 : f32
    %33 = vector.broadcast %cst_15 : f32 to vector<9x9x8xf32>
    %34 = arith.maximumf %32, %33 : vector<9x9x8xf32>
    %cst_16 = arith.constant 0.000000e+00 : f32
    %35 = vector.broadcast %cst_16 : f32 to vector<9x9x8xf32>
    %36 = arith.select %24, %34, %35 : vector<9x9x8xi1>, vector<9x9x8xf32>
    %c0_17 = arith.constant 0 : index
    %c0_18 = arith.constant 0 : index
    %c0_19 = arith.constant 0 : index
    %c0_20 = arith.constant 0 : index
    %37 = vector.load %arg22[%c0_17, %c0_18, %c0_19, %c0_20] : memref<4x9x9x8xf32, #tpu.memory_space<vmem>>, vector<1x9x9x8xf32>
    %38 = vector.shape_cast %37 : vector<1x9x9x8xf32> to vector<9x9x8xf32>
    %39 = vector.shape_cast %36 : vector<9x9x8xf32> to vector<1x9x9x8xf32>
    tpu.vector_store %arg22[%c0_17, %c0_18, %c0_19, %c0_20], %39 {strides = array<i32>} : memref<4x9x9x8xf32, #tpu.memory_space<vmem>>, vector<1x9x9x8xf32>,
    %40 = tpu.iota {dimensions = array<i32: 0>} : vector<9x9x8xi32>
    %c2_i32_21 = arith.constant 2 : i32
    %41 = vector.broadcast %c2_i32_21 : i32 to vector<9x9x8xi32>
    %42 = arith.muli %40, %41 : vector<9x9x8xi32>
    %c0_i32_22 = arith.constant 0 : i32
    %43 = vector.broadcast %c0_i32_22 : i32 to vector<9x9x8xi32>
    %44 = arith.addi %42, %43 : vector<9x9x8xi32>
    %45 = tpu.iota {dimensions = array<i32: 1>} : vector<9x9x8xi32>
    %c2_i32_23 = arith.constant 2 : i32
    %46 = vector.broadcast %c2_i32_23 : i32 to vector<9x9x8xi32>
    %47 = arith.muli %45, %46 : vector<9x9x8xi32>
    %c1_i32_24 = arith.constant 1 : i32
    %48 = vector.broadcast %c1_i32_24 : i32 to vector<9x9x8xi32>
    %49 = arith.addi %47, %48 : vector<9x9x8xi32>
    %c1_i32_25 = arith.constant 1 : i32
    %50 = vector.broadcast %c1_i32_25 : i32 to vector<9x9x8xi32>
    %51 = arith.cmpi sge, %44, %50 : vector<9x9x8xi32>
    %c16_i32_26 = arith.constant 16 : i32
    %52 = vector.broadcast %c16_i32_26 : i32 to vector<9x9x8xi32>
    %53 = arith.cmpi sle, %44, %52 : vector<9x9x8xi32>
    %54 = arith.andi %51, %53 : vector<9x9x8xi1>
    %c1_i32_27 = arith.constant 1 : i32
    %55 = vector.broadcast %c1_i32_27 : i32 to vector<9x9x8xi32>
    %56 = arith.cmpi sge, %49, %55 : vector<9x9x8xi32>
    %57 = arith.andi %54, %56 : vector<9x9x8xi1>
    %c16_i32_28 = arith.constant 16 : i32
    %58 = vector.broadcast %c16_i32_28 : i32 to vector<9x9x8xi32>
    %59 = arith.cmpi sle, %49, %58 : vector<9x9x8xi32>
    %60 = arith.andi %57, %59 : vector<9x9x8xi1>
    %c0_29 = arith.constant 0 : index
    %c1 = arith.constant 1 : index
    %c0_30 = arith.constant 0 : index
    %c0_31 = arith.constant 0 : index
    %c0_32 = arith.constant 0 : index
    %61 = vector.load %arg1[%c0_29, %c1, %c0_30, %c0_31, %c0_32] : memref<1x4x9x9x8xf32, #tpu.memory_space<vmem>>, vector<1x1x9x9x8xf32>
    %62 = vector.shape_cast %61 : vector<1x1x9x9x8xf32> to vector<9x9x8xf32>
    %63 = vector.shape_cast %2 : vector<1x8xf32> to vector<1x1x8xf32>
    %64 = vector.broadcast %63 : vector<1x1x8xf32> to vector<9x9x8xf32>
    %65 = arith.mulf %62, %64 : vector<9x9x8xf32>
    %66 = vector.shape_cast %3 : vector<1x8xf32> to vector<1x1x8xf32>
    %67 = vector.broadcast %66 : vector<1x1x8xf32> to vector<9x9x8xf32>
    %68 = arith.addf %65, %67 : vector<9x9x8xf32>
    %cst_33 = arith.constant 0.000000e+00 : f32
    %69 = vector.broadcast %cst_33 : f32 to vector<9x9x8xf32>
    %70 = arith.maximumf %68, %69 : vector<9x9x8xf32>
    %cst_34 = arith.constant 0.000000e+00 : f32
    %71 = vector.broadcast %cst_34 : f32 to vector<9x9x8xf32>
    %72 = arith.select %60, %70, %71 : vector<9x9x8xi1>, vector<9x9x8xf32>
    %c1_35 = arith.constant 1 : index
    %c0_36 = arith.constant 0 : index
    %c0_37 = arith.constant 0 : index
    %c0_38 = arith.constant 0 : index
    %73 = vector.load %arg22[%c1_35, %c0_36, %c0_37, %c0_38] : memref<4x9x9x8xf32, #tpu.memory_space<vmem>>, vector<1x9x9x8xf32>
    %74 = vector.shape_cast %73 : vector<1x9x9x8xf32> to vector<9x9x8xf32>
    %75 = vector.shape_cast %72 : vector<9x9x8xf32> to vector<1x9x9x8xf32>
    tpu.vector_store %arg22[%c1_35, %c0_36, %c0_37, %c0_38], %75 {strides = array<i32>} : memref<4x9x9x8xf32, #tpu.memory_space<vmem>>, vector<1x9x9x8xf32>,
    %76 = tpu.iota {dimensions = array<i32: 0>} : vector<9x9x8xi32>
    %c2_i32_39 = arith.constant 2 : i32
    %77 = vector.broadcast %c2_i32_39 : i32 to vector<9x9x8xi32>
    %78 = arith.muli %76, %77 : vector<9x9x8xi32>
    %c1_i32_40 = arith.constant 1 : i32
    %79 = vector.broadcast %c1_i32_40 : i32 to vector<9x9x8xi32>
    %80 = arith.addi %78, %79 : vector<9x9x8xi32>
    %81 = tpu.iota {dimensions = array<i32: 1>} : vector<9x9x8xi32>
    %c2_i32_41 = arith.constant 2 : i32
    %82 = vector.broadcast %c2_i32_41 : i32 to vector<9x9x8xi32>
    %83 = arith.muli %81, %82 : vector<9x9x8xi32>
    %c0_i32_42 = arith.constant 0 : i32
    %84 = vector.broadcast %c0_i32_42 : i32 to vector<9x9x8xi32>
    %85 = arith.addi %83, %84 : vector<9x9x8xi32>
    %c1_i32_43 = arith.constant 1 : i32
    %86 = vector.broadcast %c1_i32_43 : i32 to vector<9x9x8xi32>
    %87 = arith.cmpi sge, %80, %86 : vector<9x9x8xi32>
    %c16_i32_44 = arith.constant 16 : i32
    %88 = vector.broadcast %c16_i32_44 : i32 to vector<9x9x8xi32>
    %89 = arith.cmpi sle, %80, %88 : vector<9x9x8xi32>
    %90 = arith.andi %87, %89 : vector<9x9x8xi1>
    %c1_i32_45 = arith.constant 1 : i32
    %91 = vector.broadcast %c1_i32_45 : i32 to vector<9x9x8xi32>
    %92 = arith.cmpi sge, %85, %91 : vector<9x9x8xi32>
    %93 = arith.andi %90, %92 : vector<9x9x8xi1>
    %c16_i32_46 = arith.constant 16 : i32
    %94 = vector.broadcast %c16_i32_46 : i32 to vector<9x9x8xi32>
    %95 = arith.cmpi sle, %85, %94 : vector<9x9x8xi32>
    %96 = arith.andi %93, %95 : vector<9x9x8xi1>
    %c0_47 = arith.constant 0 : index
    %c2 = arith.constant 2 : index
    %c0_48 = arith.constant 0 : index
    %c0_49 = arith.constant 0 : index
    %c0_50 = arith.constant 0 : index
    %97 = vector.load %arg1[%c0_47, %c2, %c0_48, %c0_49, %c0_50] : memref<1x4x9x9x8xf32, #tpu.memory_space<vmem>>, vector<1x1x9x9x8xf32>
    %98 = vector.shape_cast %97 : vector<1x1x9x9x8xf32> to vector<9x9x8xf32>
    %99 = vector.shape_cast %2 : vector<1x8xf32> to vector<1x1x8xf32>
    %100 = vector.broadcast %99 : vector<1x1x8xf32> to vector<9x9x8xf32>
    %101 = arith.mulf %98, %100 : vector<9x9x8xf32>
    %102 = vector.shape_cast %3 : vector<1x8xf32> to vector<1x1x8xf32>
    %103 = vector.broadcast %102 : vector<1x1x8xf32> to vector<9x9x8xf32>
    %104 = arith.addf %101, %103 : vector<9x9x8xf32>
    %cst_51 = arith.constant 0.000000e+00 : f32
    %105 = vector.broadcast %cst_51 : f32 to vector<9x9x8xf32>
    %106 = arith.maximumf %104, %105 : vector<9x9x8xf32>
    %cst_52 = arith.constant 0.000000e+00 : f32
    %107 = vector.broadcast %cst_52 : f32 to vector<9x9x8xf32>
    %108 = arith.select %96, %106, %107 : vector<9x9x8xi1>, vector<9x9x8xf32>
    %c2_53 = arith.constant 2 : index
    %c0_54 = arith.constant 0 : index
    %c0_55 = arith.constant 0 : index
    %c0_56 = arith.constant 0 : index
    %109 = vector.load %arg22[%c2_53, %c0_54, %c0_55, %c0_56] : memref<4x9x9x8xf32, #tpu.memory_space<vmem>>, vector<1x9x9x8xf32>
    %110 = vector.shape_cast %109 : vector<1x9x9x8xf32> to vector<9x9x8xf32>
    %111 = vector.shape_cast %108 : vector<9x9x8xf32> to vector<1x9x9x8xf32>
    tpu.vector_store %arg22[%c2_53, %c0_54, %c0_55, %c0_56], %111 {strides = array<i32>} : memref<4x9x9x8xf32, #tpu.memory_space<vmem>>, vector<1x9x9x8xf32>,
    %112 = tpu.iota {dimensions = array<i32: 0>} : vector<9x9x8xi32>
    %c2_i32_57 = arith.constant 2 : i32
    %113 = vector.broadcast %c2_i32_57 : i32 to vector<9x9x8xi32>
    %114 = arith.muli %112, %113 : vector<9x9x8xi32>
    %c1_i32_58 = arith.constant 1 : i32
    %115 = vector.broadcast %c1_i32_58 : i32 to vector<9x9x8xi32>
    %116 = arith.addi %114, %115 : vector<9x9x8xi32>
    %117 = tpu.iota {dimensions = array<i32: 1>} : vector<9x9x8xi32>
    %c2_i32_59 = arith.constant 2 : i32
    %118 = vector.broadcast %c2_i32_59 : i32 to vector<9x9x8xi32>
    %119 = arith.muli %117, %118 : vector<9x9x8xi32>
    %c1_i32_60 = arith.constant 1 : i32
    %120 = vector.broadcast %c1_i32_60 : i32 to vector<9x9x8xi32>
    %121 = arith.addi %119, %120 : vector<9x9x8xi32>
    %c1_i32_61 = arith.constant 1 : i32
    %122 = vector.broadcast %c1_i32_61 : i32 to vector<9x9x8xi32>
    %123 = arith.cmpi sge, %116, %122 : vector<9x9x8xi32>
    %c16_i32_62 = arith.constant 16 : i32
    %124 = vector.broadcast %c16_i32_62 : i32 to vector<9x9x8xi32>
    %125 = arith.cmpi sle, %116, %124 : vector<9x9x8xi32>
    %126 = arith.andi %123, %125 : vector<9x9x8xi1>
    %c1_i32_63 = arith.constant 1 : i32
    %127 = vector.broadcast %c1_i32_63 : i32 to vector<9x9x8xi32>
    %128 = arith.cmpi sge, %121, %127 : vector<9x9x8xi32>
    %129 = arith.andi %126, %128 : vector<9x9x8xi1>
    %c16_i32_64 = arith.constant 16 : i32
    %130 = vector.broadcast %c16_i32_64 : i32 to vector<9x9x8xi32>
    %131 = arith.cmpi sle, %121, %130 : vector<9x9x8xi32>
    %132 = arith.andi %129, %131 : vector<9x9x8xi1>
    %c0_65 = arith.constant 0 : index
    %c3 = arith.constant 3 : index
    %c0_66 = arith.constant 0 : index
    %c0_67 = arith.constant 0 : index
    %c0_68 = arith.constant 0 : index
    %133 = vector.load %arg1[%c0_65, %c3, %c0_66, %c0_67, %c0_68] : memref<1x4x9x9x8xf32, #tpu.memory_space<vmem>>, vector<1x1x9x9x8xf32>
    %134 = vector.shape_cast %133 : vector<1x1x9x9x8xf32> to vector<9x9x8xf32>
    %135 = vector.shape_cast %2 : vector<1x8xf32> to vector<1x1x8xf32>
    %136 = vector.broadcast %135 : vector<1x1x8xf32> to vector<9x9x8xf32>
    %137 = arith.mulf %134, %136 : vector<9x9x8xf32>
    %138 = vector.shape_cast %3 : vector<1x8xf32> to vector<1x1x8xf32>
    %139 = vector.broadcast %138 : vector<1x1x8xf32> to vector<9x9x8xf32>
    %140 = arith.addf %137, %139 : vector<9x9x8xf32>
    %cst_69 = arith.constant 0.000000e+00 : f32
    %141 = vector.broadcast %cst_69 : f32 to vector<9x9x8xf32>
    %142 = arith.maximumf %140, %141 : vector<9x9x8xf32>
    %cst_70 = arith.constant 0.000000e+00 : f32
    %143 = vector.broadcast %cst_70 : f32 to vector<9x9x8xf32>
    %144 = arith.select %132, %142, %143 : vector<9x9x8xi1>, vector<9x9x8xf32>
    %c3_71 = arith.constant 3 : index
    %c0_72 = arith.constant 0 : index
    %c0_73 = arith.constant 0 : index
    %c0_74 = arith.constant 0 : index
    %145 = vector.load %arg22[%c3_71, %c0_72, %c0_73, %c0_74] : memref<4x9x9x8xf32, #tpu.memory_space<vmem>>, vector<1x9x9x8xf32>
    %146 = vector.shape_cast %145 : vector<1x9x9x8xf32> to vector<9x9x8xf32>
    %147 = vector.shape_cast %144 : vector<9x9x8xf32> to vector<1x9x9x8xf32>
    tpu.vector_store %arg22[%c3_71, %c0_72, %c0_73, %c0_74], %147 {strides = array<i32>} : memref<4x9x9x8xf32, #tpu.memory_space<vmem>>, vector<1x9x9x8xf32>,
    %c3_75 = arith.constant 3 : index
    %c0_76 = arith.constant 0 : index
    %c0_77 = arith.constant 0 : index
    %c0_78 = arith.constant 0 : index
    %148 = vector.load %arg22[%c3_75, %c0_76, %c0_77, %c0_78] : memref<4x9x9x8xf32, #tpu.memory_space<vmem>>, vector<1x8x8x8xf32>
    %149 = vector.shape_cast %148 : vector<1x8x8x8xf32> to vector<8x8x8xf32>
    %150 = vector.shape_cast %149 : vector<8x8x8xf32> to vector<64x8xf32>
    %c0_79 = arith.constant 0 : index
    %c0_80 = arith.constant 0 : index
    %151 = vector.load %arg5[%c0_79, %c0_80] : memref<8x16xf32, #tpu.memory_space<vmem>>, vector<8x16xf32>
    %cst_81 = arith.constant dense<0.000000e+00> : vector<64x16xf32>
    %152 = tpu.matmul %150, %151, %cst_81 {dimension_numbers = #tpu.dot_dimension_numbers<[1], [0], [0], [1], [0, 0, 1, 1], [], []>} : vector<64x8xf32>, vector<8x16xf32>, vector<64x16xf32> -> vector<64x16xf32>
    %c0_82 = arith.constant 0 : index
    %c0_83 = arith.constant 0 : index
    %c0_84 = arith.constant 0 : index
    %c0_85 = arith.constant 0 : index
    %153 = vector.load %arg22[%c0_82, %c0_83, %c0_84, %c0_85] : memref<4x9x9x8xf32, #tpu.memory_space<vmem>>, vector<1x8x8x8xf32>
    %154 = vector.shape_cast %153 : vector<1x8x8x8xf32> to vector<8x8x8xf32>
    %155 = vector.shape_cast %154 : vector<8x8x8xf32> to vector<64x8xf32>
    %c1_86 = arith.constant 1 : index
    %c0_87 = arith.constant 0 : index
    %c0_88 = arith.constant 0 : index
    %c0_89 = arith.constant 0 : index
    %156 = vector.load %arg22[%c1_86, %c0_87, %c0_88, %c0_89] : memref<4x9x9x8xf32, #tpu.memory_space<vmem>>, vector<1x8x8x8xf32>
    %157 = vector.shape_cast %156 : vector<1x8x8x8xf32> to vector<8x8x8xf32>
    %158 = vector.shape_cast %157 : vector<8x8x8xf32> to vector<64x8xf32>
    %c0_90 = arith.constant 0 : index
    %c0_91 = arith.constant 0 : index
    %c1_92 = arith.constant 1 : index
    %c0_93 = arith.constant 0 : index
    %159 = vector.load %arg22[%c0_90, %c0_91, %c1_92, %c0_93] : memref<4x9x9x8xf32, #tpu.memory_space<vmem>>, vector<1x8x8x8xf32>
    %160 = vector.shape_cast %159 : vector<1x8x8x8xf32> to vector<8x8x8xf32>
    %161 = vector.shape_cast %160 : vector<8x8x8xf32> to vector<64x8xf32>
    %c2_94 = arith.constant 2 : index
    %c0_95 = arith.constant 0 : index
    %c0_96 = arith.constant 0 : index
    %c0_97 = arith.constant 0 : index
    %162 = vector.load %arg22[%c2_94, %c0_95, %c0_96, %c0_97] : memref<4x9x9x8xf32, #tpu.memory_space<vmem>>, vector<1x8x8x8xf32>
    %163 = vector.shape_cast %162 : vector<1x8x8x8xf32> to vector<8x8x8xf32>
    %164 = vector.shape_cast %163 : vector<8x8x8xf32> to vector<64x8xf32>
    %c3_98 = arith.constant 3 : index
    %c0_99 = arith.constant 0 : index
    %c0_100 = arith.constant 0 : index
    %c0_101 = arith.constant 0 : index
    %165 = vector.load %arg22[%c3_98, %c0_99, %c0_100, %c0_101] : memref<4x9x9x8xf32, #tpu.memory_space<vmem>>, vector<1x8x8x8xf32>
    %166 = vector.shape_cast %165 : vector<1x8x8x8xf32> to vector<8x8x8xf32>
    %167 = vector.shape_cast %166 : vector<8x8x8xf32> to vector<64x8xf32>
    %c2_102 = arith.constant 2 : index
    %c0_103 = arith.constant 0 : index
    %c1_104 = arith.constant 1 : index
    %c0_105 = arith.constant 0 : index
    %168 = vector.load %arg22[%c2_102, %c0_103, %c1_104, %c0_105] : memref<4x9x9x8xf32, #tpu.memory_space<vmem>>, vector<1x8x8x8xf32>
    %169 = vector.shape_cast %168 : vector<1x8x8x8xf32> to vector<8x8x8xf32>
    %170 = vector.shape_cast %169 : vector<8x8x8xf32> to vector<64x8xf32>
    %c0_106 = arith.constant 0 : index
    %c1_107 = arith.constant 1 : index
    %c0_108 = arith.constant 0 : index
    %c0_109 = arith.constant 0 : index
    %171 = vector.load %arg22[%c0_106, %c1_107, %c0_108, %c0_109] : memref<4x9x9x8xf32, #tpu.memory_space<vmem>>, vector<1x8x8x8xf32>
    %172 = vector.shape_cast %171 : vector<1x8x8x8xf32> to vector<8x8x8xf32>
    %173 = vector.shape_cast %172 : vector<8x8x8xf32> to vector<64x8xf32>
    %c1_110 = arith.constant 1 : index
    %c1_111 = arith.constant 1 : index
    %c0_112 = arith.constant 0 : index
    %c0_113 = arith.constant 0 : index
    %174 = vector.load %arg22[%c1_110, %c1_111, %c0_112, %c0_113] : memref<4x9x9x8xf32, #tpu.memory_space<vmem>>, vector<1x8x8x8xf32>
    %175 = vector.shape_cast %174 : vector<1x8x8x8xf32> to vector<8x8x8xf32>
    %176 = vector.shape_cast %175 : vector<8x8x8xf32> to vector<64x8xf32>
    %c0_114 = arith.constant 0 : index
    %c1_115 = arith.constant 1 : index
    %c1_116 = arith.constant 1 : index
    %c0_117 = arith.constant 0 : index
    %177 = vector.load %arg22[%c0_114, %c1_115, %c1_116, %c0_117] : memref<4x9x9x8xf32, #tpu.memory_space<vmem>>, vector<1x8x8x8xf32>
    %178 = vector.shape_cast %177 : vector<1x8x8x8xf32> to vector<8x8x8xf32>
    %179 = vector.shape_cast %178 : vector<8x8x8xf32> to vector<64x8xf32>
    %180 = tpu.concatenate %155, %158, %161, %164, %167, %170, %173, %176, %179 in 1 : vector<64x8xf32>, vector<64x8xf32>, vector<64x8xf32>, vector<64x8xf32>, vector<64x8xf32>, vector<64x8xf32>, vector<64x8xf32>, vector<64x8xf32>, vector<64x8xf32> -> vector<64x72xf32>
    %c0_118 = arith.constant 0 : index
    %c0_119 = arith.constant 0 : index
    %181 = vector.load %arg4[%c0_118, %c0_119] : memref<72x16xf32, #tpu.memory_space<vmem>>, vector<72x16xf32>
    %cst_120 = arith.constant dense<0.000000e+00> : vector<64x16xf32>
    %182 = tpu.matmul %180, %181, %cst_120 {dimension_numbers = #tpu.dot_dimension_numbers<[1], [0], [0], [1], [0, 0, 1, 1], [], []>} : vector<64x72xf32>, vector<72x16xf32>, vector<64x16xf32> -> vector<64x16xf32>
    %c0_121 = arith.constant 0 : index
    %c0_122 = arith.constant 0 : index
    %183 = vector.load %arg6[%c0_121, %c0_122] : memref<1x16xf32, #tpu.memory_space<vmem>>, vector<1x16xf32>
    %184 = vector.broadcast %183 : vector<1x16xf32> to vector<64x16xf32>
    %185 = arith.mulf %182, %184 : vector<64x16xf32>
    %c0_123 = arith.constant 0 : index
    %c0_124 = arith.constant 0 : index
    %186 = vector.load %arg7[%c0_123, %c0_124] : memref<1x16xf32, #tpu.memory_space<vmem>>, vector<1x16xf32>
    %187 = vector.broadcast %186 : vector<1x16xf32> to vector<64x16xf32>
    %188 = arith.addf %185, %187 : vector<64x16xf32>
    %cst_125 = arith.constant 0.000000e+00 : f32
    %189 = vector.broadcast %cst_125 : f32 to vector<64x16xf32>
    %190 = arith.maximumf %188, %189 : vector<64x16xf32>
    %191 = vector.shape_cast %190 : vector<64x16xf32> to vector<8x8x16xf32>
    %c1_126 = arith.constant 1 : index
    %c1_127 = arith.constant 1 : index
    %c0_128 = arith.constant 0 : index
    %192 = vector.load %arg23[%c1_126, %c1_127, %c0_128] : memref<10x10x16xf32, #tpu.memory_space<vmem>>, vector<8x8x16xf32>
    tpu.vector_store %arg23[%c1_126, %c1_127, %c0_128], %191 {strides = array<i32>} : memref<10x10x16xf32, #tpu.memory_space<vmem>>, vector<8x8x16xf32>,
    %c0_129 = arith.constant 0 : index
    %c0_130 = arith.constant 0 : index
    %c0_131 = arith.constant 0 : index
    %193 = vector.load %arg23[%c0_129, %c0_130, %c0_131] : memref<10x10x16xf32, #tpu.memory_space<vmem>>, vector<8x8x16xf32>
    %194 = vector.shape_cast %193 : vector<8x8x16xf32> to vector<64x16xf32>
    %c0_132 = arith.constant 0 : index
    %c1_133 = arith.constant 1 : index
    %c0_134 = arith.constant 0 : index
    %195 = vector.load %arg23[%c0_132, %c1_133, %c0_134] : memref<10x10x16xf32, #tpu.memory_space<vmem>>, vector<8x8x16xf32>
    %196 = vector.shape_cast %195 : vector<8x8x16xf32> to vector<64x16xf32>
    %c0_135 = arith.constant 0 : index
    %c2_136 = arith.constant 2 : index
    %c0_137 = arith.constant 0 : index
    %197 = vector.load %arg23[%c0_135, %c2_136, %c0_137] : memref<10x10x16xf32, #tpu.memory_space<vmem>>, vector<8x8x16xf32>
    %198 = vector.shape_cast %197 : vector<8x8x16xf32> to vector<64x16xf32>
    %c1_138 = arith.constant 1 : index
    %c0_139 = arith.constant 0 : index
    %c0_140 = arith.constant 0 : index
    %199 = vector.load %arg23[%c1_138, %c0_139, %c0_140] : memref<10x10x16xf32, #tpu.memory_space<vmem>>, vector<8x8x16xf32>
    %200 = vector.shape_cast %199 : vector<8x8x16xf32> to vector<64x16xf32>
    %c1_141 = arith.constant 1 : index
    %c1_142 = arith.constant 1 : index
    %c0_143 = arith.constant 0 : index
    %201 = vector.load %arg23[%c1_141, %c1_142, %c0_143] : memref<10x10x16xf32, #tpu.memory_space<vmem>>, vector<8x8x16xf32>
    %202 = vector.shape_cast %201 : vector<8x8x16xf32> to vector<64x16xf32>
    %c1_144 = arith.constant 1 : index
    %c2_145 = arith.constant 2 : index
    %c0_146 = arith.constant 0 : index
    %203 = vector.load %arg23[%c1_144, %c2_145, %c0_146] : memref<10x10x16xf32, #tpu.memory_space<vmem>>, vector<8x8x16xf32>
    %204 = vector.shape_cast %203 : vector<8x8x16xf32> to vector<64x16xf32>
    %c2_147 = arith.constant 2 : index
    %c0_148 = arith.constant 0 : index
    %c0_149 = arith.constant 0 : index
    %205 = vector.load %arg23[%c2_147, %c0_148, %c0_149] : memref<10x10x16xf32, #tpu.memory_space<vmem>>, vector<8x8x16xf32>
    %206 = vector.shape_cast %205 : vector<8x8x16xf32> to vector<64x16xf32>
    %c2_150 = arith.constant 2 : index
    %c1_151 = arith.constant 1 : index
    %c0_152 = arith.constant 0 : index
    %207 = vector.load %arg23[%c2_150, %c1_151, %c0_152] : memref<10x10x16xf32, #tpu.memory_space<vmem>>, vector<8x8x16xf32>
    %208 = vector.shape_cast %207 : vector<8x8x16xf32> to vector<64x16xf32>
    %c2_153 = arith.constant 2 : index
    %c2_154 = arith.constant 2 : index
    %c0_155 = arith.constant 0 : index
    %209 = vector.load %arg23[%c2_153, %c2_154, %c0_155] : memref<10x10x16xf32, #tpu.memory_space<vmem>>, vector<8x8x16xf32>
    %210 = vector.shape_cast %209 : vector<8x8x16xf32> to vector<64x16xf32>
    %211 = tpu.concatenate %194, %196, %198, %200, %202, %204, %206, %208, %210 in 1 : vector<64x16xf32>, vector<64x16xf32>, vector<64x16xf32>, vector<64x16xf32>, vector<64x16xf32>, vector<64x16xf32>, vector<64x16xf32>, vector<64x16xf32>, vector<64x16xf32> -> vector<64x144xf32>
    %c0_156 = arith.constant 0 : index
    %c0_157 = arith.constant 0 : index
    %212 = vector.load %arg8[%c0_156, %c0_157] : memref<144x16xf32, #tpu.memory_space<vmem>>, vector<144x16xf32>
    %cst_158 = arith.constant dense<0.000000e+00> : vector<64x16xf32>
    %213 = tpu.matmul %211, %212, %cst_158 {dimension_numbers = #tpu.dot_dimension_numbers<[1], [0], [0], [1], [0, 0, 1, 1], [], []>} : vector<64x144xf32>, vector<144x16xf32>, vector<64x16xf32> -> vector<64x16xf32>
    %214 = arith.addf %213, %152 : vector<64x16xf32>
    %c0_159 = arith.constant 0 : index
    %c0_160 = arith.constant 0 : index
    %215 = vector.load %arg9[%c0_159, %c0_160] : memref<1x16xf32, #tpu.memory_space<vmem>>, vector<1x16xf32>
    %216 = vector.broadcast %215 : vector<1x16xf32> to vector<64x16xf32>
    %217 = arith.mulf %214, %216 : vector<64x16xf32>
    %c0_161 = arith.constant 0 : index
    %c0_162 = arith.constant 0 : index
    %218 = vector.load %arg10[%c0_161, %c0_162] : memref<1x16xf32, #tpu.memory_space<vmem>>, vector<1x16xf32>
    %219 = vector.broadcast %218 : vector<1x16xf32> to vector<64x16xf32>
    %220 = arith.addf %217, %219 : vector<64x16xf32>
    %cst_163 = arith.constant 0.000000e+00 : f32
    %221 = vector.broadcast %cst_163 : f32 to vector<64x16xf32>
    %222 = arith.maximumf %220, %221 : vector<64x16xf32>
    %223 = vector.shape_cast %222 : vector<64x16xf32> to vector<8x8x16xf32>
    %c1_164 = arith.constant 1 : index
    %c1_165 = arith.constant 1 : index
    %c0_166 = arith.constant 0 : index
    %224 = vector.load %arg23[%c1_164, %c1_165, %c0_166] : memref<10x10x16xf32, #tpu.memory_space<vmem>>, vector<8x8x16xf32>
    tpu.vector_store %arg23[%c1_164, %c1_165, %c0_166], %223 {strides = array<i32>} : memref<10x10x16xf32, #tpu.memory_space<vmem>>, vector<8x8x16xf32>,
    %c0_167 = arith.constant 0 : index
    %c0_168 = arith.constant 0 : index
    %c0_169 = arith.constant 0 : index
    %225 = vector.load %arg23[%c0_167, %c0_168, %c0_169] : memref<10x10x16xf32, #tpu.memory_space<vmem>>, vector<8x8x16xf32>
    %226 = vector.shape_cast %225 : vector<8x8x16xf32> to vector<64x16xf32>
    %c0_170 = arith.constant 0 : index
    %c1_171 = arith.constant 1 : index
    %c0_172 = arith.constant 0 : index
    %227 = vector.load %arg23[%c0_170, %c1_171, %c0_172] : memref<10x10x16xf32, #tpu.memory_space<vmem>>, vector<8x8x16xf32>
    %228 = vector.shape_cast %227 : vector<8x8x16xf32> to vector<64x16xf32>
    %c0_173 = arith.constant 0 : index
    %c2_174 = arith.constant 2 : index
    %c0_175 = arith.constant 0 : index
    %229 = vector.load %arg23[%c0_173, %c2_174, %c0_175] : memref<10x10x16xf32, #tpu.memory_space<vmem>>, vector<8x8x16xf32>
    %230 = vector.shape_cast %229 : vector<8x8x16xf32> to vector<64x16xf32>
    %c1_176 = arith.constant 1 : index
    %c0_177 = arith.constant 0 : index
    %c0_178 = arith.constant 0 : index
    %231 = vector.load %arg23[%c1_176, %c0_177, %c0_178] : memref<10x10x16xf32, #tpu.memory_space<vmem>>, vector<8x8x16xf32>
    %232 = vector.shape_cast %231 : vector<8x8x16xf32> to vector<64x16xf32>
    %c1_179 = arith.constant 1 : index
    %c1_180 = arith.constant 1 : index
    %c0_181 = arith.constant 0 : index
    %233 = vector.load %arg23[%c1_179, %c1_180, %c0_181] : memref<10x10x16xf32, #tpu.memory_space<vmem>>, vector<8x8x16xf32>
    %234 = vector.shape_cast %233 : vector<8x8x16xf32> to vector<64x16xf32>
    %c1_182 = arith.constant 1 : index
    %c2_183 = arith.constant 2 : index
    %c0_184 = arith.constant 0 : index
    %235 = vector.load %arg23[%c1_182, %c2_183, %c0_184] : memref<10x10x16xf32, #tpu.memory_space<vmem>>, vector<8x8x16xf32>
    %236 = vector.shape_cast %235 : vector<8x8x16xf32> to vector<64x16xf32>
    %c2_185 = arith.constant 2 : index
    %c0_186 = arith.constant 0 : index
    %c0_187 = arith.constant 0 : index
    %237 = vector.load %arg23[%c2_185, %c0_186, %c0_187] : memref<10x10x16xf32, #tpu.memory_space<vmem>>, vector<8x8x16xf32>
    %238 = vector.shape_cast %237 : vector<8x8x16xf32> to vector<64x16xf32>
    %c2_188 = arith.constant 2 : index
    %c1_189 = arith.constant 1 : index
    %c0_190 = arith.constant 0 : index
    %239 = vector.load %arg23[%c2_188, %c1_189, %c0_190] : memref<10x10x16xf32, #tpu.memory_space<vmem>>, vector<8x8x16xf32>
    %240 = vector.shape_cast %239 : vector<8x8x16xf32> to vector<64x16xf32>
    %c2_191 = arith.constant 2 : index
    %c2_192 = arith.constant 2 : index
    %c0_193 = arith.constant 0 : index
    %241 = vector.load %arg23[%c2_191, %c2_192, %c0_193] : memref<10x10x16xf32, #tpu.memory_space<vmem>>, vector<8x8x16xf32>
    %242 = vector.shape_cast %241 : vector<8x8x16xf32> to vector<64x16xf32>
    %243 = tpu.concatenate %226, %228, %230, %232, %234, %236, %238, %240, %242 in 1 : vector<64x16xf32>, vector<64x16xf32>, vector<64x16xf32>, vector<64x16xf32>, vector<64x16xf32>, vector<64x16xf32>, vector<64x16xf32>, vector<64x16xf32>, vector<64x16xf32> -> vector<64x144xf32>
    %c0_194 = arith.constant 0 : index
    %c0_195 = arith.constant 0 : index
    %244 = vector.load %arg11[%c0_194, %c0_195] : memref<144x16xf32, #tpu.memory_space<vmem>>, vector<144x16xf32>
    %cst_196 = arith.constant dense<0.000000e+00> : vector<64x16xf32>
    %245 = tpu.matmul %243, %244, %cst_196 {dimension_numbers = #tpu.dot_dimension_numbers<[1], [0], [0], [1], [0, 0, 1, 1], [], []>} : vector<64x144xf32>, vector<144x16xf32>, vector<64x16xf32> -> vector<64x16xf32>
    %c0_197 = arith.constant 0 : index
    %c0_198 = arith.constant 0 : index
    %246 = vector.load %arg12[%c0_197, %c0_198] : memref<1x16xf32, #tpu.memory_space<vmem>>, vector<1x16xf32>
    %247 = vector.broadcast %246 : vector<1x16xf32> to vector<64x16xf32>
    %248 = arith.mulf %245, %247 : vector<64x16xf32>
    %c0_199 = arith.constant 0 : index
    %c0_200 = arith.constant 0 : index
    %249 = vector.load %arg13[%c0_199, %c0_200] : memref<1x16xf32, #tpu.memory_space<vmem>>, vector<1x16xf32>
    %250 = vector.broadcast %249 : vector<1x16xf32> to vector<64x16xf32>
    %251 = arith.addf %248, %250 : vector<64x16xf32>
    %cst_201 = arith.constant 0.000000e+00 : f32
    %252 = vector.broadcast %cst_201 : f32 to vector<64x16xf32>
    %253 = arith.maximumf %251, %252 : vector<64x16xf32>
    %254 = vector.shape_cast %253 : vector<64x16xf32> to vector<8x8x16xf32>
    %c1_202 = arith.constant 1 : index
    %c1_203 = arith.constant 1 : index
    %c0_204 = arith.constant 0 : index
    %255 = vector.load %arg23[%c1_202, %c1_203, %c0_204] : memref<10x10x16xf32, #tpu.memory_space<vmem>>, vector<8x8x16xf32>
    tpu.vector_store %arg23[%c1_202, %c1_203, %c0_204], %254 {strides = array<i32>} : memref<10x10x16xf32, #tpu.memory_space<vmem>>, vector<8x8x16xf32>,
    %c0_205 = arith.constant 0 : index
    %c0_206 = arith.constant 0 : index
    %c0_207 = arith.constant 0 : index
    %256 = vector.load %arg23[%c0_205, %c0_206, %c0_207] : memref<10x10x16xf32, #tpu.memory_space<vmem>>, vector<8x8x16xf32>
    %257 = vector.shape_cast %256 : vector<8x8x16xf32> to vector<64x16xf32>
    %c0_208 = arith.constant 0 : index
    %c1_209 = arith.constant 1 : index
    %c0_210 = arith.constant 0 : index
    %258 = vector.load %arg23[%c0_208, %c1_209, %c0_210] : memref<10x10x16xf32, #tpu.memory_space<vmem>>, vector<8x8x16xf32>
    %259 = vector.shape_cast %258 : vector<8x8x16xf32> to vector<64x16xf32>
    %c0_211 = arith.constant 0 : index
    %c2_212 = arith.constant 2 : index
    %c0_213 = arith.constant 0 : index
    %260 = vector.load %arg23[%c0_211, %c2_212, %c0_213] : memref<10x10x16xf32, #tpu.memory_space<vmem>>, vector<8x8x16xf32>
    %261 = vector.shape_cast %260 : vector<8x8x16xf32> to vector<64x16xf32>
    %c1_214 = arith.constant 1 : index
    %c0_215 = arith.constant 0 : index
    %c0_216 = arith.constant 0 : index
    %262 = vector.load %arg23[%c1_214, %c0_215, %c0_216] : memref<10x10x16xf32, #tpu.memory_space<vmem>>, vector<8x8x16xf32>
    %263 = vector.shape_cast %262 : vector<8x8x16xf32> to vector<64x16xf32>
    %c1_217 = arith.constant 1 : index
    %c1_218 = arith.constant 1 : index
    %c0_219 = arith.constant 0 : index
    %264 = vector.load %arg23[%c1_217, %c1_218, %c0_219] : memref<10x10x16xf32, #tpu.memory_space<vmem>>, vector<8x8x16xf32>
    %265 = vector.shape_cast %264 : vector<8x8x16xf32> to vector<64x16xf32>
    %c1_220 = arith.constant 1 : index
    %c2_221 = arith.constant 2 : index
    %c0_222 = arith.constant 0 : index
    %266 = vector.load %arg23[%c1_220, %c2_221, %c0_222] : memref<10x10x16xf32, #tpu.memory_space<vmem>>, vector<8x8x16xf32>
    %267 = vector.shape_cast %266 : vector<8x8x16xf32> to vector<64x16xf32>
    %c2_223 = arith.constant 2 : index
    %c0_224 = arith.constant 0 : index
    %c0_225 = arith.constant 0 : index
    %268 = vector.load %arg23[%c2_223, %c0_224, %c0_225] : memref<10x10x16xf32, #tpu.memory_space<vmem>>, vector<8x8x16xf32>
    %269 = vector.shape_cast %268 : vector<8x8x16xf32> to vector<64x16xf32>
    %c2_226 = arith.constant 2 : index
    %c1_227 = arith.constant 1 : index
    %c0_228 = arith.constant 0 : index
    %270 = vector.load %arg23[%c2_226, %c1_227, %c0_228] : memref<10x10x16xf32, #tpu.memory_space<vmem>>, vector<8x8x16xf32>
    %271 = vector.shape_cast %270 : vector<8x8x16xf32> to vector<64x16xf32>
    %c2_229 = arith.constant 2 : index
    %c2_230 = arith.constant 2 : index
    %c0_231 = arith.constant 0 : index
    %272 = vector.load %arg23[%c2_229, %c2_230, %c0_231] : memref<10x10x16xf32, #tpu.memory_space<vmem>>, vector<8x8x16xf32>
    %273 = vector.shape_cast %272 : vector<8x8x16xf32> to vector<64x16xf32>
    %274 = tpu.concatenate %257, %259, %261, %263, %265, %267, %269, %271, %273 in 1 : vector<64x16xf32>, vector<64x16xf32>, vector<64x16xf32>, vector<64x16xf32>, vector<64x16xf32>, vector<64x16xf32>, vector<64x16xf32>, vector<64x16xf32>, vector<64x16xf32> -> vector<64x144xf32>
    %c0_232 = arith.constant 0 : index
    %c0_233 = arith.constant 0 : index
    %275 = vector.load %arg14[%c0_232, %c0_233] : memref<144x16xf32, #tpu.memory_space<vmem>>, vector<144x16xf32>
    %cst_234 = arith.constant dense<0.000000e+00> : vector<64x16xf32>
    %276 = tpu.matmul %274, %275, %cst_234 {dimension_numbers = #tpu.dot_dimension_numbers<[1], [0], [0], [1], [0, 0, 1, 1], [], []>} : vector<64x144xf32>, vector<144x16xf32>, vector<64x16xf32> -> vector<64x16xf32>
    %277 = arith.addf %214, %276 : vector<64x16xf32>
    %c0_235 = arith.constant 0 : index
    %c0_236 = arith.constant 0 : index
    %278 = vector.load %arg15[%c0_235, %c0_236] : memref<1x16xf32, #tpu.memory_space<vmem>>, vector<1x16xf32>
    %279 = vector.broadcast %278 : vector<1x16xf32> to vector<64x16xf32>
    %280 = arith.mulf %277, %279 : vector<64x16xf32>
    %c0_237 = arith.constant 0 : index
    %c0_238 = arith.constant 0 : index
    %281 = vector.load %arg16[%c0_237, %c0_238] : memref<1x16xf32, #tpu.memory_space<vmem>>, vector<1x16xf32>
    %282 = vector.broadcast %281 : vector<1x16xf32> to vector<64x16xf32>
    %283 = arith.addf %280, %282 : vector<64x16xf32>
    %cst_239 = arith.constant 0.000000e+00 : f32
    %284 = vector.broadcast %cst_239 : f32 to vector<64x16xf32>
    %285 = arith.maximumf %283, %284 : vector<64x16xf32>
    %286 = vector.shape_cast %285 : vector<64x16xf32> to vector<8x8x16xf32>
    %c1_240 = arith.constant 1 : index
    %c1_241 = arith.constant 1 : index
    %c0_242 = arith.constant 0 : index
    %287 = vector.load %arg23[%c1_240, %c1_241, %c0_242] : memref<10x10x16xf32, #tpu.memory_space<vmem>>, vector<8x8x16xf32>
    tpu.vector_store %arg23[%c1_240, %c1_241, %c0_242], %286 {strides = array<i32>} : memref<10x10x16xf32, #tpu.memory_space<vmem>>, vector<8x8x16xf32>,
    %c0_243 = arith.constant 0 : index
    %c0_244 = arith.constant 0 : index
    %c0_245 = arith.constant 0 : index
    %288 = vector.load %arg23[%c0_243, %c0_244, %c0_245] : memref<10x10x16xf32, #tpu.memory_space<vmem>>, vector<8x8x16xf32>
    %289 = vector.shape_cast %288 : vector<8x8x16xf32> to vector<64x16xf32>
    %c0_246 = arith.constant 0 : index
    %c1_247 = arith.constant 1 : index
    %c0_248 = arith.constant 0 : index
    %290 = vector.load %arg23[%c0_246, %c1_247, %c0_248] : memref<10x10x16xf32, #tpu.memory_space<vmem>>, vector<8x8x16xf32>
    %291 = vector.shape_cast %290 : vector<8x8x16xf32> to vector<64x16xf32>
    %c0_249 = arith.constant 0 : index
    %c2_250 = arith.constant 2 : index
    %c0_251 = arith.constant 0 : index
    %292 = vector.load %arg23[%c0_249, %c2_250, %c0_251] : memref<10x10x16xf32, #tpu.memory_space<vmem>>, vector<8x8x16xf32>
    %293 = vector.shape_cast %292 : vector<8x8x16xf32> to vector<64x16xf32>
    %c1_252 = arith.constant 1 : index
    %c0_253 = arith.constant 0 : index
    %c0_254 = arith.constant 0 : index
    %294 = vector.load %arg23[%c1_252, %c0_253, %c0_254] : memref<10x10x16xf32, #tpu.memory_space<vmem>>, vector<8x8x16xf32>
    %295 = vector.shape_cast %294 : vector<8x8x16xf32> to vector<64x16xf32>
    %c1_255 = arith.constant 1 : index
    %c1_256 = arith.constant 1 : index
    %c0_257 = arith.constant 0 : index
    %296 = vector.load %arg23[%c1_255, %c1_256, %c0_257] : memref<10x10x16xf32, #tpu.memory_space<vmem>>, vector<8x8x16xf32>
    %297 = vector.shape_cast %296 : vector<8x8x16xf32> to vector<64x16xf32>
    %c1_258 = arith.constant 1 : index
    %c2_259 = arith.constant 2 : index
    %c0_260 = arith.constant 0 : index
    %298 = vector.load %arg23[%c1_258, %c2_259, %c0_260] : memref<10x10x16xf32, #tpu.memory_space<vmem>>, vector<8x8x16xf32>
    %299 = vector.shape_cast %298 : vector<8x8x16xf32> to vector<64x16xf32>
    %c2_261 = arith.constant 2 : index
    %c0_262 = arith.constant 0 : index
    %c0_263 = arith.constant 0 : index
    %300 = vector.load %arg23[%c2_261, %c0_262, %c0_263] : memref<10x10x16xf32, #tpu.memory_space<vmem>>, vector<8x8x16xf32>
    %301 = vector.shape_cast %300 : vector<8x8x16xf32> to vector<64x16xf32>
    %c2_264 = arith.constant 2 : index
    %c1_265 = arith.constant 1 : index
    %c0_266 = arith.constant 0 : index
    %302 = vector.load %arg23[%c2_264, %c1_265, %c0_266] : memref<10x10x16xf32, #tpu.memory_space<vmem>>, vector<8x8x16xf32>
    %303 = vector.shape_cast %302 : vector<8x8x16xf32> to vector<64x16xf32>
    %c2_267 = arith.constant 2 : index
    %c2_268 = arith.constant 2 : index
    %c0_269 = arith.constant 0 : index
    %304 = vector.load %arg23[%c2_267, %c2_268, %c0_269] : memref<10x10x16xf32, #tpu.memory_space<vmem>>, vector<8x8x16xf32>
    %305 = vector.shape_cast %304 : vector<8x8x16xf32> to vector<64x16xf32>
    %306 = tpu.concatenate %289, %291, %293, %295, %297, %299, %301, %303, %305 in 1 : vector<64x16xf32>, vector<64x16xf32>, vector<64x16xf32>, vector<64x16xf32>, vector<64x16xf32>, vector<64x16xf32>, vector<64x16xf32>, vector<64x16xf32>, vector<64x16xf32> -> vector<64x144xf32>
    %c0_270 = arith.constant 0 : index
    %c0_271 = arith.constant 0 : index
    %307 = vector.load %arg17[%c0_270, %c0_271] : memref<144x16xf32, #tpu.memory_space<vmem>>, vector<144x16xf32>
    %cst_272 = arith.constant dense<0.000000e+00> : vector<64x16xf32>
    %308 = tpu.matmul %306, %307, %cst_272 {dimension_numbers = #tpu.dot_dimension_numbers<[1], [0], [0], [1], [0, 0, 1, 1], [], []>} : vector<64x144xf32>, vector<144x16xf32>, vector<64x16xf32> -> vector<64x16xf32>
    %c0_273 = arith.constant 0 : index
    %c0_274 = arith.constant 0 : index
    %309 = vector.load %arg18[%c0_273, %c0_274] : memref<1x16xf32, #tpu.memory_space<vmem>>, vector<1x16xf32>
    %310 = vector.broadcast %309 : vector<1x16xf32> to vector<64x16xf32>
    %311 = arith.mulf %308, %310 : vector<64x16xf32>
    %c0_275 = arith.constant 0 : index
    %c0_276 = arith.constant 0 : index
    %312 = vector.load %arg19[%c0_275, %c0_276] : memref<1x16xf32, #tpu.memory_space<vmem>>, vector<1x16xf32>
    %313 = vector.broadcast %312 : vector<1x16xf32> to vector<64x16xf32>
    %314 = arith.addf %311, %313 : vector<64x16xf32>
    %cst_277 = arith.constant 0.000000e+00 : f32
    %315 = vector.broadcast %cst_277 : f32 to vector<64x16xf32>
    %316 = arith.maximumf %314, %315 : vector<64x16xf32>
    %317 = vector.shape_cast %316 : vector<64x16xf32> to vector<8x8x16xf32>
    %c1_278 = arith.constant 1 : index
    %c1_279 = arith.constant 1 : index
    %c0_280 = arith.constant 0 : index
    %318 = vector.load %arg23[%c1_278, %c1_279, %c0_280] : memref<10x10x16xf32, #tpu.memory_space<vmem>>, vector<8x8x16xf32>
    tpu.vector_store %arg23[%c1_278, %c1_279, %c0_280], %317 {strides = array<i32>} : memref<10x10x16xf32, #tpu.memory_space<vmem>>, vector<8x8x16xf32>,
    %c0_281 = arith.constant 0 : index
    %c0_282 = arith.constant 0 : index
    %c0_283 = arith.constant 0 : index
    %319 = vector.load %arg23[%c0_281, %c0_282, %c0_283] : memref<10x10x16xf32, #tpu.memory_space<vmem>>, vector<8x8x16xf32>
    %320 = vector.shape_cast %319 : vector<8x8x16xf32> to vector<64x16xf32>
    %c0_284 = arith.constant 0 : index
    %c1_285 = arith.constant 1 : index
    %c0_286 = arith.constant 0 : index
    %321 = vector.load %arg23[%c0_284, %c1_285, %c0_286] : memref<10x10x16xf32, #tpu.memory_space<vmem>>, vector<8x8x16xf32>
    %322 = vector.shape_cast %321 : vector<8x8x16xf32> to vector<64x16xf32>
    %c0_287 = arith.constant 0 : index
    %c2_288 = arith.constant 2 : index
    %c0_289 = arith.constant 0 : index
    %323 = vector.load %arg23[%c0_287, %c2_288, %c0_289] : memref<10x10x16xf32, #tpu.memory_space<vmem>>, vector<8x8x16xf32>
    %324 = vector.shape_cast %323 : vector<8x8x16xf32> to vector<64x16xf32>
    %c1_290 = arith.constant 1 : index
    %c0_291 = arith.constant 0 : index
    %c0_292 = arith.constant 0 : index
    %325 = vector.load %arg23[%c1_290, %c0_291, %c0_292] : memref<10x10x16xf32, #tpu.memory_space<vmem>>, vector<8x8x16xf32>
    %326 = vector.shape_cast %325 : vector<8x8x16xf32> to vector<64x16xf32>
    %c1_293 = arith.constant 1 : index
    %c1_294 = arith.constant 1 : index
    %c0_295 = arith.constant 0 : index
    %327 = vector.load %arg23[%c1_293, %c1_294, %c0_295] : memref<10x10x16xf32, #tpu.memory_space<vmem>>, vector<8x8x16xf32>
    %328 = vector.shape_cast %327 : vector<8x8x16xf32> to vector<64x16xf32>
    %c1_296 = arith.constant 1 : index
    %c2_297 = arith.constant 2 : index
    %c0_298 = arith.constant 0 : index
    %329 = vector.load %arg23[%c1_296, %c2_297, %c0_298] : memref<10x10x16xf32, #tpu.memory_space<vmem>>, vector<8x8x16xf32>
    %330 = vector.shape_cast %329 : vector<8x8x16xf32> to vector<64x16xf32>
    %c2_299 = arith.constant 2 : index
    %c0_300 = arith.constant 0 : index
    %c0_301 = arith.constant 0 : index
    %331 = vector.load %arg23[%c2_299, %c0_300, %c0_301] : memref<10x10x16xf32, #tpu.memory_space<vmem>>, vector<8x8x16xf32>
    %332 = vector.shape_cast %331 : vector<8x8x16xf32> to vector<64x16xf32>
    %c2_302 = arith.constant 2 : index
    %c1_303 = arith.constant 1 : index
    %c0_304 = arith.constant 0 : index
    %333 = vector.load %arg23[%c2_302, %c1_303, %c0_304] : memref<10x10x16xf32, #tpu.memory_space<vmem>>, vector<8x8x16xf32>
    %334 = vector.shape_cast %333 : vector<8x8x16xf32> to vector<64x16xf32>
    %c2_305 = arith.constant 2 : index
    %c2_306 = arith.constant 2 : index
    %c0_307 = arith.constant 0 : index
    %335 = vector.load %arg23[%c2_305, %c2_306, %c0_307] : memref<10x10x16xf32, #tpu.memory_space<vmem>>, vector<8x8x16xf32>
    %336 = vector.shape_cast %335 : vector<8x8x16xf32> to vector<64x16xf32>
    %337 = tpu.concatenate %320, %322, %324, %326, %328, %330, %332, %334, %336 in 1 : vector<64x16xf32>, vector<64x16xf32>, vector<64x16xf32>, vector<64x16xf32>, vector<64x16xf32>, vector<64x16xf32>, vector<64x16xf32>, vector<64x16xf32>, vector<64x16xf32> -> vector<64x144xf32>
    %c0_308 = arith.constant 0 : index
    %c0_309 = arith.constant 0 : index
    %338 = vector.load %arg20[%c0_308, %c0_309] : memref<144x16xf32, #tpu.memory_space<vmem>>, vector<144x16xf32>
    %cst_310 = arith.constant dense<0.000000e+00> : vector<64x16xf32>
    %339 = tpu.matmul %337, %338, %cst_310 {dimension_numbers = #tpu.dot_dimension_numbers<[1], [0], [0], [1], [0, 0, 1, 1], [], []>} : vector<64x144xf32>, vector<144x16xf32>, vector<64x16xf32> -> vector<64x16xf32>
    %340 = arith.addf %277, %339 : vector<64x16xf32>
    %c0_311 = arith.constant 0 : index
    %c0_312 = arith.constant 0 : index
    %c0_313 = arith.constant 0 : index
    %341 = vector.load %arg21[%c0_311, %c0_312, %c0_313] : memref<1x64x16xf32, #tpu.memory_space<vmem>>, vector<1x64x16xf32>
    %342 = vector.shape_cast %341 : vector<1x64x16xf32> to vector<64x16xf32>
    %343 = vector.shape_cast %340 : vector<64x16xf32> to vector<1x64x16xf32>
    tpu.vector_store %arg21[%c0_311, %c0_312, %c0_313], %343 {strides = array<i32>} : memref<1x64x16xf32, #tpu.memory_space<vmem>>, vector<1x64x16xf32>,
    return
  }
  func.func @transform_0(%arg0: i32) -> (i32, i32, i32, i32, i32) {
    %c0_i32 = arith.constant 0 : i32
    %c0_i32_0 = arith.constant 0 : i32
    %c0_i32_1 = arith.constant 0 : i32
    %c0_i32_2 = arith.constant 0 : i32
    %c0_i32_3 = arith.constant 0 : i32
    return %arg0, %c0_i32, %c0_i32_0, %c0_i32_1, %c0_i32_2 : i32, i32, i32, i32, i32
  }
  func.func @transform_1(%arg0: i32) -> (i32, i32) {
    %c0_i32 = arith.constant 0 : i32
    %c0_i32_0 = arith.constant 0 : i32
    %c0_i32_1 = arith.constant 0 : i32
    return %c0_i32, %c0_i32_0 : i32, i32
  }
  func.func @transform_2(%arg0: i32) -> (i32, i32) {
    %c0_i32 = arith.constant 0 : i32
    %c0_i32_0 = arith.constant 0 : i32
    %c0_i32_1 = arith.constant 0 : i32
    return %c0_i32, %c0_i32_0 : i32, i32
  }
  func.func @transform_3(%arg0: i32) -> (i32, i32) {
    %c0_i32 = arith.constant 0 : i32
    %c0_i32_0 = arith.constant 0 : i32
    %c0_i32_1 = arith.constant 0 : i32
    return %c0_i32, %c0_i32_0 : i32, i32
  }
  func.func @transform_4(%arg0: i32) -> (i32, i32) {
    %c0_i32 = arith.constant 0 : i32
    %c0_i32_0 = arith.constant 0 : i32
    %c0_i32_1 = arith.constant 0 : i32
    return %c0_i32, %c0_i32_0 : i32, i32
  }
  func.func @transform_5(%arg0: i32) -> (i32, i32) {
    %c0_i32 = arith.constant 0 : i32
    %c0_i32_0 = arith.constant 0 : i32
    %c0_i32_1 = arith.constant 0 : i32
    return %c0_i32, %c0_i32_0 : i32, i32
  }
  func.func @transform_6(%arg0: i32) -> (i32, i32) {
    %c0_i32 = arith.constant 0 : i32
    %c0_i32_0 = arith.constant 0 : i32
    %c0_i32_1 = arith.constant 0 : i32
    return %c0_i32, %c0_i32_0 : i32, i32
  }
  func.func @transform_7(%arg0: i32) -> (i32, i32) {
    %c0_i32 = arith.constant 0 : i32
    %c0_i32_0 = arith.constant 0 : i32
    %c0_i32_1 = arith.constant 0 : i32
    return %c0_i32, %c0_i32_0 : i32, i32
  }
  func.func @transform_8(%arg0: i32) -> (i32, i32) {
    %c0_i32 = arith.constant 0 : i32
    %c0_i32_0 = arith.constant 0 : i32
    %c0_i32_1 = arith.constant 0 : i32
    return %c0_i32, %c0_i32_0 : i32, i32
  }
  func.func @transform_9(%arg0: i32) -> (i32, i32) {
    %c0_i32 = arith.constant 0 : i32
    %c0_i32_0 = arith.constant 0 : i32
    %c0_i32_1 = arith.constant 0 : i32
    return %c0_i32, %c0_i32_0 : i32, i32
  }
  func.func @transform_10(%arg0: i32) -> (i32, i32) {
    %c0_i32 = arith.constant 0 : i32
    %c0_i32_0 = arith.constant 0 : i32
    %c0_i32_1 = arith.constant 0 : i32
    return %c0_i32, %c0_i32_0 : i32, i32
  }
  func.func @transform_11(%arg0: i32) -> (i32, i32) {
    %c0_i32 = arith.constant 0 : i32
    %c0_i32_0 = arith.constant 0 : i32
    %c0_i32_1 = arith.constant 0 : i32
    return %c0_i32, %c0_i32_0 : i32, i32
  }
  func.func @transform_12(%arg0: i32) -> (i32, i32) {
    %c0_i32 = arith.constant 0 : i32
    %c0_i32_0 = arith.constant 0 : i32
    %c0_i32_1 = arith.constant 0 : i32
    return %c0_i32, %c0_i32_0 : i32, i32
  }
  func.func @transform_13(%arg0: i32) -> (i32, i32) {
    %c0_i32 = arith.constant 0 : i32
    %c0_i32_0 = arith.constant 0 : i32
    %c0_i32_1 = arith.constant 0 : i32
    return %c0_i32, %c0_i32_0 : i32, i32
  }
  func.func @transform_14(%arg0: i32) -> (i32, i32) {
    %c0_i32 = arith.constant 0 : i32
    %c0_i32_0 = arith.constant 0 : i32
    %c0_i32_1 = arith.constant 0 : i32
    return %c0_i32, %c0_i32_0 : i32, i32
  }
  func.func @transform_15(%arg0: i32) -> (i32, i32) {
    %c0_i32 = arith.constant 0 : i32
    %c0_i32_0 = arith.constant 0 : i32
    %c0_i32_1 = arith.constant 0 : i32
    return %c0_i32, %c0_i32_0 : i32, i32
  }
  func.func @transform_16(%arg0: i32) -> (i32, i32) {
    %c0_i32 = arith.constant 0 : i32
    %c0_i32_0 = arith.constant 0 : i32
    %c0_i32_1 = arith.constant 0 : i32
    return %c0_i32, %c0_i32_0 : i32, i32
  }
  func.func @transform_17(%arg0: i32) -> (i32, i32) {
    %c0_i32 = arith.constant 0 : i32
    %c0_i32_0 = arith.constant 0 : i32
    %c0_i32_1 = arith.constant 0 : i32
    return %c0_i32, %c0_i32_0 : i32, i32
  }
  func.func @transform_18(%arg0: i32) -> (i32, i32) {
    %c0_i32 = arith.constant 0 : i32
    %c0_i32_0 = arith.constant 0 : i32
    %c0_i32_1 = arith.constant 0 : i32
    return %c0_i32, %c0_i32_0 : i32, i32
  }
  func.func @transform_19(%arg0: i32) -> (i32, i32) {
    %c0_i32 = arith.constant 0 : i32
    %c0_i32_0 = arith.constant 0 : i32
    %c0_i32_1 = arith.constant 0 : i32
    return %c0_i32, %c0_i32_0 : i32, i32
  }
  func.func @transform_20(%arg0: i32) -> (i32, i32, i32) {
    %c0_i32 = arith.constant 0 : i32
    %c0_i32_0 = arith.constant 0 : i32
    %c0_i32_1 = arith.constant 0 : i32
    return %arg0, %c0_i32, %c0_i32_0 : i32, i32, i32
  }
}

</mosaic_0001>

<bundles_post_ra>
// kernel: block_forward.1
= control target key start
LH: loop header
LB: loop body
LE: loop exit
PB: predicated region body
PF: predicated region fallthrough
CT: control target
= control target key end

     0   :  { %s7923_s0 = inlined_call_operand.vmem [shape: f32[2,4,9,9,8], index: 0, kind: input, shape index: {}]   ;;  %s7924_s1 = inlined_call_operand.vmem [shape: f32[1,8], index: 1, kind: input, shape index: {}]   ;;  %s7925_s2 = inlined_call_operand.vmem [shape: f32[1,8], index: 2, kind: input, shape index: {}]   ;;  %s7926_s3 = inlined_call_operand.vmem [shape: f32[72,16], index: 3, kind: input, shape index: {}]   ;;  %s7927_s4 = inlined_call_operand.vmem [shape: f32[8,16], index: 4, kind: input, shape index: {}]   ;;  %s7928_s5 = inlined_call_operand.vmem [shape: f32[1,16], index: 5, kind: input, shape index: {}]   ;;  %s7929_s6 = inlined_call_operand.vmem [shape: f32[1,16], index: 6, kind: input, shape index: {}]   ;;  %s7930_s7 = inlined_call_operand.vmem [shape: f32[144,16], index: 7, kind: input, shape index: {}]   ;;  %s7931_s8 = inlined_call_operand.vmem [shape: f32[1,16], index: 8, kind: input, shape index: {}]   ;;  %s7932_s9 = inlined_call_operand.vmem [shape: f32[1,16], index: 9, kind: input, shape index: {}]   ;;  %s7933_s10 = inlined_call_operand.vmem [shape: f32[144,16], index: 10, kind: input, shape index: {}]   ;;  %s7934_s11 = inlined_call_operand.vmem [shape: f32[1,16], index: 11, kind: input, shape index: {}]   ;;  %s7935_s12 = inlined_call_operand.vmem [shape: f32[1,16], index: 12, kind: input, shape index: {}]   ;;  %s7936_s13 = inlined_call_operand.vmem [shape: f32[144,16], index: 13, kind: input, shape index: {}]   ;;  %s7937_s14 = inlined_call_operand.vmem [shape: f32[1,16], index: 14, kind: input, shape index: {}]   ;;  %s7938_s15 = inlined_call_operand.vmem [shape: f32[1,16], index: 15, kind: input, shape index: {}]   ;;  %s7939_s16 = inlined_call_operand.vmem [shape: f32[144,16], index: 16, kind: input, shape index: {}]   ;;  %s7940_s17 = inlined_call_operand.vmem [shape: f32[1,16], index: 17, kind: input, shape index: {}]   ;;  %s7941_s18 = inlined_call_operand.vmem [shape: f32[1,16], index: 18, kind: input, shape index: {}]   ;;  %s7942_s19 = inlined_call_operand.vmem [shape: f32[144,16], index: 19, kind: input, shape index: {}]   ;;  %s7943_s20 = inlined_call_operand.hbm [shape: f32[2,64,16], index: 20, kind: output, shape index: {}]  }
   0x1   :  { %7966 = sst [smem:[#allocation13_spill]] %s7923_s0 }
   0x2   :  { %7967 = sst [smem:[#allocation14_spill]] %s7924_s1 }
   0x3   :  { %7968 = sst [smem:[#allocation15_spill]] %s7925_s2 }
   0x4   :  { %7969 = sst [smem:[#allocation16_spill]] %s7926_s3 }
   0x5   :  { %7970 = sst [smem:[#allocation17_spill]] %s7927_s4 }
   0x6   :  { %7971 = sst [smem:[#allocation18_spill]] %s7928_s5 }
   0x7   :  { %7972 = sst [smem:[#allocation19_spill]] %s7929_s6 }
   0x8   :  { %7973 = sst [smem:[#allocation20_spill]] %s7930_s7 }
   0x9   :  { %7974 = sst [smem:[#allocation21_spill]] %s7931_s8 }
   0xa   :  { %25 = vsyncpa [#allocation5], 0 }
   0xb   :  { %27 = vsyncpa [#allocation5 + $0x1], 0  ;;  %s5740_s1 = smov 0   ;;  %s5742_s22 = smov 0  }
   0xc   :  { %s5744_s23 = smov 0   ;;  %s5746_s24 = smov 0  }
   0xd LB: > { %7975 = sst [smem:[#allocation7_spill]] %s5607_s1  ;;  %s5761_s2 = sadd.s32 4294967295, %s5619_s24   ;;  %s5619_s24 = sphi %s5746_s24, %s8010_s24   ;;  %s5615_s23 = sphi %s5744_s23, %s8012_s23   ;;  %s5611_s22 = sphi %s5742_s22, %s8014_s22   ;;  %s5607_s1 = sphi %s5740_s1, %s8013_s1  }
   0xe   : > { %7976 = sst [smem:[#allocation8_spill]] %s5615_s23  ;;  %s4626_s25 = sadd.s32 4294967294, %s5619_s24  }
   0xf   : > { %7977 = sst [smem:[#allocation9_spill]] %s5619_s24  ;;  %s5765_s3 = sadd.s32 1, %s5619_s24  }
  0x10   : > { %7978 = sst [smem:[#allocation10_spill]] %s5765_s3  ;;  %s465_s26 = sadd.s32 1, %s5615_s23 }
  0x11   : > { %s462_s27 = ssub.s32 %s5619_s24, %s5765_s3  ;;  %p475_p0 = scmp.ne.s32.totalorder %s5615_s23, %s5611_s22 }
  0x12   : > { %p463_p1 = scmp.eq.s32.totalorder %s462_s27, 0  ;;  %p476_p2 = scmp.eq.s32.totalorder %s5761_s2, 1 }
  0x13   : > { %p481_p3 = scmp.ne.s32.totalorder %s5611_s22, %s5607_s1  ;;  %p482_p4 = scmp.eq.s32.totalorder %s4626_s25, 1 }
  0x14   : > { %s5776_s28 = scalar_select %p463_p1, %s5615_s23, %s465_s26  }
  0x15   : > { %p5778_p5 = por %p476_p2, %p475_p0  ;;  %p5782_p6 = por %p482_p4, %p481_p3 }
  0x16   : > { %7979 = sst [smem:[#allocation11_spill]] %s5776_s28  ;;  %p4629_p7 = scmp.ge.s32.totalorder %s5619_s24, 1 }
  0x17   : > { %s7981_s29 = scalar_select %p5782_p6, 1, 0 }
  0x18   : > { %p565_p8 = scmp.lt.s32.totalorder %s5619_s24, 3 }
  0x19   : > { %7982 = sst [smem:[#allocation12_spill]] %s7981_s29 }
  0x1a   : > { %p566_p9 = pnand %p4629_p7, %p565_p8 }
  0x1b   : > { %p623_p10 = scmp.lt.s32.totalorder (!%p566_p9), %s5761_s2, 1  ;;  %s7983_s26 = sld [smem:[#allocation14_spill]] (!%p566_p9) }
  0x1c   : > { %569 = sbr.rel (%p566_p9) target bundleno = 2228 (0x8b4), region = 100  ;;  %s7984_s23 = sld [smem:[#allocation13_spill]] (!%p566_p9) }
  0x1d   : > { %s7985_s24 = sld [smem:[#allocation15_spill]] (!%p566_p9)  ;;  %s7964_s21 = smov (!%p566_p9), 16  }
  0x1e   : > { %s5624_s29 = smov (!%p566_p9), 24   ;;  %s7962_s1 = smov (!%p566_p9), 32  }
  0x1f   : > { %s7952_s25 = smov (!%p566_p9), 48   ;;  %s5628_s27 = smov (!%p566_p9), 56  }
  0x20   : > { %s7995_s5 = sld [smem:[#allocation18_spill]] (!%p566_p9) }
  0x21   : > { %vm771_vm0 = vcmask 64512   ;;  %vm773_vm1 = vcmask 57344   ;;  %v652_v0 = vlaneseq  ;;  %v5621_v1 = vmov 0.0   ;;  %s624_s30 = scalar_select %p623_p10, %s5761_s2, 1  ;;  %v5799_v5 = vld [vmem:[%s7983_s26] ss:$0 sm:$0xff] }
  0x22   : > { %897 = vst.msk [vmem:[#allocation2 + $0x90] sm:$0xff] %vm771_vm0, %v5621_v1  ;;  %772 = vst.msk [vmem:[#allocation2] sm:$0xff] %vm771_vm0, %v5621_v1  ;;  %s5626_s26 = smov 40   ;;  %vm628_vm11 = vcmask 130048   ;;  %vm630_vm12 = vcmask 123904   ;;  %vm1603_vm13 = vcmask 195584  }
  0x23   : > { %774 = vst.msk [vmem:[#allocation2 + $0x8] sm:$0x1] %vm773_vm1, %v5621_v1  ;;  %v653_v2 = vshrl.u32 %v652_v0, 7  ;;  %s4866_s0 = smul.u32 576, %s624_s30  ;;  %v5809_v8 = vld [vmem:[%s7985_s24] ss:$0 sm:$0xff] }
  0x24   : > { %s7951_s30 = smov 8   ;;  %s7992_s24 = sld [smem:[#allocation16_spill]]  ;;  %629 = vst.msk [vmem:[#allocation3] sm:$0xff] %vm628_vm11, %v5621_v1  ;;  %632 = vst.msk [vmem:[#allocation3 + $0x10] sm:$0xff] %vm628_vm11, %v5621_v1  ;;  %vm1612_vm14 = vcmask 261120   ;;  %vm1621_vm15 = vcmask 326656  }
  0x25   : > { %v655_v3 = vmul.u32 2, %v653_v2  ;;  %v654_v4 = vadd.s32 8, %v653_v2  ;;  %s5804_s3 = scalar_lea.vmem %s7984_s23, %s4866_s0  ;;  %s7960_s23 = smov 64   ;;  %634 = vst.msk [vmem:[#allocation3 + $0x20] sm:$0xff] %vm628_vm11, %v5621_v1  ;;  %636 = vst.msk [vmem:[#allocation3 + $0x30] sm:$0xff] %vm628_vm11, %v5621_v1 }
  0x26   : > { %v4636_v11 = vld [vmem:[%s5804_s3 + $0xa0] sm:$0xff]  ;;  %v671_v13 = vld [vmem:[%s5804_s3 + $0x10] sm:$0xff]  ;;  %v672_v14 = vld [vmem:[%s5804_s3 + $0x18] sm:$0x1]  ;;  %638 = vst.msk [vmem:[#allocation3 + $0x40] sm:$0xff] %vm628_vm11, %v5621_v1  ;;  %s7994_s0 = sld [smem:[#allocation17_spill]] }
  0x27   : > { %v791_v6 = vadd.s32 1, %v655_v3  ;;  %v656_v7 = vmul.u32 2, %v654_v4  ;;  %vm657_vm2 = vcmp.ge.s32.totalorder %v655_v3, 1  ;;  %vm663_vm3 = vcmp.le.s32.totalorder %v655_v3, 16  ;;  %v4652_v31 = vld [vmem:[%s5804_s3 + $0x120] sm:$0xff]  ;;  %v4654_v32 = vld [vmem:[%s5804_s3 + $0x130] sm:$0xff] }
  0x28   : > { %v826_v12 = vmul.f32 %v4636_v11, %v5799_v5  ;;  %v695_v15 = vmul.f32 %v5799_v5, %v671_v13  ;;  %v696_v16 = vmul.f32 %v5799_v5, %v672_v14  ;;  %vm5822_vm8 = vmand %vm657_vm2, %vm663_vm3  ;;  %v4670_v33 = vld [vmem:[%s5804_s3 + $0x1b0] sm:$0xff]  ;;  %v4672_v34 = vld [vmem:[%s5804_s3 + $0x1c0] sm:$0xff]  ;;  %v934_v39 = vmul.f32 %v4652_v31, %v5799_v5  ;;  %640 = vst.msk [vmem:[#allocation3 + $0x50] sm:$0xff] %vm628_vm11, %v5621_v1  ;;  %s7996_s6 = sld [smem:[#allocation19_spill]] }
  0x29   : > { %v1281_v9 = vld [vmem:[#allocation2 + $0x90] sm:$0xff]  ;;  %vm793_vm4 = vcmp.ge.s32.totalorder %v791_v6, 1  ;;  %vm799_vm5 = vcmp.le.s32.totalorder %v791_v6, 16  ;;  %vm658_vm6 = vcmp.ge.s32.totalorder %v656_v7, 1  ;;  %vm664_vm7 = vcmp.le.s32.totalorder %v656_v7, 16  ;;  %v673_v37 = vld [vmem:[%s5804_s3 + $0x20] sm:$0xff] }
  0x2a   : > { %v1289_v10 = vld [vmem:[#allocation2 + $0x1] sm:$0xff]  ;;  %1347 = vrot.lane.b32.xlu0 %v1281_v9, %s7951_s30  ;;  %v844_v17 = vadd.f32 %v5809_v8, %v826_v12  ;;  %vm5826_vm9 = vmand %vm793_vm4, %vm799_vm5  ;;  %v719_v20 = vadd.f32 %v5809_v8, %v695_v15  ;;  %v720_v21 = vadd.f32 %v5809_v8, %v696_v16  ;;  %v4655_v36 = vld [vmem:[%s5804_s3 + $0x138] sm:$0x1]  ;;  %v936_v40 = vmul.f32 %v4654_v32, %v5799_v5  ;;  %s7993_s28 = smov %s7992_s24  ;;  %s7997_s7 = sld [smem:[#allocation20_spill]] }
  0x2b   : > { %1379 = vrot.lane.b32.xlu1 %v1289_v10, %s7964_s21  ;;  %vm5832_vm10 = vmand %vm658_vm6, %vm664_vm7  ;;  %v4653_v35 = vld [vmem:[%s5804_s3 + $0x128] sm:$0x1]  ;;  %v4638_v38 = vld [vmem:[%s5804_s3 + $0xb0] sm:$0xff]  ;;  %v1044_v41 = vmul.f32 %v4670_v33, %v5799_v5  ;;  %v1046_v42 = vmul.f32 %v4672_v34, %v5799_v5  ;;  %v952_v44 = vadd.f32 %v5809_v8, %v934_v39  ;;  %v937_v45 = vmul.f32 %v4655_v36, %v5799_v5  ;;  %s7999_s8 = sld [smem:[#allocation21_spill]] }
  0x2c   : > { %v862_v22 = vmax.f32 %v844_v17, 0.0  ;;  %v737_v24 = vmax.f32 %v719_v20, 0.0  ;;  %v738_v25 = vmax.f32 %v720_v21, 0.0  ;;  %v935_v43 = vmul.f32 %v4653_v35, %v5799_v5  ;;  %v4640_v56 = vld [vmem:[%s5804_s3 + $0xc0] sm:$0xff]  ;;  %v674_v57 = vld [vmem:[%s5804_s3 + $0x28] sm:$0x1] }
  0x2d   : > { %v697_v46 = vmul.f32 %v5799_v5, %v673_v37  ;;  %v828_v47 = vmul.f32 %v4638_v38, %v5799_v5  ;;  %v954_v48 = vadd.f32 %v5809_v8, %v936_v40  ;;  %v1062_v49 = vadd.f32 %v5809_v8, %v1044_v41  ;;  %v675_v58 = vld [vmem:[%s5804_s3 + $0x30] sm:$0xff]  ;;  %v676_v63 = vld [vmem:[%s5804_s3 + $0x38] sm:$0x1]  ;;  %v4656_v6 = vld [vmem:[%s5804_s3 + $0x140] sm:$0xff]  ;;  %642 = vst.msk [vmem:[#allocation3 + $0x60] sm:$0xff] %vm628_vm11, %v5621_v1 }
  0x2e   : > { %v880_v26 = vsel %vm5826_vm9, %v862_v22, 0.0  ;;  %v755_v27 = vsel %vm5822_vm8, %v737_v24, 0.0  ;;  %v756_v28 = vsel %vm5832_vm10, %v738_v25, 0.0  ;;  %v1064_v50 = vadd.f32 %v5809_v8, %v1046_v42  ;;  %v4658_v7 = vld [vmem:[%s5804_s3 + $0x150] sm:$0xff]  ;;  %v4676_v14 = vld [vmem:[%s5804_s3 + $0x1e0] sm:$0xff]  ;;  %644 = vst.msk [vmem:[#allocation3 + $0x70] sm:$0xff] %vm628_vm11, %v5621_v1 }
  0x2f   : > { %899 = vst.msk [vmem:[#allocation2 + $0xa0] sm:$0xff] %vm771_vm0, %v880_v26  ;;  %775 = vst.msk [vmem:[#allocation2 + $0x10] sm:$0xff] %vm771_vm0, %v755_v27  ;;  %v953_v51 = vadd.f32 %v5809_v8, %v935_v43  ;;  %v970_v52 = vmax.f32 %v952_v44, 0.0  ;;  %v955_v53 = vadd.f32 %v5809_v8, %v937_v45  ;;  %v721_v54 = vadd.f32 %v5809_v8, %v697_v46  ;;  %v4674_v13 = vld [vmem:[%s5804_s3 + $0x1d0] sm:$0xff]  ;;  %v4657_v36 = vld [vmem:[%s5804_s3 + $0x148] sm:$0x1] }
  0x30   : > { %776 = vst.msk [vmem:[#allocation2 + $0x18] sm:$0x1] %vm773_vm1, %v756_v28  ;;  %v846_v55 = vadd.f32 %v5809_v8, %v828_v47  ;;  %v972_v59 = vmax.f32 %v954_v48, 0.0  ;;  %v1080_v60 = vmax.f32 %v1062_v49, 0.0  ;;  %v1082_v61 = vmax.f32 %v1064_v50, 0.0  ;;  %v1665_v37 = vld [vmem:[%s7992_s24 + $0x40] sm:$0xff] }
  0x31   : > { %v971_v62 = vmax.f32 %v953_v51, 0.0  ;;  %v988_v0 = vsel %vm5822_vm8, %v970_v52, 0.0  ;;  %v973_v2 = vmax.f32 %v955_v53, 0.0  ;;  %v739_v3 = vmax.f32 %v721_v54, 0.0  ;;  %v4659_v42 = vld [vmem:[%s5804_s3 + $0x158] sm:$0x1]  ;;  %4800 = vmatprep.subr.mxu1 %v1665_v37 }
  0x32   : > { %v864_v4 = vmax.f32 %v846_v55, 0.0  ;;  %1007 = vst.msk [vmem:[#allocation2 + $0x120] sm:$0xff] %vm771_vm0, %v988_v0  ;;  %v990_v9 = vsel %vm5822_vm8, %v972_v59, 0.0  ;;  %v1098_v10 = vsel %vm5826_vm9, %v1080_v60, 0.0  ;;  %v1100_v11 = vsel %vm5826_vm9, %v1082_v61, 0.0  ;;  %v677_v43 = vld [vmem:[%s5804_s3 + $0x40] sm:$0xff]  ;;  %4801 = vmatpush3.msra.mxu1 %v1665_v37 }
  0x33   : > { %v989_v12 = vsel %vm5832_vm10, %v971_v62, 0.0  ;;  %1009 = vst.msk [vmem:[#allocation2 + $0x130] sm:$0xff] %vm771_vm0, %v990_v9  ;;  %1117 = vst.msk [vmem:[#allocation2 + $0x1b0] sm:$0xff] %vm771_vm0, %v1098_v10  ;;  %v991_v15 = vsel %vm5832_vm10, %v973_v2, 0.0  ;;  %v757_v16 = vsel %vm5822_vm8, %v739_v3, 0.0  ;;  %v830_v20 = vmul.f32 %v4640_v56, %v5799_v5  ;;  %v4642_v44 = vld [vmem:[%s5804_s3 + $0xd0] sm:$0xff] }
  0x34   : > { %1119 = vst.msk [vmem:[#allocation2 + $0x1c0] sm:$0xff] %vm771_vm0, %v1100_v11  ;;  %v882_v17 = vsel %vm5826_vm9, %v864_v4, 0.0  ;;  %777 = vst.msk [vmem:[#allocation2 + $0x20] sm:$0xff] %vm771_vm0, %v757_v16  ;;  %v698_v21 = vmul.f32 %v5799_v5, %v674_v57  ;;  %v699_v22 = vmul.f32 %v5799_v5, %v675_v58  ;;  %v700_v24 = vmul.f32 %v5799_v5, %v676_v63  ;;  %v678_v49 = vld [vmem:[%s5804_s3 + $0x48] sm:$0x1]  ;;  %v4644_v55 = vld [vmem:[%s5804_s3 + $0xe0] sm:$0xff] }
  0x35   : > { %1008 = vst.msk [vmem:[#allocation2 + $0x128] sm:$0x1] %vm773_vm1, %v989_v12  ;;  %1010 = vst.msk [vmem:[#allocation2 + $0x138] sm:$0x1] %vm773_vm1, %v991_v15  ;;  %v938_v25 = vmul.f32 %v4656_v6, %v5799_v5  ;;  %v848_v26 = vadd.f32 %v5809_v8, %v830_v20  ;;  %v940_v27 = vmul.f32 %v4658_v7, %v5799_v5  ;;  %v679_v62 = vld [vmem:[%s5804_s3 + $0x50] sm:$0xff]  ;;  %v1664_v12 = vld [vmem:[%s7993_s28 + $0x38] sm:$0xff] }
  0x36   : > { %v5845_v29 = vld [vmem:[#allocation2 + $0xa0] sm:$0xff]  ;;  %901 = vst.msk [vmem:[#allocation2 + $0xb0] sm:$0xff] %vm771_vm0, %v882_v17  ;;  %v1048_v28 = vmul.f32 %v4674_v13, %v5799_v5  ;;  %v1050_v31 = vmul.f32 %v4676_v14, %v5799_v5  ;;  %v722_v32 = vadd.f32 %v5809_v8, %v698_v21  ;;  %v723_v33 = vadd.f32 %v5809_v8, %v699_v22  ;;  %v680_v4 = vld [vmem:[%s5804_s3 + $0x58] sm:$0x1]  ;;  %v1663_v13 = vld [vmem:[%s7993_s28 + $0x30] sm:$0xff]  ;;  %s7954_s24 = smov 112  }
  0x37   : > { %1349 = vrot.lane.b32.xlu0 %v5845_v29, %s7951_s30  ;;  %v5849_v30 = vld [vmem:[#allocation2 + $0x11] sm:$0xff]  ;;  %v724_v34 = vadd.f32 %v5809_v8, %v700_v24  ;;  %v956_v35 = vadd.f32 %v5809_v8, %v938_v25  ;;  %v866_v38 = vmax.f32 %v848_v26, 0.0  ;;  %v958_v39 = vadd.f32 %v5809_v8, %v940_v27  ;;  %4802 = vmatprep.subr.mxu1 %v1664_v12  ;;  %v4660_v25 = vld [vmem:[%s5804_s3 + $0x160] sm:$0xff]  ;;  %v1662_v26 = vld [vmem:[%s7993_s28 + $0x28] sm:$0xff] }
  0x38   : > { %1381 = vrot.lane.b32.xlu1 %v5849_v30, %s7964_s21  ;;  %v1066_v40 = vadd.f32 %v5809_v8, %v1048_v28  ;;  %v1068_v41 = vadd.f32 %v5809_v8, %v1050_v31  ;;  %v740_v45 = vmax.f32 %v722_v32, 0.0  ;;  %v741_v46 = vmax.f32 %v723_v33, 0.0  ;;  %4803 = vmatpush3.msra.mxu1 %v1664_v12  ;;  %646 = vst.msk [vmem:[#allocation3 + $0x80] sm:$0xff] %vm628_vm11, %v5621_v1 }
  0x39   : > { %v742_v47 = vmax.f32 %v724_v34, 0.0  ;;  %v974_v48 = vmax.f32 %v956_v35, 0.0  ;;  %v1297_v50 = vld [vmem:[#allocation2 + $0x120] sm:$0xff]  ;;  %v884_v51 = vsel %vm5826_vm9, %v866_v38, 0.0  ;;  %v976_v52 = vmax.f32 %v958_v39, 0.0  ;;  %v4662_v34 = vld [vmem:[%s5804_s3 + $0x170] sm:$0xff]  ;;  %4804 = vmatprep.subr.mxu1 %v1663_v13 }
  0x3a   : > { %v1084_v53 = vmax.f32 %v1066_v40, 0.0  ;;  %v1086_v54 = vmax.f32 %v1068_v41, 0.0  ;;  %v1298_v56 = vld [vmem:[#allocation2 + $0x130] sm:$0xff]  ;;  %903 = vst.msk [vmem:[#allocation2 + $0xc0] sm:$0xff] %vm771_vm0, %v884_v51  ;;  %v758_v58 = vsel %vm5832_vm10, %v740_v45, 0.0  ;;  %v759_v59 = vsel %vm5822_vm8, %v741_v46, 0.0  ;;  %4805 = vmatpush3.msra.mxu1 %v1663_v13 }
  0x3b   : > { %1411 = vrot.lane.b32.xlu0 %v1297_v50, %s5624_s29  ;;  %v1135_v57 = vld [vmem:[#allocation2 + $0x1b0] sm:$0xff]  ;;  %v760_v60 = vsel %vm5832_vm10, %v742_v47, 0.0  ;;  %v939_v61 = vmul.f32 %v4657_v36, %v5799_v5  ;;  %778 = vst.msk [vmem:[#allocation2 + $0x28] sm:$0x1] %vm773_vm1, %v758_v58  ;;  %v992_v63 = vsel %vm5822_vm8, %v974_v48, 0.0  ;;  %v994_v0 = vsel %vm5822_vm8, %v976_v52, 0.0  ;;  %4806 = vmatprep.subr.mxu1 %v1662_v26 }
  0x3c   : > { %1413 = vrot.lane.b32.xlu1 %v1298_v56, %s5624_s29  ;;  %779 = vst.msk [vmem:[#allocation2 + $0x30] sm:$0xff] %vm771_vm0, %v759_v59  ;;  %v1102_v2 = vsel %vm5826_vm9, %v1084_v53, 0.0  ;;  %v941_v3 = vmul.f32 %v4659_v42, %v5799_v5  ;;  %4788 = vmatprep.mubr.msk.f32.mxu0 %vm771_vm0, %v1135_v57  ;;  %v5959_v6 = vld [vmem:[#allocation2 + $0x1c0] sm:$0xff]  ;;  %1011 = vst.msk [vmem:[#allocation2 + $0x140] sm:$0xff] %vm771_vm0, %v992_v63  ;;  %v1104_v7 = vsel %vm5826_vm9, %v1086_v54, 0.0  ;;  %v4678_v35 = vld [vmem:[%s5804_s3 + $0x1f0] sm:$0xff] }
  0x3d   : > { %780 = vst.msk [vmem:[#allocation2 + $0x38] sm:$0x1] %vm773_vm1, %v760_v60  ;;  %v957_v9 = vadd.f32 %v5809_v8, %v939_v61  ;;  %v701_v10 = vmul.f32 %v5799_v5, %v677_v43  ;;  %v832_v11 = vmul.f32 %v4642_v44, %v5799_v5  ;;  %v702_v15 = vmul.f32 %v5799_v5, %v678_v49  ;;  %v1305_v27 = vld [vmem:[#allocation2 + $0x121] sm:$0xff]  ;;  %v1306_v36 = vld [vmem:[#allocation2 + $0x131] sm:$0xff] }
  0x3e   : > { %1013 = vst.msk [vmem:[#allocation2 + $0x150] sm:$0xff] %vm771_vm0, %v994_v0  ;;  %1121 = vst.msk [vmem:[#allocation2 + $0x1d0] sm:$0xff] %vm771_vm0, %v1102_v2  ;;  %v959_v14 = vadd.f32 %v5809_v8, %v941_v3  ;;  %v834_v16 = vmul.f32 %v4644_v55, %v5799_v5  ;;  %v703_v17 = vmul.f32 %v5799_v5, %v679_v62  ;;  %v4680_v41 = vld [vmem:[%s5804_s3 + $0x200] sm:$0xff]  ;;  %v4661_v42 = vld [vmem:[%s5804_s3 + $0x168] sm:$0x1]  ;;  %4807 = vmatpush3.msra.mxu1 %v1662_v26  ;;  %vm1639_vm2 = vcmask 457728  }
  0x3f   : > { %1123 = vst.msk [vmem:[#allocation2 + $0x1e0] sm:$0xff] %vm771_vm0, %v1104_v7  ;;  %1435 = vrot.lane.b32.xlu0 %v1135_v57, %s7962_s1  ;;  %v975_v20 = vmax.f32 %v957_v9, 0.0  ;;  %v725_v21 = vadd.f32 %v5809_v8, %v701_v10  ;;  %v850_v22 = vadd.f32 %v5809_v8, %v832_v11  ;;  %v704_v24 = vmul.f32 %v5799_v5, %v680_v4  ;;  %v1661_v43 = vld [vmem:[%s7993_s28 + $0x20] sm:$0xff]  ;;  %v4663_v48 = vld [vmem:[%s5804_s3 + $0x178] sm:$0x1]  ;;  %v6019_v55 = vld [vmem:[#allocation2 + $0x10] sm:$0xff] }
  0x40   : > { %1437 = vrot.lane.b32.xlu1 %v5959_v6, %s7962_s1  ;;  %v977_v28 = vmax.f32 %v959_v14, 0.0  ;;  %v726_v31 = vadd.f32 %v5809_v8, %v702_v15  ;;  %v852_v32 = vadd.f32 %v5809_v8, %v834_v16  ;;  %v727_v33 = vadd.f32 %v5809_v8, %v703_v17  ;;  %v681_v53 = vld [vmem:[%s5804_s3 + $0x60] sm:$0xff]  ;;  %v1660_v54 = vld [vmem:[%s7993_s28 + $0x18] sm:$0xff]  ;;  %v4646_v60 = vld [vmem:[%s5804_s3 + $0xf0] sm:$0xff]  ;;  %4808 = vmatprep.subr.mxu1 %v1661_v43 }
  0x41   : > { %v993_v37 = vsel %vm5832_vm10, %v975_v20, 0.0  ;;  %v743_v38 = vmax.f32 %v725_v21, 0.0  ;;  %v868_v39 = vmax.f32 %v850_v22, 0.0  ;;  %v728_v40 = vadd.f32 %v5809_v8, %v704_v24  ;;  %v6031_v61 = vld [vmem:[#allocation2 + $0x20] sm:$0xff]  ;;  %4809 = vmatpush3.msra.mxu1 %v1661_v43  ;;  %v1659_v3 = vld [vmem:[%s7993_s28 + $0x10] sm:$0xff]  ;;  %v1658_v15 = vld [vmem:[%s7993_s28 + $0x8] sm:$0xff] }
  0x42   : > { %1012 = vst.msk [vmem:[#allocation2 + $0x148] sm:$0x1] %vm773_vm1, %v993_v37  ;;  %v995_v44 = vsel %vm5832_vm10, %v977_v28, 0.0  ;;  %v744_v45 = vmax.f32 %v726_v31, 0.0  ;;  %v870_v46 = vmax.f32 %v852_v32, 0.0  ;;  %v745_v47 = vmax.f32 %v727_v33, 0.0  ;;  %4810 = vmatprep.subr.mxu1 %v1660_v54 }
  0x43   : > { %1467 = vrot.lane.b32.xlu0 %v1305_v27, %s5626_s26  ;;  %1014 = vst.msk [vmem:[#allocation2 + $0x158] sm:$0x1] %vm773_vm1, %v995_v44  ;;  %v761_v49 = vsel %vm5822_vm8, %v743_v38, 0.0  ;;  %v886_v50 = vsel %vm5826_vm9, %v868_v39, 0.0  ;;  %v746_v51 = vmax.f32 %v728_v40, 0.0  ;;  %v942_v52 = vmul.f32 %v4660_v25, %v5799_v5  ;;  %4811 = vmatpush3.msra.mxu1 %v1660_v54  ;;  %v4648_v24 = vld [vmem:[%s5804_s3 + $0x100] sm:$0xff] }
  0x44   : > { %1469 = vrot.lane.b32.xlu1 %v1306_v36, %s5626_s26  ;;  %781 = vst.msk [vmem:[#allocation2 + $0x40] sm:$0xff] %vm771_vm0, %v761_v49  ;;  %905 = vst.msk [vmem:[#allocation2 + $0xd0] sm:$0xff] %vm771_vm0, %v886_v50  ;;  %v762_v56 = vsel %vm5832_vm10, %v744_v45, 0.0  ;;  %v888_v57 = vsel %vm5826_vm9, %v870_v46, 0.0  ;;  %v763_v58 = vsel %vm5822_vm8, %v745_v47, 0.0  ;;  %v944_v59 = vmul.f32 %v4662_v34, %v5799_v5  ;;  %4812 = vmatprep.subr.mxu1 %v1659_v3  ;;  %v1283_v25 = vld [vmem:[#allocation2 + $0xb0] sm:$0xff] }
  0x45   : > { %782 = vst.msk [vmem:[#allocation2 + $0x48] sm:$0x1] %vm773_vm1, %v762_v56  ;;  %v764_v62 = vsel %vm5832_vm10, %v746_v51, 0.0  ;;  %v960_v63 = vadd.f32 %v5809_v8, %v942_v52  ;;  %v1052_v0 = vmul.f32 %v4678_v35, %v5799_v5  ;;  %v1054_v2 = vmul.f32 %v4680_v41, %v5799_v5  ;;  %v682_v22 = vld [vmem:[%s5804_s3 + $0x68] sm:$0x1]  ;;  %v683_v32 = vld [vmem:[%s5804_s3 + $0x70] sm:$0xff]  ;;  %4813 = vmatpush3.msra.mxu1 %v1659_v3 }
  0x46   : > { %907 = vst.msk [vmem:[#allocation2 + $0xe0] sm:$0xff] %vm771_vm0, %v888_v57  ;;  %783 = vst.msk [vmem:[#allocation2 + $0x50] sm:$0xff] %vm771_vm0, %v763_v58  ;;  %v962_v4 = vadd.f32 %v5809_v8, %v944_v59  ;;  %v943_v7 = vmul.f32 %v4661_v42, %v5799_v5  ;;  %v945_v9 = vmul.f32 %v4663_v48, %v5799_v5  ;;  %v1657_v33 = vld [vmem:[%s7993_s28] sm:$0xff]  ;;  %v684_v38 = vld [vmem:[%s5804_s3 + $0x78] sm:$0x1]  ;;  %4814 = vmatprep.subr.mxu1 %v1658_v15  ;;  %vm1648_vm3 = vcmask 523264  }
  0x47   : > { %784 = vst.msk [vmem:[#allocation2 + $0x58] sm:$0x1] %vm773_vm1, %v764_v62  ;;  %v705_v10 = vmul.f32 %v5799_v5, %v681_v53  ;;  %1499 = vrot.lane.b32.xlu0 %v6019_v55, %s7952_s25  ;;  %v978_v11 = vmax.f32 %v960_v63, 0.0  ;;  %v1070_v12 = vadd.f32 %v5809_v8, %v1052_v0  ;;  %v1072_v13 = vadd.f32 %v5809_v8, %v1054_v2  ;;  %v4664_v43 = vld [vmem:[%s5804_s3 + $0x180] sm:$0xff]  ;;  %v4666_v44 = vld [vmem:[%s5804_s3 + $0x190] sm:$0xff] }
  0x48   : > { %v836_v14 = vmul.f32 %v4646_v60, %v5799_v5  ;;  %1501 = vrot.lane.b32.xlu1 %v6031_v61, %s7952_s25  ;;  %v980_v16 = vmax.f32 %v962_v4, 0.0  ;;  %v961_v17 = vadd.f32 %v5809_v8, %v943_v7  ;;  %v963_v20 = vadd.f32 %v5809_v8, %v945_v9  ;;  %v4682_v45 = vld [vmem:[%s5804_s3 + $0x210] sm:$0xff]  ;;  %4815 = vmatpush3.msra.mxu1 %v1658_v15  ;;  %v4684_v49 = vld [vmem:[%s5804_s3 + $0x220] sm:$0xff]  ;;  %v4665_v9 = vld [vmem:[%s5804_s3 + $0x188] sm:$0x1] }
  0x49   : > { %v729_v21 = vadd.f32 %v5809_v8, %v705_v10  ;;  %v996_v26 = vsel %vm5822_vm8, %v978_v11, 0.0  ;;  %v1088_v27 = vmax.f32 %v1070_v12, 0.0  ;;  %v1090_v28 = vmax.f32 %v1072_v13, 0.0  ;;  %4816 = vmatprep.subr.mxu1 %v1657_v33  ;;  %v6117_v0 = vld [vmem:[#allocation2 + $0xc0] sm:$0xff]  ;;  %648 = vst.msk [vmem:[#allocation3 + $0x90] sm:$0xff] %vm628_vm11, %v5621_v1  ;;  %v6214_v19 = vld [vmem:[#allocation2 + $0x30] sm:$0xff] }
  0x4a   : > { %v854_v31 = vadd.f32 %v5809_v8, %v836_v14  ;;  %1015 = vst.msk [vmem:[#allocation2 + $0x160] sm:$0xff] %vm771_vm0, %v996_v26  ;;  %v998_v34 = vsel %vm5822_vm8, %v980_v16, 0.0  ;;  %v979_v35 = vmax.f32 %v961_v17, 0.0  ;;  %v981_v36 = vmax.f32 %v963_v20, 0.0  ;;  %4817 = vmatpush3.msra.mxu1 %v1657_v33  ;;  %v1291_v10 = vld [vmem:[#allocation2 + $0x21] sm:$0xff] }
  0x4b   : > { %v747_v37 = vmax.f32 %v729_v21, 0.0  ;;  %1531 = vrot.lane.b32.xlu0 %v5845_v29, %s5628_s27  ;;  %1017 = vst.msk [vmem:[#allocation2 + $0x170] sm:$0xff] %vm771_vm0, %v998_v34  ;;  %v1106_v39 = vsel %vm5826_vm9, %v1088_v27, 0.0  ;;  %v1108_v40 = vsel %vm5826_vm9, %v1090_v28, 0.0  ;;  %v706_v42 = vmul.f32 %v5799_v5, %v682_v22  ;;  %2786 = vmatprep.subr.mxu1 %v5621_v1  ;;  %v4667_v14 = vld [vmem:[%s5804_s3 + $0x198] sm:$0x1] }
  0x4c   : > { %v872_v41 = vmax.f32 %v854_v31, 0.0  ;;  %1351 = vrot.lane.b32.xlu1 %v1283_v25, %s7951_s30  ;;  %1125 = vst.msk [vmem:[#allocation2 + $0x1f0] sm:$0xff] %vm771_vm0, %v1106_v39  ;;  %1127 = vst.msk [vmem:[#allocation2 + $0x200] sm:$0xff] %vm771_vm0, %v1108_v40  ;;  %v997_v29 = vsel %vm5832_vm10, %v979_v35, 0.0  ;;  %v999_v46 = vsel %vm5832_vm10, %v981_v36, 0.0  ;;  %v838_v48 = vmul.f32 %v4648_v24, %v5799_v5  ;;  %v685_v21 = vld [vmem:[%s5804_s3 + $0x80] sm:$0xff] }
  0x4d   : > { %v765_v47 = vsel %vm5822_vm8, %v747_v37, 0.0  ;;  %1016 = vst.msk [vmem:[#allocation2 + $0x168] sm:$0x1] %vm773_vm1, %v997_v29  ;;  %1018 = vst.msk [vmem:[#allocation2 + $0x178] sm:$0x1] %vm773_vm1, %v999_v46  ;;  %v730_v51 = vadd.f32 %v5809_v8, %v706_v42  ;;  %v707_v52 = vmul.f32 %v5799_v5, %v683_v32  ;;  %v708_v53 = vmul.f32 %v5799_v5, %v684_v38  ;;  %v4650_v27 = vld [vmem:[%s5804_s3 + $0x110] sm:$0xff] }
  0x4e   : > { %785 = vst.msk [vmem:[#allocation2 + $0x60] sm:$0xff] %vm771_vm0, %v765_v47  ;;  %v890_v50 = vsel %vm5826_vm9, %v872_v41, 0.0  ;;  %v856_v54 = vadd.f32 %v5809_v8, %v838_v48  ;;  %v946_v56 = vmul.f32 %v4664_v43, %v5799_v5  ;;  %v948_v57 = vmul.f32 %v4666_v44, %v5799_v5  ;;  %v686_v28 = vld [vmem:[%s5804_s3 + $0x88] sm:$0x1]  ;;  %v1292_v35 = vld [vmem:[#allocation2 + $0x31] sm:$0xff]  ;;  %v1299_v44 = vld [vmem:[#allocation2 + $0x140] sm:$0xff] }
  0x4f   : > { %909 = vst.msk [vmem:[#allocation2 + $0xf0] sm:$0xff] %vm771_vm0, %v890_v50  ;;  %v1056_v58 = vmul.f32 %v4682_v45, %v5799_v5  ;;  %1533 = vrot.lane.b32.xlu0 %v1283_v25, %s5628_s27  ;;  %v748_v59 = vmax.f32 %v730_v51, 0.0  ;;  %v731_v60 = vadd.f32 %v5809_v8, %v707_v52  ;;  %v732_v62 = vadd.f32 %v5809_v8, %v708_v53  ;;  %v1300_v47 = vld [vmem:[#allocation2 + $0x150] sm:$0xff]  ;;  %v1307_v18 = vld [vmem:[#allocation2 + $0x141] sm:$0xff]  ;;  %s7958_s3 = smov 80  }
  0x50   : > { %v1058_v63 = vmul.f32 %v4684_v49, %v5799_v5  ;;  %1563 = vrot.lane.b32.xlu1 %v5849_v30, %s7960_s23  ;;  %v874_v2 = vmax.f32 %v856_v54, 0.0  ;;  %v964_v3 = vadd.f32 %v5809_v8, %v946_v56  ;;  %v966_v4 = vadd.f32 %v5809_v8, %v948_v57  ;;  %v6204_v56 = vld [vmem:[#allocation2 + $0x1e0] sm:$0xff]  ;;  %v1308_v57 = vld [vmem:[#allocation2 + $0x151] sm:$0xff]  ;;  %635 = vst.msk [vmem:[#allocation3 + $0x28] sm:$0x3] %vm630_vm12, %v5621_v1 }
  0x51   : > { %v1074_v7 = vadd.f32 %v5809_v8, %v1056_v58  ;;  %v766_v11 = vsel %vm5832_vm10, %v748_v59, 0.0  ;;  %v749_v12 = vmax.f32 %v731_v60, 0.0  ;;  %v750_v13 = vmax.f32 %v732_v62, 0.0  ;;  %v6216_v23 = vld [vmem:[#allocation2 + $0x40] sm:$0xff]  ;;  %v1326_v58 = vld [vmem:[#allocation2 + $0xd0] sm:$0xff] }
  0x52   : > { %v1076_v30 = vadd.f32 %v5809_v8, %v1058_v63  ;;  %786 = vst.msk [vmem:[#allocation2 + $0x68] sm:$0x1] %vm773_vm1, %v766_v11  ;;  %v892_v15 = vsel %vm5826_vm9, %v874_v2, 0.0  ;;  %v982_v16 = vmax.f32 %v964_v3, 0.0  ;;  %v984_v17 = vmax.f32 %v966_v4, 0.0  ;;  %v1334_v59 = vld [vmem:[#allocation2 + $0x41] sm:$0xff] }
  0x53   : > { %v1092_v20 = vmax.f32 %v1074_v7, 0.0  ;;  %1353 = vrot.lane.b32.xlu0 %v6117_v0, %s7951_s30  ;;  %911 = vst.msk [vmem:[#allocation2 + $0x100] sm:$0xff] %vm771_vm0, %v892_v15  ;;  %v767_v22 = vsel %vm5822_vm8, %v749_v12, 0.0  ;;  %v768_v24 = vsel %vm5832_vm10, %v750_v13, 0.0  ;;  %v947_v26 = vmul.f32 %v4665_v9, %v5799_v5  ;;  %v1286_v60 = vld [vmem:[#allocation2 + $0xe0] sm:$0xff]  ;;  %v1294_v62 = vld [vmem:[#allocation2 + $0x51] sm:$0xff] }
  0x54   : > { %v1094_v25 = vmax.f32 %v1076_v30, 0.0  ;;  %1383 = vrot.lane.b32.xlu1 %v1291_v10, %s7964_s21  ;;  %787 = vst.msk [vmem:[#allocation2 + $0x70] sm:$0xff] %vm771_vm0, %v767_v22  ;;  %v1000_v31 = vsel %vm5822_vm8, %v982_v16, 0.0  ;;  %v1002_v32 = vsel %vm5822_vm8, %v984_v17, 0.0  ;;  %v949_v34 = vmul.f32 %v4667_v14, %v5799_v5  ;;  %v1301_v63 = vld [vmem:[#allocation2 + $0x160] sm:$0xff]  ;;  %v1302_v2 = vld [vmem:[#allocation2 + $0x170] sm:$0xff] }
  0x55   : > { %788 = vst.msk [vmem:[#allocation2 + $0x78] sm:$0x1] %vm773_vm1, %v768_v24  ;;  %v1110_v33 = vsel %vm5826_vm9, %v1092_v20, 0.0  ;;  %v965_v37 = vadd.f32 %v5809_v8, %v947_v26  ;;  %v709_v38 = vmul.f32 %v5799_v5, %v685_v21  ;;  %v840_v40 = vmul.f32 %v4650_v27, %v5799_v5  ;;  %v6235_v3 = vld [vmem:[#allocation2 + $0x200] sm:$0xff]  ;;  %v1310_v7 = vld [vmem:[#allocation2 + $0x171] sm:$0xff] }
  0x56   : > { %1019 = vst.msk [vmem:[#allocation2 + $0x180] sm:$0xff] %vm771_vm0, %v1000_v31  ;;  %1021 = vst.msk [vmem:[#allocation2 + $0x190] sm:$0xff] %vm771_vm0, %v1002_v32  ;;  %v1112_v36 = vsel %vm5826_vm9, %v1094_v25, 0.0  ;;  %v967_v39 = vadd.f32 %v5809_v8, %v949_v34  ;;  %v710_v41 = vmul.f32 %v5799_v5, %v686_v28  ;;  %v1309_v4 = vld [vmem:[#allocation2 + $0x161] sm:$0xff]  ;;  %v6243_v9 = vld [vmem:[#allocation2 + $0x50] sm:$0xff]  ;;  %vm1666_vm4 = vcmask 588800  }
  0x57   : > { %1129 = vst.msk [vmem:[#allocation2 + $0x210] sm:$0xff] %vm771_vm0, %v1110_v33  ;;  %1131 = vst.msk [vmem:[#allocation2 + $0x220] sm:$0xff] %vm771_vm0, %v1112_v36  ;;  %1565 = vrot.lane.b32.xlu0 %v1291_v10, %s7960_s23  ;;  %v983_v42 = vmax.f32 %v965_v37, 0.0  ;;  %v733_v43 = vadd.f32 %v5809_v8, %v709_v38  ;;  %v858_v29 = vadd.f32 %v5809_v8, %v840_v40  ;;  %v6245_v10 = vld [vmem:[#allocation2 + $0x60] sm:$0xff]  ;;  %v1328_v11 = vld [vmem:[#allocation2 + $0xf0] sm:$0xff]  ;;  %vm2181_vm5 = vcmask 785408  }
  0x58   : > { %1385 = vrot.lane.b32.xlu1 %v1292_v35, %s7964_s21  ;;  %v985_v45 = vmax.f32 %v967_v39, 0.0  ;;  %v734_v46 = vadd.f32 %v5809_v8, %v710_v41  ;;  %v6197_v8 = vld [vmem:[#allocation2 + $0x1d0] sm:$0xff]  ;;  %v1143_v26 = vld [vmem:[%s7994_s0] sm:$0xff]  ;;  %631 = vst.msk [vmem:[#allocation3 + $0x8] sm:$0x3] %vm630_vm12, %v5621_v1  ;;  %s7956_s0 = smov 96  }
  0x59   : > { %v1001_v48 = vsel %vm5832_vm10, %v983_v42, 0.0  ;;  %v751_v49 = vmax.f32 %v733_v43, 0.0  ;;  %v876_v50 = vmax.f32 %v858_v29, 0.0  ;;  %v1336_v12 = vld [vmem:[#allocation2 + $0x61] sm:$0xff]  ;;  %4786 = vmatprep.subr.mxu0 %v1143_v26  ;;  %633 = vst.msk [vmem:[#allocation3 + $0x18] sm:$0x3] %vm630_vm12, %v5621_v1 }
  0x5a   : > { %1020 = vst.msk [vmem:[#allocation2 + $0x188] sm:$0x1] %vm773_vm1, %v1001_v48  ;;  %v1003_v5 = vsel %vm5832_vm10, %v985_v45, 0.0  ;;  %v752_v51 = vmax.f32 %v734_v46, 0.0  ;;  %v1288_v13 = vld [vmem:[#allocation2 + $0x100] sm:$0xff]  ;;  %4787 = vmatpush3.msra.mxu0 %v1143_v26  ;;  %vm2190_vm6 = vcmask 916480  }
  0x5b   : > { %1415 = vrot.lane.b32.xlu0 %v1299_v44, %s5624_s29  ;;  %1022 = vst.msk [vmem:[#allocation2 + $0x198] sm:$0x1] %vm773_vm1, %v1003_v5  ;;  %v769_v52 = vsel %vm5822_vm8, %v751_v49, 0.0  ;;  %v894_v53 = vsel %vm5826_vm9, %v876_v50, 0.0  ;;  %v6265_v25 = vld [vmem:[#allocation2 + $0x70] sm:$0xff]  ;;  %4789 = vmatmul.mubr.msk.f32.vlgmr.msra.gmra.mxu0 %vm771_vm0, %v5959_v6  ;;  %v1273_v39 = vld [vmem:[#allocation2] sm:$0xff] }
  0x5c   : > { %1417 = vrot.lane.b32.xlu1 %v1300_v47, %s5624_s29  ;;  %789 = vst.msk [vmem:[#allocation2 + $0x80] sm:$0xff] %vm771_vm0, %v769_v52  ;;  %v770_v54 = vsel %vm5832_vm10, %v752_v51, 0.0  ;;  %913 = vst.msk [vmem:[#allocation2 + $0x110] sm:$0xff] %vm771_vm0, %v894_v53  ;;  %v1296_v30 = vld [vmem:[#allocation2 + $0x71] sm:$0xff]  ;;  %4791 = vmatprep.mubr.msk.f32.mxu0 %vm771_vm0, %v6197_v8 }
  0x5d   : > { %790 = vst.msk [vmem:[#allocation2 + $0x88] sm:$0x1] %vm773_vm1, %v770_v54  ;;  %v1303_v14 = vld [vmem:[#allocation2 + $0x180] sm:$0xff]  ;;  %v1304_v15 = vld [vmem:[#allocation2 + $0x190] sm:$0xff]  ;;  %2241 = vmatprep.subr.mxu0 %v5621_v1  ;;  %vm1630_vm1 = vcmask 392192  }
  0x5e   : > { %v1141_v16 = vld [vmem:[#allocation2 + $0x210] sm:$0xff]  ;;  %v1142_v17 = vld [vmem:[#allocation2 + $0x220] sm:$0xff]  ;;  %637 = vst.msk [vmem:[#allocation3 + $0x38] sm:$0x3] %vm630_vm12, %v5621_v1  ;;  %639 = vst.msk [vmem:[#allocation3 + $0x48] sm:$0x3] %vm630_vm12, %v5621_v1 }
  0x5f   : > { %1439 = vrot.lane.b32.xlu0 %v6197_v8, %s7962_s1  ;;  %641 = vst.msk [vmem:[#allocation3 + $0x58] sm:$0x3] %vm630_vm12, %v5621_v1  ;;  %643 = vst.msk [vmem:[#allocation3 + $0x68] sm:$0x3] %vm630_vm12, %v5621_v1  ;;  %4792 = vmatmul.mubr.msk.f32.gmra.mxu0 %vm771_vm0, %v6204_v56 }
  0x60   : > { %1441 = vrot.lane.b32.xlu1 %v6204_v56, %s7962_s1  ;;  %645 = vst.msk [vmem:[#allocation3 + $0x78] sm:$0x3] %vm630_vm12, %v5621_v1  ;;  %647 = vst.msk [vmem:[#allocation3 + $0x88] sm:$0x3] %vm630_vm12, %v5621_v1 }
  0x61   : > { %v1311_v20 = vld [vmem:[#allocation2 + $0x181] sm:$0xff]  ;;  %649 = vst.msk [vmem:[#allocation3 + $0x98] sm:$0x3] %vm630_vm12, %v5621_v1 }
  0x62   : > { %v1312_v21 = vld [vmem:[#allocation2 + $0x191] sm:$0xff] }
  0x63   : > { %1471 = vrot.lane.b32.xlu0 %v1307_v18, %s5626_s26  ;;  %v1321_v27 = vld [vmem:[#allocation2 + $0x80] sm:$0xff]  ;;  %v1330_v32 = vld [vmem:[#allocation2 + $0x110] sm:$0xff] }
  0x64   : > { %1473 = vrot.lane.b32.xlu1 %v1308_v57, %s5626_s26  ;;  %v1338_v33 = vld [vmem:[#allocation2 + $0x81] sm:$0xff] }
  0x67   : > { %1503 = vrot.lane.b32.xlu0 %v6214_v19, %s7952_s25 }
  0x68   : > { %1505 = vrot.lane.b32.xlu1 %v6216_v23, %s7952_s25 }
  0x6b   : > { %1535 = vrot.lane.b32.xlu0 %v6117_v0, %s5628_s27  ;;  %v6233_v0 = vld [vmem:[#allocation2 + $0x1f0] sm:$0xff] }
  0x6c   : > { %1537 = vrot.lane.b32.xlu1 %v1326_v58, %s5628_s27  ;;  %4794 = vmatprep.mubr.msk.f32.mxu0 %vm771_vm0, %v6233_v0 }
  0x6d   : > { %4795 = vmatmul.mubr.msk.f32.gmra.mxu0 %vm771_vm0, %v6235_v3 }
  0x6e   : > { %4797 = vmatprep.mubr.msk.f32.mxu0 %vm771_vm0, %v1141_v16 }
  0x6f   : > { %1567 = vrot.lane.b32.xlu0 %v1292_v35, %s7960_s23 }
  0x70   : > { %1355 = vrot.lane.b32.xlu1 %v1326_v58, %s7951_s30 }
  0x71   : > { %4798 = vmatmul.mubr.msk.f32.gmra.mxu0 %vm771_vm0, %v1142_v17 }
  0x73   : > { %1569 = vrot.lane.b32.xlu0 %v1334_v59, %s7960_s23 }
  0x74   : > { %1357 = vrot.lane.b32.xlu1 %v1286_v60, %s7951_s30 }
  0x77   : > { %1387 = vrot.lane.b32.xlu0 %v1334_v59, %s7964_s21 }
  0x78   : > { %1389 = vrot.lane.b32.xlu1 %v1294_v62, %s7964_s21 }
  0x7b   : > { %1419 = vrot.lane.b32.xlu0 %v1301_v63, %s5624_s29 }
  0x7c   : > { %1421 = vrot.lane.b32.xlu1 %v1302_v2, %s5624_s29 }
  0x7f   : > { %1443 = vrot.lane.b32.xlu0 %v6233_v0, %s7962_s1 }
  0x80   : > { %1445 = vrot.lane.b32.xlu1 %v6235_v3, %s7962_s1 }
  0x83   : > { %1475 = vrot.lane.b32.xlu0 %v1309_v4, %s5626_s26 }
  0x84   : > { %1477 = vrot.lane.b32.xlu1 %v1310_v7, %s5626_s26 }
  0x87   : > { %1507 = vrot.lane.b32.xlu0 %v6243_v9, %s7952_s25 }
  0x88   : > { %1509 = vrot.lane.b32.xlu1 %v6245_v10, %s7952_s25 }
  0x8b   : > { %1539 = vrot.lane.b32.xlu0 %v1286_v60, %s5628_s27 }
  0x8c   : > { %1541 = vrot.lane.b32.xlu1 %v1328_v11, %s5628_s27 }
  0x8f   : > { %1571 = vrot.lane.b32.xlu0 %v1294_v62, %s7960_s23 }
  0x90   : > { %1359 = vrot.lane.b32.xlu1 %v1328_v11, %s7951_s30 }
  0x93   : > { %1573 = vrot.lane.b32.xlu0 %v1336_v12, %s7960_s23 }
  0x94   : > { %1361 = vrot.lane.b32.xlu1 %v1288_v13, %s7951_s30  ;;  %s7998_s30 = smov 48  }
  0x97   : > { %1391 = vrot.lane.b32.xlu0 %v1336_v12, %s7964_s21 }
  0x98   : > { %1393 = vrot.lane.b32.xlu1 %v1296_v30, %s7964_s21 }
  0x9b   : > { %1423 = vrot.lane.b32.xlu0 %v1303_v14, %s5624_s29 }
  0x9c   : > { %1425 = vrot.lane.b32.xlu1 %v1304_v15, %s5624_s29  ;;  %v1348_v22 = vpop.permute.xlu0 %1347  ;;  %s8001_s29 = smov 112  }
  0x9d   : > { %v1380_v24 = vpop.permute.xlu1 %1379  ;;  %v1587_v41 = vsel %vm771_vm0, %v1273_v39, %v1348_v22 }
  0x9e   : > { %v1595_v43 = vsel %vm628_vm11, %v1587_v41, %v1380_v24 }
  0x9f   : > { %1447 = vrot.lane.b32.xlu0 %v1141_v16, %s7962_s1 }
  0xa0   : > { %1449 = vrot.lane.b32.xlu1 %v1142_v17, %s7962_s1 }
  0xa3   : > { %1479 = vrot.lane.b32.xlu0 %v1311_v20, %s5626_s26 }
  0xa4   : > { %1481 = vrot.lane.b32.xlu1 %v1312_v21, %s5626_s26  ;;  %s8005_s26 = smov 32  }
  0xa7   : > { %1511 = vrot.lane.b32.xlu0 %v6265_v25, %s7952_s25 }
  0xa8   : > { %1513 = vrot.lane.b32.xlu1 %v1321_v27, %s7952_s25  ;;  %s8000_s25 = smov 96  }
  0xa9   : > { %v1350_v28 = vpop.permute.xlu0 %1349 }
  0xaa   : > { %v1382_v31 = vpop.permute.xlu1 %1381  ;;  %v1588_v48 = vsel %vm771_vm0, %v6019_v55, %v1350_v28 }
  0xab   : > { %1543 = vrot.lane.b32.xlu0 %v1288_v13, %s5628_s27  ;;  %v1596_v8 = vsel %vm628_vm11, %v1588_v48, %v1382_v31 }
  0xac   : > { %1545 = vrot.lane.b32.xlu1 %v1330_v32, %s5628_s27 }
  0xad   : > { %v1412_v6 = vpop.permute.xlu0 %1411 }
  0xae   : > { %v1414_v34 = vpop.permute.xlu1 %1413  ;;  %v1604_v45 = vsel %vm1603_vm13, %v1595_v43, %v1412_v6 }
  0xaf   : > { %1575 = vrot.lane.b32.xlu0 %v1296_v30, %s7960_s23  ;;  %v1605_v53 = vsel %vm1603_vm13, %v1596_v8, %v1414_v34 }
  0xb0   : > { %1577 = vrot.lane.b32.xlu1 %v1338_v33, %s7960_s23 }
  0xb1   : > { %v1436_v35 = vpop.permute.xlu0 %1435 }
  0xb2   : > { %v1438_v36 = vpop.permute.xlu1 %1437  ;;  %v1613_v46 = vsel %vm1612_vm14, %v1604_v45, %v1436_v35 }
  0xb3   : > { %v1614_v56 = vsel %vm1612_vm14, %v1605_v53, %v1438_v36 }
  0xb5   : > { %v1468_v37 = vpop.permute.xlu0 %1467 }
  0xb6   : > { %v1470_v38 = vpop.permute.xlu1 %1469  ;;  %v1622_v47 = vsel %vm1621_vm15, %v1613_v46, %v1468_v37 }
  0xb7   : > { %v1623_v55 = vsel %vm1621_vm15, %v1614_v56, %v1470_v38 }
  0xb9   : > { %v1500_v40 = vpop.permute.xlu0 %1499 }
  0xba   : > { %v1502_v42 = vpop.permute.xlu1 %1501  ;;  %v1631_v49 = vsel %vm1630_vm1, %v1622_v47, %v1500_v40 }
  0xbb   : > { %v1632_v57 = vsel %vm1630_vm1, %v1623_v55, %v1502_v42 }
  0xbd   : > { %v1532_v44 = vpop.permute.xlu0 %1531 }
  0xbe   : > { %v1352_v29 = vpop.permute.xlu1 %1351  ;;  %v1640_v50 = vsel %vm1639_vm2, %v1631_v49, %v1532_v44 }
  0xbf   : > { %v1589_v13 = vsel %vm771_vm0, %v6031_v61, %v1352_v29 }
  0xc1   : > { %v1534_v5 = vpop.permute.xlu0 %1533 }
  0xc2   : > { %v1564_v51 = vpop.permute.xlu1 %1563  ;;  %v1641_v58 = vsel %vm1639_vm2, %v1632_v57, %v1534_v5 }
  0xc3   : > { %v1649_v52 = vsel %vm1648_vm3, %v1640_v50, %v1564_v51 }
  0xc4   : > { %4818 = vmatprep.mubr.msk.f32.mxu1 %vm1666_vm4, %v1649_v52 }
  0xc5   : > { %v1354_v54 = vpop.permute.xlu0 %1353 }
  0xc6   : > { %v1384_v18 = vpop.permute.xlu1 %1383  ;;  %v1590_v20 = vsel %vm771_vm0, %v6214_v19, %v1354_v54 }
  0xc7   : > { %v1597_v30 = vsel %vm628_vm11, %v1589_v13, %v1384_v18 }
  0xc9   : > { %v1566_v59 = vpop.permute.xlu0 %1565 }
  0xca   : > { %v1650_v60 = vsel %vm1648_vm3, %v1641_v58, %v1566_v59  ;;  %v1386_v62 = vpop.permute.xlu1 %1385 }
  0xcb   : > { %4819 = vmatmul.mubr.msk.f32.vlgmr.msra.gmra.mxu1 %vm1666_vm4, %v1650_v60  ;;  %v1598_v22 = vsel %vm628_vm11, %v1590_v20, %v1386_v62 }
  0xcd   : > { %v1416_v63 = vpop.permute.xlu0 %1415 }
  0xce   : > { %v1418_v2 = vpop.permute.xlu1 %1417  ;;  %v1606_v14 = vsel %vm1603_vm13, %v1597_v30, %v1416_v63 }
  0xcf   : > { %v1607_v26 = vsel %vm1603_vm13, %v1598_v22, %v1418_v2 }
  0xd1   : > { %v1440_v0 = vpop.permute.xlu0 %1439 }
  0xd2   : > { %v1442_v3 = vpop.permute.xlu1 %1441  ;;  %v1615_v16 = vsel %vm1612_vm14, %v1606_v14, %v1440_v0 }
  0xd3   : > { %v1616_v28 = vsel %vm1612_vm14, %v1607_v26, %v1442_v3 }
  0xd5   : > { %v1472_v4 = vpop.permute.xlu0 %1471 }
  0xd6   : > { %v1474_v7 = vpop.permute.xlu1 %1473  ;;  %v1624_v21 = vsel %vm1621_vm15, %v1615_v16, %v1472_v4 }
  0xd7   : > { %v1625_v6 = vsel %vm1621_vm15, %v1616_v28, %v1474_v7 }
  0xd9   : > { %v1504_v11 = vpop.permute.xlu0 %1503 }
  0xda   : > { %v1506_v12 = vpop.permute.xlu1 %1505  ;;  %v1633_v24 = vsel %vm1630_vm1, %v1624_v21, %v1504_v11 }
  0xdb   : > { %v1634_v19 = vsel %vm1630_vm1, %v1625_v6, %v1506_v12 }
  0xdd   : > { %v1536_v15 = vpop.permute.xlu0 %1535 }
  0xde   : > { %v1538_v17 = vpop.permute.xlu1 %1537  ;;  %v1642_v61 = vsel %vm1639_vm2, %v1633_v24, %v1536_v15 }
  0xdf   : > { %v1643_v33 = vsel %vm1639_vm2, %v1634_v19, %v1538_v17 }
  0xe1   : > { %v1568_v27 = vpop.permute.xlu0 %1567 }
  0xe2   : > { %v1651_v31 = vsel %vm1648_vm3, %v1642_v61, %v1568_v27  ;;  %v1356_v32 = vpop.permute.xlu1 %1355 }
  0xe3   : > { %4821 = vmatprep.mubr.msk.f32.mxu1 %vm1666_vm4, %v1651_v31  ;;  %v1591_v46 = vsel %vm771_vm0, %v6216_v23, %v1356_v32 }
  0xe5   : > { %v1570_v34 = vpop.permute.xlu0 %1569 }
  0xe6   : > { %v1652_v35 = vsel %vm1648_vm3, %v1643_v33, %v1570_v34  ;;  %v1358_v36 = vpop.permute.xlu1 %1357 }
  0xe7   : > { %4822 = vmatmul.mubr.msk.f32.gmra.mxu1 %vm1666_vm4, %v1652_v35  ;;  %v1592_v51 = vsel %vm771_vm0, %v6243_v9, %v1358_v36  ;;  %v6382_v36 = vld [vmem:[%s7995_s5] ss:$0 sm:$0xff] }
  0xe9   : > { %v1388_v37 = vpop.permute.xlu0 %1387 }
  0xea   : > { %v1390_v38 = vpop.permute.xlu1 %1389  ;;  %v1599_v47 = vsel %vm628_vm11, %v1591_v46, %v1388_v37 }
  0xeb   : > { %v1600_v8 = vsel %vm628_vm11, %v1592_v51, %v1390_v38  ;;  %v6387_v38 = vld [vmem:[%s7996_s6] ss:$0 sm:$0xff]  ;;  %v6420_v51 = vld [vmem:[#allocation3 + $0x2] sm:$0xff] }
  0xed   : > { %v1420_v39 = vpop.permute.xlu0 %1419 }
  0xee   : > { %v1422_v40 = vpop.permute.xlu1 %1421  ;;  %v1608_v48 = vsel %vm1603_vm13, %v1599_v47, %v1420_v39  ;;  %v2214_v39 = vld [vmem:[%s7997_s7 + $0x78] sm:$0xff]  ;;  %v2212_v47 = vld [vmem:[%s7997_s7 + $0x68] sm:$0xff] }
  0xef   : > { %v1609_v54 = vsel %vm1603_vm13, %v1600_v8, %v1422_v40  ;;  %v2213_v40 = vld [vmem:[%s7997_s7 + $0x70] sm:$0xff]  ;;  %2242 = vmatpush1.msra.mxu0 %v2214_v39  ;;  %v2208_v8 = vld [vmem:[%s7997_s7 + $0x48] sm:$0xff] }
  0xf0   : > { %2243 = vmatprep.subr.mxu0 %v5621_v1 }
  0xf1   : > { %v1444_v41 = vpop.permute.xlu0 %1443  ;;  %2244 = vmatpush1.msra.mxu0 %v2213_v40 }
  0xf2   : > { %v1446_v42 = vpop.permute.xlu1 %1445  ;;  %v1617_v5 = vsel %vm1612_vm14, %v1608_v48, %v1444_v41  ;;  %2245 = vmatprep.subr.mxu0 %v5621_v1  ;;  %v2211_v48 = vld [vmem:[%s7997_s7 + $0x60] sm:$0xff] }
  0xf3   : > { %v1618_v18 = vsel %vm1612_vm14, %v1609_v54, %v1446_v42  ;;  %2246 = vmatpush1.msra.mxu0 %v2212_v47 }
  0xf4   : > { %2247 = vmatprep.subr.mxu0 %v5621_v1 }
  0xf5   : > { %v1476_v43 = vpop.permute.xlu0 %1475  ;;  %2248 = vmatpush1.msra.mxu0 %v2211_v48 }
  0xf6   : > { %v1478_v44 = vpop.permute.xlu1 %1477  ;;  %v1626_v52 = vsel %vm1621_vm15, %v1617_v5, %v1476_v43  ;;  %2249 = vmatprep.subr.mxu0 %v5621_v1  ;;  %v2209_v5 = vld [vmem:[%s7997_s7 + $0x50] sm:$0xff] }
  0xf7   : > { %v1627_v58 = vsel %vm1621_vm15, %v1618_v18, %v1478_v44  ;;  %v2207_v18 = vld [vmem:[%s7997_s7 + $0x40] sm:$0xff] }
  0xf9   : > { %v1508_v45 = vpop.permute.xlu0 %1507 }
  0xfa   : > { %v1510_v29 = vpop.permute.xlu1 %1509  ;;  %v1635_v53 = vsel %vm1630_vm1, %v1626_v52, %v1508_v45  ;;  %v6422_v52 = vld [vmem:[#allocation3 + $0x1] sm:$0xff] }
  0xfb   : > { %v1636_v9 = vsel %vm1630_vm1, %v1627_v58, %v1510_v29 }
  0xfd   : > { %v1540_v49 = vpop.permute.xlu0 %1539 }
  0xfe   : > { %v1542_v50 = vpop.permute.xlu1 %1541  ;;  %v1644_v23 = vsel %vm1639_vm2, %v1635_v53, %v1540_v49  ;;  %v2210_v49 = vld [vmem:[%s7997_s7 + $0x58] sm:$0xff] }
  0xff   : > { %v1645_v59 = vsel %vm1639_vm2, %v1636_v9, %v1542_v50  ;;  %2250 = vmatpush1.msra.mxu0 %v2210_v49 }
 0x100   : > { %2251 = vmatprep.subr.mxu0 %v5621_v1 }
 0x101   : > { %v1572_v56 = vpop.permute.xlu0 %1571  ;;  %2252 = vmatpush1.msra.mxu0 %v2209_v5 }
 0x102   : > { %v1653_v55 = vsel %vm1648_vm3, %v1644_v23, %v1572_v56  ;;  %v1360_v57 = vpop.permute.xlu1 %1359  ;;  %2253 = vmatprep.subr.mxu0 %v5621_v1 }
 0x103   : > { %4824 = vmatprep.mubr.msk.f32.mxu1 %vm1666_vm4, %v1653_v55  ;;  %v1593_v15 = vsel %vm771_vm0, %v6245_v10, %v1360_v57  ;;  %2254 = vmatpush1.msra.mxu0 %v2208_v8  ;;  %v2206_v57 = vld [vmem:[%s7997_s7 + $0x38] sm:$0xff] }
 0x104   : > { %2255 = vmatprep.subr.mxu0 %v5621_v1 }
 0x105   : > { %v1574_v60 = vpop.permute.xlu0 %1573  ;;  %2256 = vmatpush1.msra.mxu0 %v2207_v18 }
 0x106   : > { %v1654_v62 = vsel %vm1648_vm3, %v1645_v59, %v1574_v60  ;;  %v1362_v63 = vpop.permute.xlu1 %1361  ;;  %2257 = vmatprep.subr.mxu0 %v5621_v1 }
 0x107   : > { %4825 = vmatmul.mubr.msk.f32.gmra.mxu1 %vm1666_vm4, %v1654_v62  ;;  %v1594_v16 = vsel %vm771_vm0, %v6265_v25, %v1362_v63  ;;  %2258 = vmatpush1.msra.mxu0 %v2206_v57  ;;  %v2205_v62 = vld [vmem:[%s7997_s7 + $0x30] sm:$0xff]  ;;  %v2204_v63 = vld [vmem:[%s7997_s7 + $0x28] sm:$0xff]  ;;  %vm2172_vm0 = vcmask 654336  }
 0x108   : > { %2259 = vmatprep.subr.mxu0 %v5621_v1 }
 0x109   : > { %v1392_v2 = vpop.permute.xlu0 %1391  ;;  %2260 = vmatpush1.msra.mxu0 %v2205_v62 }
 0x10a   : > { %v1394_v0 = vpop.permute.xlu1 %1393  ;;  %v1601_v17 = vsel %vm628_vm11, %v1593_v15, %v1392_v2  ;;  %2261 = vmatprep.subr.mxu0 %v5621_v1 }
 0x10b   : > { %v1602_v20 = vsel %vm628_vm11, %v1594_v16, %v1394_v0  ;;  %v2203_v0 = vld [vmem:[%s7997_s7 + $0x20] sm:$0xff]  ;;  %2262 = vmatpush1.msra.mxu0 %v2204_v63 }
 0x10c   : > { %2263 = vmatprep.subr.mxu0 %v5621_v1 }
 0x10d   : > { %v1424_v3 = vpop.permute.xlu0 %1423  ;;  %2264 = vmatpush1.msra.mxu0 %v2203_v0 }
 0x10e   : > { %v1426_v4 = vpop.permute.xlu1 %1425  ;;  %v1610_v21 = vsel %vm1603_vm13, %v1601_v17, %v1424_v3  ;;  %v2202_v3 = vld [vmem:[%s7997_s7 + $0x18] sm:$0xff]  ;;  %2265 = vmatprep.subr.mxu0 %v5621_v1  ;;  %v2199_v17 = vld [vmem:[%s7997_s7] sm:$0xff] }
 0x10f   : > { %v1611_v24 = vsel %vm1603_vm13, %v1602_v20, %v1426_v4  ;;  %2266 = vmatpush1.msra.mxu0 %v2202_v3 }
 0x110   : > { %2267 = vmatprep.subr.mxu0 %v5621_v1 }
 0x111   : > { %v1448_v7 = vpop.permute.xlu0 %1447 }
 0x112   : > { %v1450_v11 = vpop.permute.xlu1 %1449  ;;  %v1619_v26 = vsel %vm1612_vm14, %v1610_v21, %v1448_v7  ;;  %v2216_v21 = vld [vmem:[%s7997_s7 + $0x88] sm:$0xff] }
 0x113   : > { %v1620_v27 = vsel %vm1612_vm14, %v1611_v24, %v1450_v11  ;;  %v2201_v11 = vld [vmem:[%s7997_s7 + $0x10] sm:$0xff] }
 0x114   : > { %2268 = vmatpush1.msra.mxu0 %v2201_v11 }
 0x115   : > { %v1480_v12 = vpop.permute.xlu0 %1479  ;;  %2269 = vmatprep.subr.mxu0 %v5621_v1 }
 0x116   : > { %v1482_v13 = vpop.permute.xlu1 %1481  ;;  %v1628_v28 = vsel %vm1621_vm15, %v1619_v26, %v1480_v12 }
 0x117   : > { %v1629_v10 = vsel %vm1621_vm15, %v1620_v27, %v1482_v13 }
 0x119   : > { %v1512_v30 = vpop.permute.xlu0 %1511 }
 0x11a   : > { %v1514_v14 = vpop.permute.xlu1 %1513  ;;  %v1637_v25 = vsel %vm1630_vm1, %v1628_v28, %v1512_v30 }
 0x11b   : > { %v1638_v31 = vsel %vm1630_vm1, %v1629_v10, %v1514_v14  ;;  %v2200_v14 = vld [vmem:[%s7997_s7 + $0x8] sm:$0xff] }
 0x11c   : > { %2270 = vmatpush1.msra.mxu0 %v2200_v14  ;;  %v6580_v14 = vld [vmem:[#allocation3 + $0x90] sm:$0xff] }
 0x11d   : > { %v1544_v22 = vpop.permute.xlu0 %1543  ;;  %2271 = vmatprep.subr.mxu0 %v5621_v1 }
 0x11e   : > { %v1546_v61 = vpop.permute.xlu1 %1545  ;;  %v1646_v32 = vsel %vm1639_vm2, %v1637_v25, %v1544_v22  ;;  %2272 = vmatpush1.msra.mxu0 %v2199_v17  ;;  %v2215_v22 = vld [vmem:[%s7997_s7 + $0x80] sm:$0xff] }
 0x11f   : > { %v1647_v19 = vsel %vm1639_vm2, %v1638_v31, %v1546_v61  ;;  %2301 = vmatprep.subr.mxu0 %v5621_v1 }
 0x120   : > { %2302 = vmatpush2.msra.mxu0 %v2216_v21  ;;  %v6584_v21 = vld [vmem:[#allocation3] sm:$0xff] }
 0x121   : > { %v1576_v6 = vpop.permute.xlu0 %1575  ;;  %2303 = vmatprep.subr.mxu0 %v5621_v1 }
 0x122   : > { %v1655_v33 = vsel %vm1648_vm3, %v1646_v32, %v1576_v6  ;;  %v1578_v34 = vpop.permute.xlu1 %1577  ;;  %2304 = vmatpush2.msra.mxu0 %v2215_v22 }
 0x123   : > { %v1656_v35 = vsel %vm1648_vm3, %v1647_v19, %v1578_v34  ;;  %4827 = vmatprep.mubr.msk.f32.mxu1 %vm1666_vm4, %v1655_v33  ;;  %3331 = vmatprep.subr.mxu0 %v5621_v1 }
 0x124   : > { %4828 = vmatmul.mubr.msk.f32.gmra.mxu1 %vm1666_vm4, %v1656_v35 }
 0x18b   : > { %v4820_v37 = vpop.f32.mrf.mxu1 }
 0x18c   : > { %v1804_v41 = vmul.f32 %v4820_v37, %v6382_v36 }
 0x18d   : > { %v1757_v42 = vpop.f32.mrf.mxu1 }
 0x18e   : > { %v1819_v43 = vadd.f32 %v6387_v38, %v1804_v41  ;;  %v1803_v44 = vmul.f32 %v6382_v36, %v1757_v42 }
 0x190   : > { %v1827_v45 = vmax.f32 %v1819_v43, 0.0  ;;  %v1818_v29 = vadd.f32 %v6387_v38, %v1803_v44 }
 0x192   : > { %1836 = vst.msk [vmem:[#allocation3 + $0x21] sm:$0xff] %vm628_vm11, %v1827_v45  ;;  %v1826_v46 = vmax.f32 %v1818_v29, 0.0 }
 0x194   : > { %1835 = vst.msk [vmem:[#allocation3 + $0x11] sm:$0xff] %vm628_vm11, %v1826_v46 }
 0x199   : > { %v6418_v50 = vld [vmem:[#allocation3 + $0x22] sm:$0xff] }
 0x19a   : > { %4706 = vmatprep.mubr.msk.f32.mxu0 %vm628_vm11, %v6418_v50  ;;  %v1876_v58 = vld [vmem:[#allocation3 + $0x21] sm:$0xff] }
 0x19b   : > { %v1860_v53 = vld [vmem:[#allocation3 + $0x12] sm:$0xff]  ;;  %v6443_v9 = vld [vmem:[#allocation3 + $0x20] sm:$0xff] }
 0x19c   : > { %v1852_v54 = vld [vmem:[#allocation3 + $0x11] sm:$0xff]  ;;  %v4924_v23 = vpack.i.bf16 %v1860_v53, %v6420_v51  ;;  %v4939_v2 = vpack.i.bf16 %v6418_v50, %v1860_v53 }
 0x19d   : > { %v4919_v56 = vpack.i.bf16 %v1852_v54, %v6422_v52  ;;  %v6436_v55 = vld [vmem:[#allocation3 + $0x10] sm:$0xff]  ;;  %v4934_v59 = vpack.i.bf16 %v1876_v58, %v1852_v54 }
 0x19e   : > { %4925 = vrot.lane.b32.xlu1 %v4924_v23, %s7962_s1  ;;  %v4929_v60 = vpack.i.bf16 %v6443_v9, %v6436_v55 }
 0x19f   : > { %4920 = vrot.lane.b32.xlu0 %v4919_v56, %s7964_s21 }
 0x1a2   : > { %4935 = vrot.lane.b32.xlu1 %v4934_v59, %s7960_s23 }
 0x1a3   : > { %4930 = vrot.lane.b32.xlu0 %v4929_v60, %s7998_s30 }
 0x1a7   : > { %4940 = vrot.lane.b32.xlu0 %v4939_v2, %s7958_s3  ;;  %v4823_v4 = vpop.f32.mrf.mxu1 }
 0x1a8   : > { %v1806_v7 = vmul.f32 %v4823_v4, %v6382_v36 }
 0x1a9   : > { %v1767_v12 = vpop.f32.mrf.mxu1 }
 0x1aa   : > { %v1821_v13 = vadd.f32 %v6387_v38, %v1806_v7  ;;  %v1805_v30 = vmul.f32 %v6382_v36, %v1767_v12 }
 0x1ac   : > { %v1829_v15 = vmax.f32 %v1821_v13, 0.0  ;;  %v1820_v16 = vadd.f32 %v6387_v38, %v1805_v30  ;;  %v6575_v30 = vld [vmem:[#allocation3 + $0x91] sm:$0xff] }
 0x1ae   : > { %1838 = vst.msk [vmem:[#allocation3 + $0x41] sm:$0xff] %vm628_vm11, %v1829_v15  ;;  %v1828_v20 = vmax.f32 %v1820_v16, 0.0 }
 0x1b0   : > { %1837 = vst.msk [vmem:[#allocation3 + $0x31] sm:$0xff] %vm628_vm11, %v1828_v20 }
 0x1b5   : > { %v1878_v25 = vld [vmem:[#allocation3 + $0x41] sm:$0xff] }
 0x1b6   : > { %v6507_v31 = vld [vmem:[#allocation3 + $0x40] sm:$0xff] }
 0x1b7   : > { %v1901_v24 = vld [vmem:[#allocation3 + $0x31] sm:$0xff]  ;;  %v6513_v19 = vld [vmem:[#allocation3 + $0x42] sm:$0xff] }
 0x1b8   : > { %v6495_v26 = vld [vmem:[#allocation3 + $0x30] sm:$0xff]  ;;  %v4949_v61 = vpack.i.bf16 %v1901_v24, %v1876_v58  ;;  %v4969_v32 = vpack.i.bf16 %v1878_v25, %v1901_v24 }
 0x1b9   : > { %v4944_v27 = vpack.i.bf16 %v6495_v26, %v6443_v9  ;;  %v6499_v28 = vld [vmem:[#allocation3 + $0x32] sm:$0xff]  ;;  %v4964_v6 = vpack.i.bf16 %v6507_v31, %v6495_v26 }
 0x1ba   : > { %4950 = vrot.lane.b32.xlu0 %v4949_v61, %s7954_s24  ;;  %v4959_v10 = vpack.i.bf16 %v6499_v28, %v6418_v50  ;;  %v4974_v33 = vpack.i.bf16 %v6513_v19, %v6499_v28 }
 0x1bb   : > { %4945 = vrot.lane.b32.xlu1 %v4944_v27, %s7956_s0 }
 0x1be   : > { %4960 = vrot.lane.b32.xlu0 %v4959_v10, %s7962_s1 }
 0x1bf   : > { %4955 = vrot.lane.b32.xlu1 %v4949_v61, %s7964_s21 }
 0x1c2   : > { %4970 = vrot.lane.b32.xlu0 %v4969_v32, %s7960_s23 }
 0x1c3   : > { %4965 = vrot.lane.b32.xlu1 %v4964_v6, %s7998_s30 }
 0x1c7   : > { %4975 = vrot.lane.b32.xlu1 %v4974_v33, %s7958_s3  ;;  %v4826_v34 = vpop.f32.mrf.mxu1 }
 0x1c8   : > { %v1808_v35 = vmul.f32 %v4826_v34, %v6382_v36 }
 0x1c9   : > { %v1777_v37 = vpop.f32.mrf.mxu1 }
 0x1ca   : > { %v1823_v39 = vadd.f32 %v6387_v38, %v1808_v35  ;;  %v1807_v40 = vmul.f32 %v6382_v36, %v1777_v37 }
 0x1cc   : > { %v1831_v41 = vmax.f32 %v1823_v39, 0.0  ;;  %v1822_v42 = vadd.f32 %v6387_v38, %v1807_v40 }
 0x1ce   : > { %1840 = vst.msk [vmem:[#allocation3 + $0x61] sm:$0xff] %vm628_vm11, %v1831_v41  ;;  %v1830_v43 = vmax.f32 %v1822_v42, 0.0 }
 0x1d0   : > { %1839 = vst.msk [vmem:[#allocation3 + $0x51] sm:$0xff] %vm628_vm11, %v1830_v43 }
 0x1d5   : > { %v1880_v49 = vld [vmem:[#allocation3 + $0x61] sm:$0xff] }
 0x1d6   : > { %v6536_v5 = vld [vmem:[#allocation3 + $0x60] sm:$0xff] }
 0x1d7   : > { %v1903_v44 = vld [vmem:[#allocation3 + $0x51] sm:$0xff]  ;;  %v6542_v53 = vld [vmem:[#allocation3 + $0x62] sm:$0xff] }
 0x1d8   : > { %v6524_v45 = vld [vmem:[#allocation3 + $0x50] sm:$0xff]  ;;  %v4984_v29 = vpack.i.bf16 %v1903_v44, %v1878_v25  ;;  %v5004_v50 = vpack.i.bf16 %v1880_v49, %v1903_v44 }
 0x1d9   : > { %v4979_v46 = vpack.i.bf16 %v6524_v45, %v6507_v31  ;;  %v6528_v47 = vld [vmem:[#allocation3 + $0x52] sm:$0xff]  ;;  %v4999_v8 = vpack.i.bf16 %v6536_v5, %v6524_v45 }
 0x1da   : > { %4985 = vrot.lane.b32.xlu1 %v4984_v29, %s7954_s24  ;;  %v4994_v48 = vpack.i.bf16 %v6528_v47, %v6513_v19  ;;  %v5009_v23 = vpack.i.bf16 %v6542_v53, %v6528_v47 }
 0x1db   : > { %4980 = vrot.lane.b32.xlu0 %v4979_v46, %s7956_s0 }
 0x1de   : > { %4995 = vrot.lane.b32.xlu1 %v4994_v48, %s7962_s1 }
 0x1df   : > { %4990 = vrot.lane.b32.xlu0 %v4984_v29, %s7964_s21 }
 0x1e2   : > { %5005 = vrot.lane.b32.xlu1 %v5004_v50, %s7960_s23 }
 0x1e3   : > { %5000 = vrot.lane.b32.xlu0 %v4999_v8, %s7998_s30 }
 0x1e4   : > { %v4829_v54 = vpop.f32.mrf.mxu1 }
 0x1e5   : > { %v1810_v56 = vmul.f32 %v4829_v54, %v6382_v36 }
 0x1e6   : > { %v1787_v18 = vpop.f32.mrf.mxu1 }
 0x1e7   : > { %5010 = vrot.lane.b32.xlu0 %v5009_v23, %s7958_s3  ;;  %v1825_v57 = vadd.f32 %v6387_v38, %v1810_v56  ;;  %v1809_v58 = vmul.f32 %v6382_v36, %v1787_v18 }
 0x1e9   : > { %v1833_v59 = vmax.f32 %v1825_v57, 0.0  ;;  %v1824_v60 = vadd.f32 %v6387_v38, %v1809_v58 }
 0x1eb   : > { %1842 = vst.msk [vmem:[#allocation3 + $0x81] sm:$0xff] %vm628_vm11, %v1833_v59  ;;  %v1832_v62 = vmax.f32 %v1824_v60, 0.0 }
 0x1ed   : > { %1841 = vst.msk [vmem:[#allocation3 + $0x71] sm:$0xff] %vm628_vm11, %v1832_v62 }
 0x1f2   : > { %v1898_v63 = vld [vmem:[#allocation3 + $0x80] sm:$0xff] }
 0x1f3   : > { %2096 = vrot.lane.b32.xlu0 %v1898_v63, %s7956_s0  ;;  %v1882_v38 = vld [vmem:[#allocation3 + $0x81] sm:$0xff] }
 0x1f4   : > { %v1905_v2 = vld [vmem:[#allocation3 + $0x71] sm:$0xff]  ;;  %v6569_v13 = vld [vmem:[#allocation3 + $0x82] sm:$0xff] }
 0x1f5   : > { %v6554_v0 = vld [vmem:[#allocation3 + $0x70] sm:$0xff]  ;;  %v5019_v3 = vpack.i.bf16 %v1905_v2, %v1880_v49  ;;  %v5039_v11 = vpack.i.bf16 %v1882_v38, %v1905_v2 }
 0x1f6   : > { %v5014_v4 = vpack.i.bf16 %v6554_v0, %v6536_v5  ;;  %v6558_v7 = vld [vmem:[#allocation3 + $0x72] sm:$0xff]  ;;  %v5034_v12 = vpack.i.bf16 %v1898_v63, %v6554_v0 }
 0x1f7   : > { %5020 = vrot.lane.b32.xlu0 %v5019_v3, %s7954_s24  ;;  %v5029_v36 = vpack.i.bf16 %v6558_v7, %v6542_v53 }
 0x1f8   : > { %5015 = vrot.lane.b32.xlu1 %v5014_v4, %s7956_s0 }
 0x1fb   : > { %5030 = vrot.lane.b32.xlu0 %v5029_v36, %s7962_s1 }
 0x1fc   : > { %5025 = vrot.lane.b32.xlu1 %v5019_v3, %s7964_s21 }
 0x1ff   : > { %5040 = vrot.lane.b32.xlu0 %v5039_v11, %s7960_s23 }
 0x200   : > { %5035 = vrot.lane.b32.xlu1 %v5034_v12, %s7998_s30 }
 0x203   : > { %2066 = vrot.lane.b32.xlu0 %v6569_v13, %s7958_s3 }
 0x204   : > { %2064 = vrot.lane.b32.xlu1 %v6558_v7, %s7958_s3 }
 0x207   : > { %2130 = vrot.lane.b32.xlu0 %v6575_v30, %s7954_s24 }
 0x208   : > { %2128 = vrot.lane.b32.xlu1 %v1882_v38, %s7954_s24  ;;  %s8002_s24 = smov 64  }
 0x20c   : > { %2098 = vrot.lane.b32.xlu1 %v6580_v14, %s7956_s0  ;;  %s8004_s0 = smov 16  }
 0x210   : > { %v4926_v16 = vpop.permute.xlu1 %4925 }
 0x211   : > { %v4921_v15 = vpop.permute.xlu0 %4920  ;;  %v4927_v24 = vunpack.i.l.bf16 %v4926_v16  ;;  %v4928_v25 = vunpack.i.h.bf16 %v4926_v16 }
 0x212   : > { %v4922_v20 = vunpack.i.l.bf16 %v4921_v15  ;;  %v4923_v22 = vunpack.i.h.bf16 %v4921_v15 }
 0x214   : > { %v2140_v61 = vsel %vm628_vm11, %v6584_v21, %v4922_v20  ;;  %v4936_v27 = vpop.permute.xlu1 %4935  ;;  %v2141_v6 = vsel %vm628_vm11, %v6436_v55, %v4923_v22 }
 0x215   : > { %v4931_v17 = vpop.permute.xlu0 %4930  ;;  %v4937_v34 = vunpack.i.l.bf16 %v4936_v27  ;;  %v2148_v35 = vsel %vm1612_vm14, %v2140_v61, %v4927_v24  ;;  %v4938_v40 = vunpack.i.h.bf16 %v4936_v27  ;;  %v2149_v41 = vsel %vm1612_vm14, %v2141_v6, %v4928_v25 }
 0x216   : > { %v4932_v10 = vunpack.i.l.bf16 %v4931_v17  ;;  %v4933_v33 = vunpack.i.h.bf16 %v4931_v17 }
 0x218   : > { %v2156_v37 = vsel %vm1630_vm1, %v2148_v35, %v4932_v10  ;;  %v2157_v42 = vsel %vm1630_vm1, %v2149_v41, %v4933_v33 }
 0x219   : > { %v4941_v32 = vpop.permute.xlu0 %4940  ;;  %v2164_v55 = vsel %vm1648_vm3, %v2156_v37, %v4937_v34  ;;  %v2165_v54 = vsel %vm1648_vm3, %v2157_v42, %v4938_v40 }
 0x21a   : > { %v4942_v39 = vunpack.i.l.bf16 %v4941_v32  ;;  %v4943_v43 = vunpack.i.h.bf16 %v4941_v32 }
 0x21c   : > { %v2173_v50 = vsel %vm2172_vm0, %v2164_v55, %v4942_v39  ;;  %v2174_v18 = vsel %vm2172_vm0, %v2165_v54, %v4943_v43 }
 0x22c   : > { %v4951_v44 = vpop.permute.xlu0 %4950 }
 0x22d   : > { %v4946_v29 = vpop.permute.xlu1 %4945  ;;  %v4952_v46 = vunpack.i.l.bf16 %v4951_v44  ;;  %v4953_v23 = vunpack.i.h.bf16 %v4951_v44 }
 0x22e   : > { %v4948_v48 = vunpack.i.h.bf16 %v4946_v29  ;;  %v4947_v49 = vunpack.i.l.bf16 %v4946_v29 }
 0x230   : > { %v2182_v8 = vsel %vm2181_vm5, %v2173_v50, %v4947_v49  ;;  %v2183_v57 = vsel %vm2181_vm5, %v2174_v18, %v4948_v48  ;;  %v4961_v60 = vpop.permute.xlu0 %4960 }
 0x231   : > { %v2191_v56 = vsel %vm2190_vm6, %v2182_v8, %v4952_v46  ;;  %v2192_v58 = vsel %vm2190_vm6, %v2183_v57, %v4953_v23  ;;  %v4956_v59 = vpop.permute.xlu1 %4955  ;;  %v4962_v3 = vunpack.i.l.bf16 %v4961_v60  ;;  %v4963_v11 = vunpack.i.h.bf16 %v4961_v60 }
 0x232   : > { %2306 = vmatmul.mubr.f32.vlgmr.msra.gmra.mxu0 %v2191_v56  ;;  %v4957_v63 = vunpack.i.l.bf16 %v4956_v59  ;;  %v4958_v2 = vunpack.i.h.bf16 %v4956_v59 }
 0x233   : > { %4707 = vmatprep.mubr.msk.f32.mxu0 %vm628_vm11, %v6499_v28 }
 0x234   : > { %v2142_v4 = vsel %vm628_vm11, %v6443_v9, %v4957_v63  ;;  %v4971_v36 = vpop.permute.xlu0 %4970  ;;  %v2143_v28 = vsel %vm628_vm11, %v6495_v26, %v4958_v2 }
 0x235   : > { %v4966_v62 = vpop.permute.xlu1 %4965  ;;  %v4972_v16 = vunpack.i.l.bf16 %v4971_v36  ;;  %v4973_v22 = vunpack.i.h.bf16 %v4971_v36  ;;  %v2151_v24 = vsel %vm1612_vm14, %v2143_v28, %v4963_v11 }
 0x236   : > { %2311 = vmatmul.mubr.f32.gmra.mxu0 %v2192_v58  ;;  %v4967_v38 = vunpack.i.l.bf16 %v4966_v62  ;;  %v4968_v15 = vunpack.i.h.bf16 %v4966_v62 }
 0x237   : > { %4708 = vmatprep.mubr.msk.f32.mxu0 %vm628_vm11, %v6513_v19  ;;  %v2150_v19 = vsel %vm1612_vm14, %v2142_v4, %v4962_v3 }
 0x238   : > { %v2158_v17 = vsel %vm1630_vm1, %v2150_v19, %v4967_v38  ;;  %v2159_v61 = vsel %vm1630_vm1, %v2151_v24, %v4968_v15 }
 0x239   : > { %v4976_v12 = vpop.permute.xlu1 %4975  ;;  %v2166_v26 = vsel %vm1648_vm3, %v2158_v17, %v4972_v16  ;;  %v2167_v35 = vsel %vm1648_vm3, %v2159_v61, %v4973_v22 }
 0x23a   : > { %v4977_v20 = vunpack.i.l.bf16 %v4976_v12  ;;  %v4978_v9 = vunpack.i.h.bf16 %v4976_v12 }
 0x23c   : > { %v2175_v33 = vsel %vm2172_vm0, %v2166_v26, %v4977_v20  ;;  %v2176_v40 = vsel %vm2172_vm0, %v2167_v35, %v4978_v9 }
 0x24c   : > { %v4986_v27 = vpop.permute.xlu1 %4985 }
 0x24d   : > { %v4981_v10 = vpop.permute.xlu0 %4980  ;;  %v4987_v25 = vunpack.i.l.bf16 %v4986_v27  ;;  %v4988_v37 = vunpack.i.h.bf16 %v4986_v27 }
 0x24e   : > { %v4983_v32 = vunpack.i.h.bf16 %v4981_v10  ;;  %v4982_v6 = vunpack.i.l.bf16 %v4981_v10 }
 0x250   : > { %v2184_v34 = vsel %vm2181_vm5, %v2175_v33, %v4982_v6  ;;  %v2185_v41 = vsel %vm2181_vm5, %v2176_v40, %v4983_v32  ;;  %v4996_v29 = vpop.permute.xlu1 %4995 }
 0x251   : > { %v2193_v39 = vsel %vm2190_vm6, %v2184_v34, %v4987_v25  ;;  %v2194_v42 = vsel %vm2190_vm6, %v2185_v41, %v4988_v37  ;;  %v4991_v43 = vpop.permute.xlu0 %4990  ;;  %v4997_v49 = vunpack.i.l.bf16 %v4996_v29  ;;  %v4998_v23 = vunpack.i.h.bf16 %v4996_v29 }
 0x252   : > { %2316 = vmatmul.mubr.f32.gmra.mxu0 %v2193_v39  ;;  %v4992_v55 = vunpack.i.l.bf16 %v4991_v43  ;;  %v4993_v46 = vunpack.i.h.bf16 %v4991_v43 }
 0x253   : > { %4709 = vmatprep.mubr.msk.f32.mxu0 %vm628_vm11, %v6528_v47 }
 0x254   : > { %v2144_v50 = vsel %vm628_vm11, %v6507_v31, %v4992_v55  ;;  %v5006_v8 = vpop.permute.xlu1 %5005  ;;  %v2145_v47 = vsel %vm628_vm11, %v6524_v45, %v4993_v46  ;;  %v6657_v55 = vld [vmem:[#allocation3 + $0x92] sm:$0xff] }
 0x255   : > { %v5001_v44 = vpop.permute.xlu0 %5000  ;;  %v5007_v57 = vunpack.i.l.bf16 %v5006_v8  ;;  %v5008_v60 = vunpack.i.h.bf16 %v5006_v8  ;;  %v2153_v62 = vsel %vm1612_vm14, %v2145_v47, %v4998_v23  ;;  %v4790_v23 = vpop.f32.mrf.mxu0 }
 0x256   : > { %2321 = vmatmul.mubr.f32.gmra.mxu0 %v2194_v42  ;;  %v5002_v54 = vunpack.i.l.bf16 %v5001_v44  ;;  %v5003_v56 = vunpack.i.h.bf16 %v5001_v44 }
 0x257   : > { %4710 = vmatprep.mubr.msk.f32.mxu0 %vm628_vm11, %v6542_v53  ;;  %v2152_v53 = vsel %vm1612_vm14, %v2144_v50, %v4997_v49  ;;  %v1234_v47 = vpop.f32.mrf.mxu0 }
 0x258   : > { %v2160_v58 = vsel %vm1630_vm1, %v2152_v53, %v5002_v54  ;;  %v2161_v63 = vsel %vm1630_vm1, %v2153_v62, %v5003_v56  ;;  %v6681_v62 = vld [vmem:[%s7999_s8] ss:$0 sm:$0xff] }
 0x259   : > { %v5011_v48 = vpop.permute.xlu0 %5010  ;;  %v2168_v45 = vsel %vm1648_vm3, %v2160_v58, %v5007_v57  ;;  %v2169_v28 = vsel %vm1648_vm3, %v2161_v63, %v5008_v60  ;;  %v6666_v56 = vpop.f32.mrf.mxu0 }
 0x25a   : > { %v5012_v59 = vunpack.i.l.bf16 %v5011_v48  ;;  %v5013_v31 = vunpack.i.h.bf16 %v5011_v48 }
 0x25c   : > { %v2177_v11 = vsel %vm2172_vm0, %v2168_v45, %v5012_v59  ;;  %v2178_v20 = vsel %vm2172_vm0, %v2169_v28, %v5013_v31  ;;  %v6688_v31 = vld [vmem:[%s7932_s9] ss:$0 sm:$0xff]  ;;  %v2759_v28 = vld [vmem:[%s7933_s10 + $0x78] sm:$0xff] }
 0x25d   : > { %2787 = vmatpush1.msra.mxu1 %v2759_v28 }
 0x25e   : > { %2788 = vmatprep.subr.mxu1 %v5621_v1 }
 0x265   : > { %v2097_v18 = vpop.permute.xlu0 %2096 }
 0x269   : > { %v5021_v2 = vpop.permute.xlu0 %5020 }
 0x26a   : > { %v5016_v3 = vpop.permute.xlu1 %5015  ;;  %v5022_v4 = vunpack.i.l.bf16 %v5021_v2  ;;  %v5023_v15 = vunpack.i.h.bf16 %v5021_v2 }
 0x26b   : > { %v5018_v36 = vunpack.i.h.bf16 %v5016_v3  ;;  %v5017_v38 = vunpack.i.l.bf16 %v5016_v3 }
 0x26d   : > { %v2186_v12 = vsel %vm2181_vm5, %v2177_v11, %v5017_v38  ;;  %v5031_v16 = vpop.permute.xlu0 %5030  ;;  %v2187_v24 = vsel %vm2181_vm5, %v2178_v20, %v5018_v36  ;;  %v2756_v20 = vld [vmem:[%s7933_s10 + $0x60] sm:$0xff] }
 0x26e   : > { %v5026_v19 = vpop.permute.xlu1 %5025  ;;  %v2195_v17 = vsel %vm2190_vm6, %v2186_v12, %v5022_v4  ;;  %v5032_v61 = vunpack.i.l.bf16 %v5031_v16  ;;  %v2196_v32 = vsel %vm2190_vm6, %v2187_v24, %v5023_v15  ;;  %v5033_v6 = vunpack.i.h.bf16 %v5031_v16  ;;  %v2758_v15 = vld [vmem:[%s7933_s10 + $0x70] sm:$0xff] }
 0x26f   : > { %v5027_v22 = vunpack.i.l.bf16 %v5026_v19  ;;  %2326 = vmatmul.mubr.f32.gmra.mxu0 %v2195_v17  ;;  %v5028_v9 = vunpack.i.h.bf16 %v5026_v19  ;;  %2789 = vmatpush1.msra.mxu1 %v2758_v15  ;;  %v2757_v17 = vld [vmem:[%s7933_s10 + $0x68] sm:$0xff] }
 0x270   : > { %4711 = vmatprep.mubr.msk.f32.mxu0 %vm628_vm11, %v6558_v7  ;;  %2790 = vmatprep.subr.mxu1 %v5621_v1 }
 0x271   : > { %v2146_v27 = vsel %vm628_vm11, %v6536_v5, %v5027_v22  ;;  %v5041_v10 = vpop.permute.xlu0 %5040  ;;  %v2147_v34 = vsel %vm628_vm11, %v6554_v0, %v5028_v9  ;;  %2791 = vmatpush1.msra.mxu1 %v2757_v17  ;;  %v2755_v22 = vld [vmem:[%s7933_s10 + $0x58] sm:$0xff] }
 0x272   : > { %v5036_v25 = vpop.permute.xlu1 %5035  ;;  %v5042_v26 = vunpack.i.l.bf16 %v5041_v10  ;;  %v2154_v7 = vsel %vm1612_vm14, %v2146_v27, %v5032_v61  ;;  %v5043_v40 = vunpack.i.h.bf16 %v5041_v10  ;;  %v2155_v41 = vsel %vm1612_vm14, %v2147_v34, %v5033_v6  ;;  %2792 = vmatprep.subr.mxu1 %v5621_v1  ;;  %v2754_v10 = vld [vmem:[%s7933_s10 + $0x50] sm:$0xff]  ;;  %v2752_v34 = vld [vmem:[%s7933_s10 + $0x40] sm:$0xff] }
 0x273   : > { %v5037_v33 = vunpack.i.l.bf16 %v5036_v25  ;;  %2331 = vmatmul.mubr.f32.gmra.mxu0 %v2196_v32  ;;  %v5038_v35 = vunpack.i.h.bf16 %v5036_v25  ;;  %2793 = vmatpush1.msra.mxu1 %v2756_v20  ;;  %v2753_v25 = vld [vmem:[%s7933_s10 + $0x48] sm:$0xff] }
 0x274   : > { %4712 = vmatprep.mubr.msk.f32.mxu0 %vm628_vm11, %v6569_v13  ;;  %2794 = vmatprep.subr.mxu1 %v5621_v1 }
 0x275   : > { %v2162_v37 = vsel %vm1630_vm1, %v2154_v7, %v5037_v33  ;;  %v2163_v43 = vsel %vm1630_vm1, %v2155_v41, %v5038_v35  ;;  %v2067_v44 = vpop.permute.xlu0 %2066  ;;  %2795 = vmatpush1.msra.mxu1 %v2755_v22  ;;  %v2751_v35 = vld [vmem:[%s7933_s10 + $0x38] sm:$0xff] }
 0x276   : > { %v2065_v5 = vpop.permute.xlu1 %2064  ;;  %v2170_v39 = vsel %vm1648_vm3, %v2162_v37, %v5042_v26  ;;  %v2171_v13 = vsel %vm1648_vm3, %v2163_v43, %v5043_v40  ;;  %2796 = vmatprep.subr.mxu1 %v5621_v1  ;;  %v2750_v37 = vld [vmem:[%s7933_s10 + $0x30] sm:$0xff]  ;;  %v2747_v40 = vld [vmem:[%s7933_s10 + $0x18] sm:$0xff] }
 0x277   : > { %v2179_v42 = vsel %vm2172_vm0, %v2170_v39, %v2065_v5  ;;  %v2180_v49 = vsel %vm2172_vm0, %v2171_v13, %v2067_v44  ;;  %2797 = vmatpush1.msra.mxu1 %v2754_v10  ;;  %v2749_v5 = vld [vmem:[%s7933_s10 + $0x28] sm:$0xff]  ;;  %v2748_v39 = vld [vmem:[%s7933_s10 + $0x20] sm:$0xff]  ;;  %v2746_v43 = vld [vmem:[%s7933_s10 + $0x10] sm:$0xff] }
 0x278   : > { %v2188_v29 = vsel %vm2181_vm5, %v2179_v42, %v2097_v18  ;;  %v6668_v18 = vpop.f32.mrf.mxu0  ;;  %2798 = vmatprep.subr.mxu1 %v5621_v1 }
 0x279   : > { %v2131_v48 = vpop.permute.xlu0 %2130  ;;  %2799 = vmatpush1.msra.mxu1 %v2753_v25 }
 0x27a   : > { %v2129_v0 = vpop.permute.xlu1 %2128  ;;  %v6670_v57 = vpop.f32.mrf.mxu0  ;;  %2800 = vmatprep.subr.mxu1 %v5621_v1 }
 0x27b   : > { %v2197_v46 = vsel %vm2190_vm6, %v2188_v29, %v2129_v0  ;;  %2801 = vmatpush1.msra.mxu1 %v2752_v34  ;;  %v2745_v29 = vld [vmem:[%s7933_s10 + $0x8] sm:$0xff] }
 0x27c   : > { %2336 = vmatmul.mubr.f32.gmra.mxu0 %v2197_v46  ;;  %v6672_v53 = vpop.f32.mrf.mxu0  ;;  %2802 = vmatprep.subr.mxu1 %v5621_v1 }
 0x27d   : > { %4713 = vmatprep.mubr.msk.f32.mxu0 %vm628_vm11, %v6657_v55  ;;  %2803 = vmatpush1.msra.mxu1 %v2751_v35 }
 0x27e   : > { %v2099_v50 = vpop.permute.xlu1 %2098  ;;  %v6674_v58 = vpop.f32.mrf.mxu0  ;;  %2804 = vmatprep.subr.mxu1 %v5621_v1 }
 0x27f   : > { %v2189_v8 = vsel %vm2181_vm5, %v2180_v49, %v2099_v50  ;;  %2805 = vmatpush1.msra.mxu1 %v2750_v37  ;;  %v2744_v49 = vld [vmem:[%s7933_s10] sm:$0xff] }
 0x280   : > { %v2198_v54 = vsel %vm2190_vm6, %v2189_v8, %v2131_v48  ;;  %v6676_v59 = vpop.f32.mrf.mxu0  ;;  %2806 = vmatprep.subr.mxu1 %v5621_v1 }
 0x281   : > { %2341 = vmatmul.mubr.f32.gmra.mxu0 %v2198_v54  ;;  %2807 = vmatpush1.msra.mxu1 %v2749_v5 }
 0x282   : > { %2808 = vmatprep.subr.mxu1 %v5621_v1 }
 0x283   : > { %2809 = vmatpush1.msra.mxu1 %v2748_v39 }
 0x284   : > { %2810 = vmatprep.subr.mxu1 %v5621_v1 }
 0x285   : > { %2811 = vmatpush1.msra.mxu1 %v2747_v40 }
 0x286   : > { %2812 = vmatprep.subr.mxu1 %v5621_v1 }
 0x287   : > { %2813 = vmatpush1.msra.mxu1 %v2746_v43 }
 0x288   : > { %2814 = vmatprep.subr.mxu1 %v5621_v1 }
 0x289   : > { %2815 = vmatpush1.msra.mxu1 %v2745_v29 }
 0x28a   : > { %2816 = vmatprep.subr.mxu1 %v5621_v1 }
 0x28b   : > { %2817 = vmatpush1.msra.mxu1 %v2744_v49 }
 0x28c   : > { %2846 = vmatprep.subr.mxu1 %v5621_v1 }
 0x2f2   : > { %v2307_v60 = vpop.f32.mrf.mxu0 }
 0x2f3   : > { %v6683_v63 = vadd.f32 %v2307_v60, %v1234_v47 }
 0x2f4   : > { %v2309_v2 = vpop.f32.mrf.mxu0 }
 0x2f5   : > { %v2353_v3 = vmul.f32 %v6681_v62, %v6683_v63 }
 0x2f6   : > { %v2312_v4 = vpop.f32.mrf.mxu0 }
 0x2f7   : > { %v2368_v36 = vadd.f32 %v6688_v31, %v2353_v3  ;;  %v6693_v38 = vadd.f32 %v4790_v23, %v2312_v4  ;;  %v2761_v23 = vld [vmem:[%s7933_s10 + $0x88] sm:$0xff] }
 0x2f8   : > { %v2314_v45 = vpop.f32.mrf.mxu0  ;;  %2847 = vmatpush2.msra.mxu1 %v2761_v23 }
 0x2f9   : > { %v2376_v11 = vmax.f32 %v2368_v36, 0.0  ;;  %v2354_v12 = vmul.f32 %v6681_v62, %v6693_v38  ;;  %2848 = vmatprep.subr.mxu1 %v5621_v1 }
 0x2fb   : > { %2384 = vst.msk [vmem:[#allocation3 + $0x11] sm:$0xff] %vm628_vm11, %v2376_v11  ;;  %v2369_v16 = vadd.f32 %v6688_v31, %v2354_v12 }
 0x2fd   : > { %v2377_v19 = vmax.f32 %v2369_v16, 0.0 }
 0x2ff   : > { %2385 = vst.msk [vmem:[#allocation3 + $0x21] sm:$0xff] %vm628_vm11, %v2377_v19 }
 0x302   : > { %v2409_v24 = vld [vmem:[#allocation3 + $0x12] sm:$0xff] }
 0x303   : > { %v2401_v61 = vld [vmem:[#allocation3 + $0x11] sm:$0xff]  ;;  %v5049_v9 = vpack.i.bf16 %v2409_v24, %v6420_v51 }
 0x304   : > { %v5044_v27 = vpack.i.bf16 %v2401_v61, %v6422_v52  ;;  %v6730_v32 = vld [vmem:[#allocation3 + $0x10] sm:$0xff] }
 0x305   : > { %5050 = vrot.lane.b32.xlu0 %v5049_v9, %s7962_s1 }
 0x306   : > { %5045 = vrot.lane.b32.xlu1 %v5044_v27, %s7964_s21  ;;  %v6732_v51 = vld [vmem:[#allocation3 + $0x22] sm:$0xff] }
 0x307   : > { %v2425_v52 = vld [vmem:[#allocation3 + $0x21] sm:$0xff]  ;;  %4716 = vmatprep.mubr.msk.f32.mxu1 %vm628_vm11, %v6732_v51  ;;  %v5064_v7 = vpack.i.bf16 %v6732_v51, %v2409_v24 }
 0x308   : > { %v6734_v6 = vld [vmem:[#allocation3 + $0x20] sm:$0xff]  ;;  %v5059_v26 = vpack.i.bf16 %v2425_v52, %v2401_v61 }
 0x309   : > { %v5054_v33 = vpack.i.bf16 %v6734_v6, %v6730_v32 }
 0x30a   : > { %5060 = vrot.lane.b32.xlu0 %v5059_v26, %s7960_s23 }
 0x30b   : > { %5055 = vrot.lane.b32.xlu1 %v5054_v33, %s7998_s30 }
 0x30f   : > { %5065 = vrot.lane.b32.xlu1 %v5064_v7, %s7958_s3 }
 0x312   : > { %v2317_v41 = vpop.f32.mrf.mxu0 }
 0x313   : > { %v6769_v42 = vadd.f32 %v2317_v41, %v6668_v18 }
 0x314   : > { %v2319_v44 = vpop.f32.mrf.mxu0 }
 0x315   : > { %v2355_v0 = vmul.f32 %v6681_v62, %v6769_v42 }
 0x316   : > { %v2322_v13 = vpop.f32.mrf.mxu0 }
 0x317   : > { %v2370_v46 = vadd.f32 %v6688_v31, %v2355_v0  ;;  %v6783_v48 = vadd.f32 %v6666_v56, %v2322_v13  ;;  %v2760_v56 = vld [vmem:[%s7933_s10 + $0x80] sm:$0xff] }
 0x318   : > { %v2324_v50 = vpop.f32.mrf.mxu0  ;;  %2849 = vmatpush2.msra.mxu1 %v2760_v56 }
 0x319   : > { %v2378_v8 = vmax.f32 %v2370_v46, 0.0  ;;  %v2356_v54 = vmul.f32 %v6681_v62, %v6783_v48  ;;  %3884 = vmatprep.subr.mxu1 %v5621_v1 }
 0x31b   : > { %2386 = vst.msk [vmem:[#allocation3 + $0x31] sm:$0xff] %vm628_vm11, %v2378_v8  ;;  %v2371_v47 = vadd.f32 %v6688_v31, %v2356_v54 }
 0x31d   : > { %v2379_v18 = vmax.f32 %v2371_v47, 0.0 }
 0x31f   : > { %2387 = vst.msk [vmem:[#allocation3 + $0x41] sm:$0xff] %vm628_vm11, %v2379_v18 }
 0x322   : > { %v6804_v60 = vld [vmem:[#allocation3 + $0x30] sm:$0xff] }
 0x323   : > { %v2449_v2 = vld [vmem:[#allocation3 + $0x31] sm:$0xff]  ;;  %v5069_v3 = vpack.i.bf16 %v6804_v60, %v6734_v6 }
 0x324   : > { %v5074_v4 = vpack.i.bf16 %v2449_v2, %v2425_v52  ;;  %v6808_v36 = vld [vmem:[#allocation3 + $0x32] sm:$0xff] }
 0x325   : > { %5070 = vrot.lane.b32.xlu0 %v5069_v3, %s8000_s25  ;;  %v5084_v45 = vpack.i.bf16 %v6808_v36, %v6732_v51 }
 0x326   : > { %5075 = vrot.lane.b32.xlu1 %v5074_v4, %s8001_s29  ;;  %v6814_v11 = vld [vmem:[#allocation3 + $0x40] sm:$0xff] }
 0x327   : > { %v2427_v12 = vld [vmem:[#allocation3 + $0x41] sm:$0xff]  ;;  %v5089_v28 = vpack.i.bf16 %v6814_v11, %v6804_v60 }
 0x328   : > { %v5094_v15 = vpack.i.bf16 %v2427_v12, %v2449_v2  ;;  %v6820_v16 = vld [vmem:[#allocation3 + $0x42] sm:$0xff] }
 0x329   : > { %5080 = vrot.lane.b32.xlu0 %v5074_v4, %s7964_s21  ;;  %v5099_v17 = vpack.i.bf16 %v6820_v16, %v6808_v36 }
 0x32a   : > { %5085 = vrot.lane.b32.xlu1 %v5084_v45, %s7962_s1 }
 0x32d   : > { %5090 = vrot.lane.b32.xlu0 %v5089_v28, %s7998_s30 }
 0x32e   : > { %5095 = vrot.lane.b32.xlu1 %v5094_v15, %s7960_s23 }
 0x32f   : > { %v2327_v19 = vpop.f32.mrf.mxu0 }
 0x330   : > { %v6827_v20 = vadd.f32 %v2327_v19, %v6672_v53 }
 0x331   : > { %v2329_v22 = vpop.f32.mrf.mxu0  ;;  %5100 = vrot.lane.b32.xlu0 %v5099_v17, %s7958_s3 }
 0x332   : > { %v2357_v24 = vmul.f32 %v6681_v62, %v6827_v20 }
 0x333   : > { %v2332_v61 = vpop.f32.mrf.mxu0 }
 0x334   : > { %v2372_v9 = vadd.f32 %v6688_v31, %v2357_v24  ;;  %v6834_v27 = vadd.f32 %v6670_v57, %v2332_v61 }
 0x335   : > { %v2334_v10 = vpop.f32.mrf.mxu0 }
 0x336   : > { %v2380_v25 = vmax.f32 %v2372_v9, 0.0  ;;  %v2358_v51 = vmul.f32 %v6681_v62, %v6834_v27 }
 0x338   : > { %2388 = vst.msk [vmem:[#allocation3 + $0x51] sm:$0xff] %vm628_vm11, %v2380_v25  ;;  %v2373_v53 = vadd.f32 %v6688_v31, %v2358_v51 }
 0x33a   : > { %v2381_v52 = vmax.f32 %v2373_v53, 0.0 }
 0x33c   : > { %2389 = vst.msk [vmem:[#allocation3 + $0x61] sm:$0xff] %vm628_vm11, %v2381_v52  ;;  %v2337_v26 = vpop.f32.mrf.mxu0 }
 0x33d   : > { %v6842_v33 = vadd.f32 %v2337_v26, %v6676_v59 }
 0x33e   : > { %v2339_v34 = vpop.f32.mrf.mxu0 }
 0x33f   : > { %v2359_v57 = vmul.f32 %v6681_v62, %v6842_v33  ;;  %v2451_v35 = vld [vmem:[#allocation3 + $0x51] sm:$0xff] }
 0x340   : > { %v6846_v7 = vld [vmem:[#allocation3 + $0x50] sm:$0xff]  ;;  %v5109_v37 = vpack.i.bf16 %v2451_v35, %v2427_v12 }
 0x341   : > { %v5104_v5 = vpack.i.bf16 %v6846_v7, %v6814_v11  ;;  %v2374_v39 = vadd.f32 %v6688_v31, %v2359_v57  ;;  %v2342_v40 = vpop.f32.mrf.mxu0  ;;  %v6851_v41 = vld [vmem:[#allocation3 + $0x52] sm:$0xff] }
 0x342   : > { %v6854_v43 = vadd.f32 %v6674_v58, %v2342_v40  ;;  %5110 = vrot.lane.b32.xlu0 %v5109_v37, %s8001_s29  ;;  %v5119_v29 = vpack.i.bf16 %v6851_v41, %v6820_v16 }
 0x343   : > { %5105 = vrot.lane.b32.xlu1 %v5104_v5, %s8000_s25  ;;  %v2382_v59 = vmax.f32 %v2374_v39, 0.0  ;;  %v2344_v44 = vpop.f32.mrf.mxu0  ;;  %v2429_v13 = vld [vmem:[#allocation3 + $0x61] sm:$0xff] }
 0x344   : > { %v2360_v0 = vmul.f32 %v6681_v62, %v6854_v43  ;;  %v6863_v46 = vld [vmem:[#allocation3 + $0x60] sm:$0xff]  ;;  %v5129_v50 = vpack.i.bf16 %v2429_v13, %v2451_v35 }
 0x345   : > { %2390 = vst.msk [vmem:[#allocation3 + $0x71] sm:$0xff] %vm628_vm11, %v2382_v59  ;;  %v5124_v8 = vpack.i.bf16 %v6863_v46, %v6846_v7  ;;  %v6870_v62 = vld [vmem:[#allocation3 + $0x62] sm:$0xff] }
 0x346   : > { %v2375_v58 = vadd.f32 %v6688_v31, %v2360_v0  ;;  %5120 = vrot.lane.b32.xlu0 %v5119_v29, %s7962_s1  ;;  %v5134_v31 = vpack.i.bf16 %v6870_v62, %v6851_v41 }
 0x347   : > { %5115 = vrot.lane.b32.xlu1 %v5109_v37, %s7964_s21 }
 0x348   : > { %v2383_v49 = vmax.f32 %v2375_v58, 0.0 }
 0x34a   : > { %2391 = vst.msk [vmem:[#allocation3 + $0x81] sm:$0xff] %vm628_vm11, %v2383_v49  ;;  %5130 = vrot.lane.b32.xlu0 %v5129_v50, %s7960_s23 }
 0x34b   : > { %5125 = vrot.lane.b32.xlu1 %v5124_v8, %s7998_s30 }
 0x34c   : > { %v6877_v54 = vld [vmem:[#allocation3 + $0x70] sm:$0xff] }
 0x34d   : > { %v5139_v23 = vpack.i.bf16 %v6877_v54, %v6863_v46  ;;  %v2453_v47 = vld [vmem:[#allocation3 + $0x71] sm:$0xff] }
 0x34e   : > { %v5144_v56 = vpack.i.bf16 %v2453_v47, %v2429_v13  ;;  %v6883_v18 = vld [vmem:[#allocation3 + $0x72] sm:$0xff] }
 0x34f   : > { %5135 = vrot.lane.b32.xlu1 %v5134_v31, %s7958_s3  ;;  %5140 = vrot.lane.b32.xlu0 %v5139_v23, %s8000_s25  ;;  %v5154_v2 = vpack.i.bf16 %v6883_v18, %v6870_v62 }
 0x351   : > { %v2431_v3 = vld [vmem:[#allocation3 + $0x81] sm:$0xff] }
 0x352   : > { %v2423_v4 = vld [vmem:[#allocation3 + $0x80] sm:$0xff]  ;;  %v5164_v45 = vpack.i.bf16 %v2431_v3, %v2453_v47 }
 0x353   : > { %5145 = vrot.lane.b32.xlu1 %v5144_v56, %s8001_s29  ;;  %5150 = vrot.lane.b32.xlu0 %v5144_v56, %s7964_s21  ;;  %v5159_v12 = vpack.i.bf16 %v2423_v4, %v6877_v54  ;;  %v6897_v28 = vld [vmem:[#allocation3 + $0x82] sm:$0xff] }
 0x357   : > { %5155 = vrot.lane.b32.xlu1 %v5154_v2, %s7962_s1  ;;  %2612 = vrot.lane.b32.xlu0 %v6883_v18, %s7958_s3 }
 0x35b   : > { %5165 = vrot.lane.b32.xlu1 %v5164_v45, %s7960_s23  ;;  %5160 = vrot.lane.b32.xlu0 %v5159_v12, %s7998_s30  ;;  %s8003_s23 = smov 80  }
 0x35f   : > { %2644 = vrot.lane.b32.xlu1 %v2423_v4, %s8000_s25  ;;  %2676 = vrot.lane.b32.xlu0 %v2431_v3, %s8001_s29 }
 0x363   : > { %2614 = vrot.lane.b32.xlu1 %v6897_v28, %s7958_s3  ;;  %2646 = vrot.lane.b32.xlu0 %v6580_v14, %s8000_s25 }
 0x367   : > { %2678 = vrot.lane.b32.xlu1 %v6575_v30, %s8001_s29 }
 0x377   : > { %v5051_v19 = vpop.permute.xlu0 %5050 }
 0x378   : > { %v5046_v15 = vpop.permute.xlu1 %5045  ;;  %v5052_v61 = vunpack.i.l.bf16 %v5051_v19  ;;  %v5053_v51 = vunpack.i.h.bf16 %v5051_v19 }
 0x379   : > { %v5047_v22 = vunpack.i.l.bf16 %v5046_v15  ;;  %v5048_v24 = vunpack.i.h.bf16 %v5046_v15 }
 0x37b   : > { %v2688_v9 = vsel %vm628_vm11, %v6584_v21, %v5047_v22  ;;  %v2689_v52 = vsel %vm628_vm11, %v6730_v32, %v5048_v24 }
 0x37c   : > { %v5061_v10 = vpop.permute.xlu0 %5060  ;;  %v2696_v30 = vsel %vm1612_vm14, %v2688_v9, %v5052_v61  ;;  %v2697_v37 = vsel %vm1612_vm14, %v2689_v52, %v5053_v51 }
 0x37d   : > { %v5056_v17 = vpop.permute.xlu1 %5055  ;;  %v5062_v26 = vunpack.i.l.bf16 %v5061_v10  ;;  %v5063_v35 = vunpack.i.h.bf16 %v5061_v10 }
 0x37e   : > { %v5057_v25 = vunpack.i.l.bf16 %v5056_v17  ;;  %v5058_v14 = vunpack.i.h.bf16 %v5056_v17 }
 0x380   : > { %v2704_v34 = vsel %vm1630_vm1, %v2696_v30, %v5057_v25  ;;  %v2705_v5 = vsel %vm1630_vm1, %v2697_v37, %v5058_v14 }
 0x381   : > { %v5066_v53 = vpop.permute.xlu1 %5065  ;;  %v2712_v59 = vsel %vm1648_vm3, %v2704_v34, %v5062_v26  ;;  %v2713_v58 = vsel %vm1648_vm3, %v2705_v5, %v5063_v35 }
 0x382   : > { %v5067_v57 = vunpack.i.l.bf16 %v5066_v53  ;;  %v5068_v21 = vunpack.i.h.bf16 %v5066_v53 }
 0x384   : > { %v2720_v29 = vsel %vm2172_vm0, %v2712_v59, %v5067_v57  ;;  %v2721_v8 = vsel %vm2172_vm0, %v2713_v58, %v5068_v21 }
 0x397   : > { %v5071_v39 = vpop.permute.xlu0 %5070 }
 0x398   : > { %v5076_v40 = vpop.permute.xlu1 %5075  ;;  %v5073_v44 = vunpack.i.h.bf16 %v5071_v39  ;;  %v5072_v0 = vunpack.i.l.bf16 %v5071_v39 }
 0x399   : > { %v5077_v32 = vunpack.i.l.bf16 %v5076_v40  ;;  %v5078_v49 = vunpack.i.h.bf16 %v5076_v40 }
 0x39a   : > { %v2728_v13 = vsel %vm2181_vm5, %v2720_v29, %v5072_v0  ;;  %v2729_v31 = vsel %vm2181_vm5, %v2721_v8, %v5073_v44 }
 0x39b   : > { %v2736_v50 = vsel %vm2190_vm6, %v2728_v13, %v5077_v32  ;;  %v2737_v23 = vsel %vm2190_vm6, %v2729_v31, %v5078_v49  ;;  %v5081_v47 = vpop.permute.xlu0 %5080 }
 0x39c   : > { %2851 = vmatmul.mubr.f32.vlgmr.msra.gmra.mxu1 %v2736_v50  ;;  %v5086_v56 = vpop.permute.xlu1 %5085  ;;  %v5082_v3 = vunpack.i.l.bf16 %v5081_v47  ;;  %v5083_v4 = vunpack.i.h.bf16 %v5081_v47 }
 0x39d   : > { %4717 = vmatprep.mubr.msk.f32.mxu1 %vm628_vm11, %v6808_v36  ;;  %v5087_v45 = vunpack.i.l.bf16 %v5086_v56  ;;  %v5088_v17 = vunpack.i.h.bf16 %v5086_v56 }
 0x39e   : > { %v2690_v12 = vsel %vm628_vm11, %v6734_v6, %v5082_v3  ;;  %v2691_v36 = vsel %vm628_vm11, %v6804_v60, %v5083_v4 }
 0x39f   : > { %v5091_v2 = vpop.permute.xlu0 %5090  ;;  %v2698_v61 = vsel %vm1612_vm14, %v2690_v12, %v5087_v45  ;;  %v2699_v25 = vsel %vm1612_vm14, %v2691_v36, %v5088_v17 }
 0x3a0   : > { %2856 = vmatmul.mubr.f32.gmra.mxu1 %v2737_v23  ;;  %v5092_v15 = vunpack.i.l.bf16 %v5091_v2  ;;  %v5096_v19 = vpop.permute.xlu1 %5095  ;;  %v5093_v24 = vunpack.i.h.bf16 %v5091_v2 }
 0x3a1   : > { %4718 = vmatprep.mubr.msk.f32.mxu1 %vm628_vm11, %v6820_v16  ;;  %v5097_v16 = vunpack.i.l.bf16 %v5096_v19  ;;  %v5098_v51 = vunpack.i.h.bf16 %v5096_v19 }
 0x3a2   : > { %v2706_v9 = vsel %vm1630_vm1, %v2698_v61, %v5092_v15  ;;  %v2707_v53 = vsel %vm1630_vm1, %v2699_v25, %v5093_v24 }
 0x3a3   : > { %v5101_v22 = vpop.permute.xlu0 %5100  ;;  %v2714_v26 = vsel %vm1648_vm3, %v2706_v9, %v5097_v16  ;;  %v2715_v35 = vsel %vm1648_vm3, %v2707_v53, %v5098_v51 }
 0x3a4   : > { %v5102_v10 = vunpack.i.l.bf16 %v5101_v22  ;;  %v5103_v6 = vunpack.i.h.bf16 %v5101_v22 }
 0x3a6   : > { %v2722_v57 = vsel %vm2172_vm0, %v2714_v26, %v5102_v10  ;;  %v2723_v59 = vsel %vm2172_vm0, %v2715_v35, %v5103_v6 }
 0x3b4   : > { %v5111_v52 = vpop.permute.xlu0 %5110 }
 0x3b5   : > { %v5106_v14 = vpop.permute.xlu1 %5105  ;;  %v5112_v30 = vunpack.i.l.bf16 %v5111_v52  ;;  %v5113_v5 = vunpack.i.h.bf16 %v5111_v52 }
 0x3b6   : > { %v5108_v34 = vunpack.i.h.bf16 %v5106_v14  ;;  %v5107_v60 = vunpack.i.l.bf16 %v5106_v14 }
 0x3b8   : > { %v2730_v37 = vsel %vm2181_vm5, %v2722_v57, %v5107_v60  ;;  %v5121_v21 = vpop.permute.xlu0 %5120  ;;  %v2731_v0 = vsel %vm2181_vm5, %v2723_v59, %v5108_v34 }
 0x3b9   : > { %v5116_v39 = vpop.permute.xlu1 %5115  ;;  %v2738_v40 = vsel %vm2190_vm6, %v2730_v37, %v5112_v30  ;;  %v5122_v32 = vunpack.i.l.bf16 %v5121_v21  ;;  %v2739_v50 = vsel %vm2190_vm6, %v2731_v0, %v5113_v5  ;;  %v5123_v31 = vunpack.i.h.bf16 %v5121_v21 }
 0x3ba   : > { %v5117_v44 = vunpack.i.l.bf16 %v5116_v39  ;;  %2861 = vmatmul.mubr.f32.gmra.mxu1 %v2738_v40  ;;  %v5118_v29 = vunpack.i.h.bf16 %v5116_v39 }
 0x3bb   : > { %4719 = vmatprep.mubr.msk.f32.mxu1 %vm628_vm11, %v6851_v41 }
 0x3bc   : > { %v2692_v13 = vsel %vm628_vm11, %v6814_v11, %v5117_v44  ;;  %v5131_v58 = vpop.permute.xlu0 %5130  ;;  %v2693_v41 = vsel %vm628_vm11, %v6846_v7, %v5118_v29 }
 0x3bd   : > { %v5126_v49 = vpop.permute.xlu1 %5125  ;;  %v5132_v23 = vunpack.i.l.bf16 %v5131_v58  ;;  %v2700_v47 = vsel %vm1612_vm14, %v2692_v13, %v5122_v32  ;;  %v5133_v45 = vunpack.i.h.bf16 %v5131_v58  ;;  %v2701_v12 = vsel %vm1612_vm14, %v2693_v41, %v5123_v31 }
 0x3be   : > { %v5127_v8 = vunpack.i.l.bf16 %v5126_v49  ;;  %2866 = vmatmul.mubr.f32.gmra.mxu1 %v2739_v50  ;;  %v5128_v56 = vunpack.i.h.bf16 %v5126_v49 }
 0x3bf   : > { %4720 = vmatprep.mubr.msk.f32.mxu1 %vm628_vm11, %v6870_v62 }
 0x3c0   : > { %v2708_v2 = vsel %vm1630_vm1, %v2700_v47, %v5127_v8  ;;  %v2709_v17 = vsel %vm1630_vm1, %v2701_v12, %v5128_v56  ;;  %v3304_v56 = vld [vmem:[%s7936_s13 + $0x78] sm:$0xff] }
 0x3c1   : > { %v5136_v11 = vpop.permute.xlu1 %5135  ;;  %v5141_v4 = vpop.permute.xlu0 %5140  ;;  %v2716_v19 = vsel %vm1648_vm3, %v2708_v2, %v5132_v23  ;;  %v2717_v9 = vsel %vm1648_vm3, %v2709_v17, %v5133_v45  ;;  %3332 = vmatpush1.msra.mxu0 %v3304_v56  ;;  %v6990_v2 = vld [vmem:[%s7934_s11] ss:$0 sm:$0xff] }
 0x3c2   : > { %v5137_v3 = vunpack.i.l.bf16 %v5136_v11  ;;  %v5142_v15 = vunpack.i.l.bf16 %v5141_v4  ;;  %v5138_v22 = vunpack.i.h.bf16 %v5136_v11  ;;  %v5143_v61 = vunpack.i.h.bf16 %v5141_v4  ;;  %3333 = vmatprep.subr.mxu0 %v5621_v1 }
 0x3c4   : > { %v2724_v62 = vsel %vm2172_vm0, %v2716_v19, %v5137_v3  ;;  %v2725_v51 = vsel %vm2172_vm0, %v2717_v9, %v5138_v22  ;;  %v7020_v9 = vld [vmem:[#allocation3 + $0x1] sm:$0xff] }
 0x3c5   : > { %v5146_v36 = vpop.permute.xlu1 %5145  ;;  %v5151_v7 = vpop.permute.xlu0 %5150  ;;  %v2732_v16 = vsel %vm2181_vm5, %v2724_v62, %v5142_v15  ;;  %v2733_v14 = vsel %vm2181_vm5, %v2725_v51, %v5143_v61  ;;  %v3303_v15 = vld [vmem:[%s7936_s13 + $0x70] sm:$0xff]  ;;  %v3302_v62 = vld [vmem:[%s7936_s13 + $0x68] sm:$0xff]  ;;  %v3300_v61 = vld [vmem:[%s7936_s13 + $0x58] sm:$0xff] }
 0x3c6   : > { %v5147_v24 = vunpack.i.l.bf16 %v5146_v36  ;;  %v5148_v10 = vunpack.i.h.bf16 %v5146_v36  ;;  %v5152_v52 = vunpack.i.l.bf16 %v5151_v7  ;;  %v5153_v26 = vunpack.i.h.bf16 %v5151_v7  ;;  %3334 = vmatpush1.msra.mxu0 %v3303_v15 }
 0x3c7   : > { %3335 = vmatprep.subr.mxu0 %v5621_v1 }
 0x3c8   : > { %v2740_v25 = vsel %vm2190_vm6, %v2732_v16, %v5147_v24  ;;  %v2741_v34 = vsel %vm2190_vm6, %v2733_v14, %v5148_v10  ;;  %v2694_v37 = vsel %vm628_vm11, %v6863_v46, %v5152_v52  ;;  %v2695_v21 = vsel %vm628_vm11, %v6877_v54, %v5153_v26  ;;  %3336 = vmatpush1.msra.mxu0 %v3302_v62  ;;  %v3301_v24 = vld [vmem:[%s7936_s13 + $0x60] sm:$0xff]  ;;  %v3299_v10 = vld [vmem:[%s7936_s13 + $0x50] sm:$0xff]  ;;  %v3298_v52 = vld [vmem:[%s7936_s13 + $0x48] sm:$0xff] }
 0x3c9   : > { %2871 = vmatmul.mubr.f32.gmra.mxu1 %v2740_v25  ;;  %v5156_v53 = vpop.permute.xlu1 %5155  ;;  %v2613_v6 = vpop.permute.xlu0 %2612  ;;  %3337 = vmatprep.subr.mxu0 %v5621_v1  ;;  %v7018_v16 = vld [vmem:[#allocation3 + $0x2] sm:$0xff] }
 0x3ca   : > { %4721 = vmatprep.mubr.msk.f32.mxu1 %vm628_vm11, %v6883_v18  ;;  %v5157_v30 = vunpack.i.l.bf16 %v5156_v53  ;;  %v5158_v60 = vunpack.i.h.bf16 %v5156_v53  ;;  %3338 = vmatpush1.msra.mxu0 %v3301_v24  ;;  %v3297_v14 = vld [vmem:[%s7936_s13 + $0x40] sm:$0xff] }
 0x3cb   : > { %3339 = vmatprep.subr.mxu0 %v5621_v1 }
 0x3cc   : > { %v2702_v39 = vsel %vm1612_vm14, %v2694_v37, %v5157_v30  ;;  %v2703_v59 = vsel %vm1612_vm14, %v2695_v21, %v5158_v60  ;;  %3340 = vmatpush1.msra.mxu0 %v3300_v61  ;;  %v3296_v37 = vld [vmem:[%s7936_s13 + $0x38] sm:$0xff]  ;;  %v3294_v21 = vld [vmem:[%s7936_s13 + $0x28] sm:$0xff] }
 0x3cd   : > { %2876 = vmatmul.mubr.f32.gmra.mxu1 %v2741_v34  ;;  %v5166_v57 = vpop.permute.xlu1 %5165  ;;  %v5161_v35 = vpop.permute.xlu0 %5160  ;;  %3341 = vmatprep.subr.mxu0 %v5621_v1 }
 0x3ce   : > { %4722 = vmatprep.mubr.msk.f32.mxu1 %vm628_vm11, %v6897_v28  ;;  %v5163_v5 = vunpack.i.h.bf16 %v5161_v35  ;;  %v5162_v18 = vunpack.i.l.bf16 %v5161_v35  ;;  %v5167_v40 = vunpack.i.l.bf16 %v5166_v57  ;;  %v5168_v13 = vunpack.i.h.bf16 %v5166_v57  ;;  %3342 = vmatpush1.msra.mxu0 %v3299_v10 }
 0x3cf   : > { %3343 = vmatprep.subr.mxu0 %v5621_v1 }
 0x3d0   : > { %v2710_v44 = vsel %vm1630_vm1, %v2702_v39, %v5162_v18  ;;  %v2711_v29 = vsel %vm1630_vm1, %v2703_v59, %v5163_v5  ;;  %3344 = vmatpush1.msra.mxu0 %v3298_v52  ;;  %v3295_v5 = vld [vmem:[%s7936_s13 + $0x30] sm:$0xff]  ;;  %v3293_v39 = vld [vmem:[%s7936_s13 + $0x20] sm:$0xff] }
 0x3d1   : > { %v2645_v0 = vpop.permute.xlu1 %2644  ;;  %v2718_v32 = vsel %vm1648_vm3, %v2710_v44, %v5167_v40  ;;  %v2677_v28 = vpop.permute.xlu0 %2676  ;;  %v2719_v54 = vsel %vm1648_vm3, %v2711_v29, %v5168_v13  ;;  %3345 = vmatprep.subr.mxu0 %v5621_v1  ;;  %v3292_v40 = vld [vmem:[%s7936_s13 + $0x18] sm:$0xff]  ;;  %v3291_v44 = vld [vmem:[%s7936_s13 + $0x10] sm:$0xff] }
 0x3d2   : > { %v2726_v46 = vsel %vm2172_vm0, %v2718_v32, %v2613_v6  ;;  %3346 = vmatpush1.msra.mxu0 %v3297_v14 }
 0x3d3   : > { %v2734_v58 = vsel %vm2181_vm5, %v2726_v46, %v2645_v0  ;;  %3347 = vmatprep.subr.mxu0 %v5621_v1  ;;  %v3289_v46 = vld [vmem:[%s7936_s13] sm:$0xff] }
 0x3d4   : > { %v2742_v50 = vsel %vm2190_vm6, %v2734_v58, %v2677_v28  ;;  %3348 = vmatpush1.msra.mxu0 %v3296_v37  ;;  %v3290_v28 = vld [vmem:[%s7936_s13 + $0x8] sm:$0xff] }
 0x3d5   : > { %v2615_v49 = vpop.permute.xlu1 %2614  ;;  %v2647_v31 = vpop.permute.xlu0 %2646  ;;  %2881 = vmatmul.mubr.f32.gmra.mxu1 %v2742_v50  ;;  %3349 = vmatprep.subr.mxu0 %v5621_v1  ;;  %v3306_v50 = vld [vmem:[%s7936_s13 + $0x88] sm:$0xff] }
 0x3d6   : > { %v2727_v8 = vsel %vm2172_vm0, %v2719_v54, %v2615_v49  ;;  %4723 = vmatprep.mubr.msk.f32.mxu1 %vm628_vm11, %v6657_v55  ;;  %v6995_v55 = vld [vmem:[%s7935_s12] ss:$0 sm:$0xff]  ;;  %3350 = vmatpush1.msra.mxu0 %v3295_v5 }
 0x3d7   : > { %v2735_v23 = vsel %vm2181_vm5, %v2727_v8, %v2647_v31  ;;  %3351 = vmatprep.subr.mxu0 %v5621_v1  ;;  %v3305_v31 = vld [vmem:[%s7936_s13 + $0x80] sm:$0xff] }
 0x3d8   : > { %3352 = vmatpush1.msra.mxu0 %v3294_v21 }
 0x3d9   : > { %v2679_v47 = vpop.permute.xlu1 %2678  ;;  %3353 = vmatprep.subr.mxu0 %v5621_v1 }
 0x3da   : > { %v2743_v41 = vsel %vm2190_vm6, %v2735_v23, %v2679_v47  ;;  %3354 = vmatpush1.msra.mxu0 %v3293_v39 }
 0x3db   : > { %2886 = vmatmul.mubr.f32.gmra.mxu1 %v2743_v41  ;;  %3355 = vmatprep.subr.mxu0 %v5621_v1 }
 0x3dc   : > { %3356 = vmatpush1.msra.mxu0 %v3292_v40 }
 0x3dd   : > { %3357 = vmatprep.subr.mxu0 %v5621_v1 }
 0x3de   : > { %3358 = vmatpush1.msra.mxu0 %v3291_v44 }
 0x3df   : > { %3359 = vmatprep.subr.mxu0 %v5621_v1 }
 0x3e0   : > { %3360 = vmatpush1.msra.mxu0 %v3290_v28 }
 0x3e1   : > { %3361 = vmatprep.subr.mxu0 %v5621_v1 }
 0x3e2   : > { %3362 = vmatpush1.msra.mxu0 %v3289_v46 }
 0x3e3   : > { %3391 = vmatprep.subr.mxu0 %v5621_v1 }
 0x3e4   : > { %3392 = vmatpush2.msra.mxu0 %v3306_v50 }
 0x3e5   : > { %3393 = vmatprep.subr.mxu0 %v5621_v1 }
 0x3e6   : > { %3394 = vmatpush2.msra.mxu0 %v3305_v31 }
 0x3e7   : > { %4429 = vmatprep.subr.mxu0 %v5621_v1 }
 0x45c   : > { %v2852_v11 = vpop.f32.mrf.mxu1 }
 0x45d   : > { %v2898_v3 = vmul.f32 %v6990_v2, %v2852_v11 }
 0x45e   : > { %v2854_v4 = vpop.f32.mrf.mxu1 }
 0x45f   : > { %v2913_v45 = vadd.f32 %v6995_v55, %v2898_v3 }
 0x460   : > { %v2857_v12 = vpop.f32.mrf.mxu1 }
 0x461   : > { %v2921_v19 = vmax.f32 %v2913_v45, 0.0  ;;  %v2899_v17 = vmul.f32 %v6990_v2, %v2857_v12 }
 0x462   : > { %v2859_v22 = vpop.f32.mrf.mxu1 }
 0x463   : > { %2929 = vst.msk [vmem:[#allocation3 + $0x11] sm:$0xff] %vm628_vm11, %v2921_v19  ;;  %v2914_v36 = vadd.f32 %v6995_v55, %v2899_v17 }
 0x465   : > { %v2922_v7 = vmax.f32 %v2914_v36, 0.0 }
 0x467   : > { %2930 = vst.msk [vmem:[#allocation3 + $0x21] sm:$0xff] %vm628_vm11, %v2922_v7 }
 0x46a   : > { %v2954_v25 = vld [vmem:[#allocation3 + $0x12] sm:$0xff] }
 0x46b   : > { %v2946_v51 = vld [vmem:[#allocation3 + $0x11] sm:$0xff]  ;;  %v5174_v53 = vpack.i.bf16 %v2954_v25, %v7018_v16 }
 0x46c   : > { %v5169_v6 = vpack.i.bf16 %v2946_v51, %v7020_v9  ;;  %v7037_v26 = vld [vmem:[#allocation3 + $0x10] sm:$0xff] }
 0x46d   : > { %5175 = vrot.lane.b32.xlu1 %v5174_v53, %s7962_s1 }
 0x46e   : > { %5170 = vrot.lane.b32.xlu0 %v5169_v6, %s7964_s21  ;;  %v7039_v30 = vld [vmem:[#allocation3 + $0x22] sm:$0xff]  ;;  %s5633_s21 = smov [#allocation4]  }
 0x46f   : > { %v2970_v34 = vld [vmem:[#allocation3 + $0x21] sm:$0xff]  ;;  %4726 = vmatprep.mubr.msk.f32.mxu0 %vm628_vm11, %v7039_v30  ;;  %v5189_v18 = vpack.i.bf16 %v7039_v30, %v2954_v25  ;;  %s5563_s5 = sshll.u32 %s5633_s21, 4  ;;  %s5564_s5 = int_to_ptr.vmem [resolvable:$false] %s5563_s5 }
 0x470   : > { %v7041_v60 = vld [vmem:[#allocation3 + $0x20] sm:$0xff]  ;;  %v5184_v57 = vpack.i.bf16 %v2970_v34, %v2946_v51  ;;  %s5565_s6 = scalar_lea.vmem %s5564_s5, 2048 }
 0x471   : > { %v5179_v35 = vpack.i.bf16 %v7041_v60, %v7037_v26 }
 0x472   : > { %5185 = vrot.lane.b32.xlu1 %v5184_v57, %s8002_s24 }
 0x473   : > { %5180 = vrot.lane.b32.xlu0 %v5179_v35, %s7998_s30 }
 0x477   : > { %5190 = vrot.lane.b32.xlu0 %v5189_v18, %s8003_s23 }
 0x47a   : > { %v2862_v59 = vpop.f32.mrf.mxu1 }
 0x47b   : > { %v2900_v0 = vmul.f32 %v6990_v2, %v2862_v59 }
 0x47c   : > { %v2864_v32 = vpop.f32.mrf.mxu1 }
 0x47d   : > { %v2915_v29 = vadd.f32 %v6995_v55, %v2900_v0 }
 0x47e   : > { %v2867_v13 = vpop.f32.mrf.mxu1 }
 0x47f   : > { %v2923_v58 = vmax.f32 %v2915_v29, 0.0  ;;  %v2901_v49 = vmul.f32 %v6990_v2, %v2867_v13 }
 0x480   : > { %v2869_v54 = vpop.f32.mrf.mxu1 }
 0x481   : > { %2931 = vst.msk [vmem:[#allocation3 + $0x31] sm:$0xff] %vm628_vm11, %v2923_v58  ;;  %v2916_v8 = vadd.f32 %v6995_v55, %v2901_v49 }
 0x483   : > { %v2924_v23 = vmax.f32 %v2916_v8, 0.0 }
 0x485   : > { %2932 = vst.msk [vmem:[#allocation3 + $0x41] sm:$0xff] %vm628_vm11, %v2924_v23 }
 0x488   : > { %v7099_v47 = vld [vmem:[#allocation3 + $0x30] sm:$0xff] }
 0x489   : > { %v2994_v41 = vld [vmem:[#allocation3 + $0x31] sm:$0xff]  ;;  %v2872_v56 = vpop.f32.mrf.mxu1  ;;  %v5194_v11 = vpack.i.bf16 %v7099_v47, %v7041_v60 }
 0x48a   : > { %v5199_v3 = vpack.i.bf16 %v2994_v41, %v2970_v34  ;;  %v2902_v4 = vmul.f32 %v6990_v2, %v2872_v56  ;;  %v7104_v45 = vld [vmem:[#allocation3 + $0x32] sm:$0xff] }
 0x48b   : > { %v2874_v12 = vpop.f32.mrf.mxu1  ;;  %5195 = vrot.lane.b32.xlu1 %v5194_v11, %s8000_s25  ;;  %v5209_v17 = vpack.i.bf16 %v7104_v45, %v7039_v30 }
 0x48c   : > { %5200 = vrot.lane.b32.xlu0 %v5199_v3, %s8001_s29  ;;  %v2917_v15 = vadd.f32 %v6995_v55, %v2902_v4  ;;  %v7112_v36 = vld [vmem:[#allocation3 + $0x40] sm:$0xff]  ;;  %v7184_v12 = vld [vmem:[#allocation3 + $0x91] sm:$0xff] }
 0x48d   : > { %v2877_v19 = vpop.f32.mrf.mxu1  ;;  %v2972_v24 = vld [vmem:[#allocation3 + $0x41] sm:$0xff]  ;;  %v5214_v10 = vpack.i.bf16 %v7112_v36, %v7099_v47 }
 0x48e   : > { %v2925_v22 = vmax.f32 %v2917_v15, 0.0  ;;  %v2903_v62 = vmul.f32 %v6990_v2, %v2877_v19  ;;  %v5219_v25 = vpack.i.bf16 %v2972_v24, %v2994_v41  ;;  %v7120_v53 = vld [vmem:[#allocation3 + $0x42] sm:$0xff] }
 0x48f   : > { %v2879_v7 = vpop.f32.mrf.mxu1  ;;  %5205 = vrot.lane.b32.xlu1 %v5199_v3, %s8004_s0  ;;  %v5224_v6 = vpack.i.bf16 %v7120_v53, %v7104_v45  ;;  %v7176_v3 = vld [vmem:[#allocation3 + $0x90] sm:$0xff] }
 0x490   : > { %5210 = vrot.lane.b32.xlu0 %v5209_v17, %s8005_s26  ;;  %2933 = vst.msk [vmem:[#allocation3 + $0x51] sm:$0xff] %vm628_vm11, %v2925_v22  ;;  %v2918_v61 = vadd.f32 %v6995_v55, %v2903_v62  ;;  %v7188_v62 = vld [vmem:[#allocation3] sm:$0xff] }
 0x492   : > { %v2926_v51 = vmax.f32 %v2918_v61, 0.0 }
 0x493   : > { %5215 = vrot.lane.b32.xlu1 %v5214_v10, %s7998_s30 }
 0x494   : > { %5220 = vrot.lane.b32.xlu0 %v5219_v25, %s8002_s24  ;;  %2934 = vst.msk [vmem:[#allocation3 + $0x61] sm:$0xff] %vm628_vm11, %v2926_v51 }
 0x495   : > { %v2882_v52 = vpop.f32.mrf.mxu1 }
 0x496   : > { %v2904_v14 = vmul.f32 %v6990_v2, %v2882_v52 }
 0x497   : > { %5225 = vrot.lane.b32.xlu1 %v5224_v6, %s8003_s23  ;;  %v7129_v30 = vld [vmem:[#allocation3 + $0x50] sm:$0xff]  ;;  %v2884_v57 = vpop.f32.mrf.mxu1 }
 0x498   : > { %v2996_v34 = vld [vmem:[#allocation3 + $0x51] sm:$0xff]  ;;  %v5229_v35 = vpack.i.bf16 %v7129_v30, %v7112_v36  ;;  %v2919_v5 = vadd.f32 %v6995_v55, %v2904_v14 }
 0x499   : > { %v5234_v37 = vpack.i.bf16 %v2996_v34, %v2972_v24  ;;  %v7135_v18 = vld [vmem:[#allocation3 + $0x52] sm:$0xff] }
 0x49a   : > { %5230 = vrot.lane.b32.xlu0 %v5229_v35, %s8000_s25  ;;  %v2927_v21 = vmax.f32 %v2919_v5, 0.0  ;;  %v5244_v44 = vpack.i.bf16 %v7135_v18, %v7120_v53 }
 0x49b   : > { %5235 = vrot.lane.b32.xlu1 %v5234_v37, %s8001_s29  ;;  %v2887_v39 = vpop.f32.mrf.mxu1  ;;  %v7142_v0 = vld [vmem:[#allocation3 + $0x60] sm:$0xff] }
 0x49c   : > { %v2905_v40 = vmul.f32 %v6990_v2, %v2887_v39  ;;  %2935 = vst.msk [vmem:[#allocation3 + $0x71] sm:$0xff] %vm628_vm11, %v2927_v21  ;;  %v2974_v28 = vld [vmem:[#allocation3 + $0x61] sm:$0xff]  ;;  %v5249_v13 = vpack.i.bf16 %v7142_v0, %v7129_v30 }
 0x49d   : > { %v2889_v59 = vpop.f32.mrf.mxu1  ;;  %v5254_v2 = vpack.i.bf16 %v2974_v28, %v2996_v34  ;;  %v7149_v46 = vld [vmem:[#allocation3 + $0x62] sm:$0xff] }
 0x49e   : > { %v2920_v32 = vadd.f32 %v6995_v55, %v2905_v40  ;;  %5240 = vrot.lane.b32.xlu0 %v5234_v37, %s8004_s0  ;;  %v5259_v55 = vpack.i.bf16 %v7149_v46, %v7135_v18 }
 0x49f   : > { %5245 = vrot.lane.b32.xlu1 %v5244_v44, %s8005_s26 }
 0x4a0   : > { %v2928_v29 = vmax.f32 %v2920_v32, 0.0 }
 0x4a2   : > { %2936 = vst.msk [vmem:[#allocation3 + $0x81] sm:$0xff] %vm628_vm11, %v2928_v29  ;;  %5250 = vrot.lane.b32.xlu0 %v5249_v13, %s7998_s30 }
 0x4a3   : > { %5255 = vrot.lane.b32.xlu1 %v5254_v2, %s8002_s24  ;;  %v7156_v58 = vld [vmem:[#allocation3 + $0x70] sm:$0xff] }
 0x4a4   : > { %v5264_v49 = vpack.i.bf16 %v7156_v58, %v7142_v0  ;;  %v2998_v54 = vld [vmem:[#allocation3 + $0x71] sm:$0xff] }
 0x4a5   : > { %v5269_v50 = vpack.i.bf16 %v2998_v54, %v2974_v28  ;;  %v7162_v8 = vld [vmem:[#allocation3 + $0x72] sm:$0xff] }
 0x4a6   : > { %5260 = vrot.lane.b32.xlu0 %v5259_v55, %s8003_s23  ;;  %v5279_v31 = vpack.i.bf16 %v7162_v8, %v7149_v46 }
 0x4a7   : > { %5265 = vrot.lane.b32.xlu1 %v5264_v49, %s8000_s25 }
 0x4a9   : > { %v2976_v23 = vld [vmem:[#allocation3 + $0x81] sm:$0xff] }
 0x4aa   : > { %5270 = vrot.lane.b32.xlu0 %v5269_v50, %s8001_s29  ;;  %v2968_v41 = vld [vmem:[#allocation3 + $0x80] sm:$0xff]  ;;  %v5289_v56 = vpack.i.bf16 %v2976_v23, %v2998_v54 }
 0x4ab   : > { %5275 = vrot.lane.b32.xlu1 %v5269_v50, %s8004_s0  ;;  %v5284_v11 = vpack.i.bf16 %v2968_v41, %v7156_v58  ;;  %v7178_v4 = vld [vmem:[#allocation3 + $0x82] sm:$0xff] }
 0x4ae   : > { %5280 = vrot.lane.b32.xlu0 %v5279_v31, %s8005_s26 }
 0x4af   : > { %3157 = vrot.lane.b32.xlu1 %v7162_v8, %s8003_s23 }
 0x4b2   : > { %5290 = vrot.lane.b32.xlu0 %v5289_v56, %s8002_s24 }
 0x4b3   : > { %5285 = vrot.lane.b32.xlu1 %v5284_v11, %s7998_s30 }
 0x4b6   : > { %3189 = vrot.lane.b32.xlu0 %v2968_v41, %s8000_s25 }
 0x4b7   : > { %3221 = vrot.lane.b32.xlu1 %v2976_v23, %s8001_s29 }
 0x4ba   : > { %3159 = vrot.lane.b32.xlu0 %v7178_v4, %s8003_s23 }
 0x4bb   : > { %3191 = vrot.lane.b32.xlu1 %v7176_v3, %s8000_s25 }
 0x4be   : > { %3223 = vrot.lane.b32.xlu0 %v7184_v12, %s8001_s29 }
 0x4df   : > { %v5176_v19 = vpop.permute.xlu1 %5175 }
 0x4e0   : > { %v5171_v15 = vpop.permute.xlu0 %5170  ;;  %v5177_v7 = vunpack.i.l.bf16 %v5176_v19  ;;  %v5178_v51 = vunpack.i.h.bf16 %v5176_v19 }
 0x4e1   : > { %v5172_v22 = vunpack.i.l.bf16 %v5171_v15  ;;  %v5173_v24 = vunpack.i.h.bf16 %v5171_v15 }
 0x4e3   : > { %v3233_v61 = vsel %vm628_vm11, %v7188_v62, %v5172_v22  ;;  %v3234_v52 = vsel %vm628_vm11, %v7037_v26, %v5173_v24 }
 0x4e4   : > { %v5186_v10 = vpop.permute.xlu1 %5185  ;;  %v3241_v57 = vsel %vm1612_vm14, %v3233_v61, %v5177_v7  ;;  %v3242_v21 = vsel %vm1612_vm14, %v3234_v52, %v5178_v51 }
 0x4e5   : > { %v5181_v17 = vpop.permute.xlu0 %5180  ;;  %v5187_v34 = vunpack.i.l.bf16 %v5186_v10  ;;  %v5188_v5 = vunpack.i.h.bf16 %v5186_v10 }
 0x4e6   : > { %v5182_v25 = vunpack.i.l.bf16 %v5181_v17  ;;  %v5183_v14 = vunpack.i.h.bf16 %v5181_v17 }
 0x4e8   : > { %v3249_v35 = vsel %vm1630_vm1, %v3241_v57, %v5182_v25  ;;  %v3250_v39 = vsel %vm1630_vm1, %v3242_v21, %v5183_v14 }
 0x4e9   : > { %v5191_v6 = vpop.permute.xlu0 %5190  ;;  %v3257_v32 = vsel %vm1648_vm3, %v3249_v35, %v5187_v34  ;;  %v3258_v55 = vsel %vm1648_vm3, %v3250_v39, %v5188_v5 }
 0x4ea   : > { %v5192_v37 = vunpack.i.l.bf16 %v5191_v6  ;;  %v5193_v40 = vunpack.i.h.bf16 %v5191_v6 }
 0x4ec   : > { %v3265_v13 = vsel %vm2172_vm0, %v3257_v32, %v5192_v37  ;;  %v3266_v23 = vsel %vm2172_vm0, %v3258_v55, %v5193_v40 }
 0x4fd   : > { %v5196_v59 = vpop.permute.xlu1 %5195 }
 0x4fe   : > { %v5201_v44 = vpop.permute.xlu0 %5200  ;;  %v5198_v28 = vunpack.i.h.bf16 %v5196_v59  ;;  %v5197_v29 = vunpack.i.l.bf16 %v5196_v59 }
 0x4ff   : > { %v5202_v26 = vunpack.i.l.bf16 %v5201_v44  ;;  %v5203_v49 = vunpack.i.h.bf16 %v5201_v44 }
 0x500   : > { %v3273_v2 = vsel %vm2181_vm5, %v3265_v13, %v5197_v29  ;;  %v3274_v56 = vsel %vm2181_vm5, %v3266_v23, %v5198_v28 }
 0x501   : > { %v5206_v54 = vpop.permute.xlu1 %5205  ;;  %v3281_v31 = vsel %vm2190_vm6, %v3273_v2, %v5202_v26  ;;  %v3282_v17 = vsel %vm2190_vm6, %v3274_v56, %v5203_v49 }
 0x502   : > { %v5211_v50 = vpop.permute.xlu0 %5210  ;;  %v5207_v41 = vunpack.i.l.bf16 %v5206_v54  ;;  %3396 = vmatmul.mubr.f32.vlgmr.msra.gmra.mxu0 %v3281_v31  ;;  %v5208_v11 = vunpack.i.h.bf16 %v5206_v54 }
 0x503   : > { %4727 = vmatprep.mubr.msk.f32.mxu0 %vm628_vm11, %v7104_v45  ;;  %v5212_v15 = vunpack.i.l.bf16 %v5211_v50  ;;  %v5213_v61 = vunpack.i.h.bf16 %v5211_v50 }
 0x504   : > { %v3235_v22 = vsel %vm628_vm11, %v7041_v60, %v5207_v41  ;;  %v3236_v10 = vsel %vm628_vm11, %v7099_v47, %v5208_v11 }
 0x505   : > { %v5216_v19 = vpop.permute.xlu1 %5215  ;;  %v3243_v45 = vsel %vm1612_vm14, %v3235_v22, %v5212_v15  ;;  %v3244_v60 = vsel %vm1612_vm14, %v3236_v10, %v5213_v61 }
 0x506   : > { %v5217_v24 = vunpack.i.l.bf16 %v5216_v19  ;;  %v5221_v7 = vpop.permute.xlu0 %5220  ;;  %3401 = vmatmul.mubr.f32.gmra.mxu0 %v3282_v17  ;;  %v5218_v25 = vunpack.i.h.bf16 %v5216_v19 }
 0x507   : > { %4728 = vmatprep.mubr.msk.f32.mxu0 %vm628_vm11, %v7120_v53  ;;  %v5222_v51 = vunpack.i.l.bf16 %v5221_v7  ;;  %v5223_v34 = vunpack.i.h.bf16 %v5221_v7 }
 0x508   : > { %v3251_v52 = vsel %vm1630_vm1, %v3243_v45, %v5217_v24  ;;  %v3252_v57 = vsel %vm1630_vm1, %v3244_v60, %v5218_v25 }
 0x509   : > { %v5226_v6 = vpop.permute.xlu1 %5225  ;;  %v3259_v53 = vsel %vm1648_vm3, %v3251_v52, %v5222_v51  ;;  %v3260_v59 = vsel %vm1648_vm3, %v3252_v57, %v5223_v34 }
 0x50a   : > { %v5227_v14 = vunpack.i.l.bf16 %v5226_v6  ;;  %v5228_v35 = vunpack.i.h.bf16 %v5226_v6 }
 0x50c   : > { %v5231_v37 = vpop.permute.xlu0 %5230  ;;  %v3267_v40 = vsel %vm2172_vm0, %v3259_v53, %v5227_v14  ;;  %v3268_v26 = vsel %vm2172_vm0, %v3260_v59, %v5228_v35 }
 0x50d   : > { %v5233_v5 = vunpack.i.h.bf16 %v5231_v37  ;;  %v5232_v21 = vunpack.i.l.bf16 %v5231_v37  ;;  %v5236_v47 = vpop.permute.xlu1 %5235 }
 0x50e   : > { %v5237_v39 = vunpack.i.l.bf16 %v5236_v47  ;;  %v5238_v32 = vunpack.i.h.bf16 %v5236_v47 }
 0x50f   : > { %v3275_v44 = vsel %vm2181_vm5, %v3267_v40, %v5232_v21  ;;  %v3276_v55 = vsel %vm2181_vm5, %v3268_v26, %v5233_v5 }
 0x510   : > { %v5241_v28 = vpop.permute.xlu0 %5240  ;;  %v3283_v29 = vsel %vm2190_vm6, %v3275_v44, %v5237_v39  ;;  %v3284_v23 = vsel %vm2190_vm6, %v3276_v55, %v5238_v32 }
 0x511   : > { %v5242_v13 = vunpack.i.l.bf16 %v5241_v28  ;;  %v5246_v2 = vpop.permute.xlu1 %5245  ;;  %3406 = vmatmul.mubr.f32.gmra.mxu0 %v3283_v29  ;;  %v5243_v54 = vunpack.i.h.bf16 %v5241_v28 }
 0x512   : > { %v5247_v49 = vunpack.i.l.bf16 %v5246_v2  ;;  %4729 = vmatprep.mubr.msk.f32.mxu0 %vm628_vm11, %v7135_v18  ;;  %v5248_v11 = vunpack.i.h.bf16 %v5246_v2 }
 0x513   : > { %v3237_v50 = vsel %vm628_vm11, %v7112_v36, %v5242_v13  ;;  %v3238_v18 = vsel %vm628_vm11, %v7129_v30, %v5243_v54 }
 0x514   : > { %v5251_v31 = vpop.permute.xlu0 %5250  ;;  %v3245_v15 = vsel %vm1612_vm14, %v3237_v50, %v5247_v49  ;;  %v3246_v61 = vsel %vm1612_vm14, %v3238_v18, %v5248_v11 }
 0x515   : > { %v5252_v41 = vunpack.i.l.bf16 %v5251_v31  ;;  %v5256_v56 = vpop.permute.xlu1 %5255  ;;  %3411 = vmatmul.mubr.f32.gmra.mxu0 %v3284_v23  ;;  %v5253_v17 = vunpack.i.h.bf16 %v5251_v31 }
 0x516   : > { %v5257_v19 = vunpack.i.l.bf16 %v5256_v56  ;;  %4730 = vmatprep.mubr.msk.f32.mxu0 %vm628_vm11, %v7149_v46  ;;  %v5258_v10 = vunpack.i.h.bf16 %v5256_v56 }
 0x517   : > { %v3253_v22 = vsel %vm1630_vm1, %v3245_v15, %v5252_v41  ;;  %v3254_v51 = vsel %vm1630_vm1, %v3246_v61, %v5253_v17  ;;  %v7261_v15 = vld [vmem:[#allocation3 + $0x92] sm:$0xff] }
 0x518   : > { %v5261_v36 = vpop.permute.xlu0 %5260  ;;  %v3261_v25 = vsel %vm1648_vm3, %v3253_v22, %v5257_v19  ;;  %v3262_v60 = vsel %vm1648_vm3, %v3254_v51, %v5258_v10  ;;  %v3857_v61 = vld [vmem:[%s7939_s16 + $0x78] sm:$0xff]  ;;  %v3856_v10 = vld [vmem:[%s7939_s16 + $0x70] sm:$0xff] }
 0x519   : > { %v5262_v24 = vunpack.i.l.bf16 %v5261_v36  ;;  %v5266_v7 = vpop.permute.xlu1 %5265  ;;  %v5263_v6 = vunpack.i.h.bf16 %v5261_v36  ;;  %3885 = vmatpush1.msra.mxu1 %v3857_v61  ;;  %v3853_v51 = vld [vmem:[%s7939_s16 + $0x58] sm:$0xff] }
 0x51a   : > { %v5267_v45 = vunpack.i.l.bf16 %v5266_v7  ;;  %v5268_v34 = vunpack.i.h.bf16 %v5266_v7  ;;  %3886 = vmatprep.subr.mxu1 %v5621_v1 }
 0x51b   : > { %v3269_v46 = vsel %vm2172_vm0, %v3261_v25, %v5262_v24  ;;  %v3270_v53 = vsel %vm2172_vm0, %v3262_v60, %v5263_v6  ;;  %v3855_v25 = vld [vmem:[%s7939_s16 + $0x68] sm:$0xff]  ;;  %3887 = vmatpush1.msra.mxu1 %v3856_v10  ;;  %v3852_v6 = vld [vmem:[%s7939_s16 + $0x50] sm:$0xff] }
 0x51c   : > { %v5271_v52 = vpop.permute.xlu0 %5270  ;;  %v3277_v57 = vsel %vm2181_vm5, %v3269_v46, %v5267_v45  ;;  %v3278_v39 = vsel %vm2181_vm5, %v3270_v53, %v5268_v34  ;;  %3888 = vmatprep.subr.mxu1 %v5621_v1  ;;  %v3854_v45 = vld [vmem:[%s7939_s16 + $0x60] sm:$0xff]  ;;  %v3851_v46 = vld [vmem:[%s7939_s16 + $0x48] sm:$0xff] }
 0x51d   : > { %v5272_v14 = vunpack.i.l.bf16 %v5271_v52  ;;  %v5276_v30 = vpop.permute.xlu1 %5275  ;;  %v5273_v35 = vunpack.i.h.bf16 %v5271_v52  ;;  %3889 = vmatpush1.msra.mxu1 %v3855_v25  ;;  %v3850_v52 = vld [vmem:[%s7939_s16 + $0x40] sm:$0xff] }
 0x51e   : > { %v5277_v47 = vunpack.i.l.bf16 %v5276_v30  ;;  %v5278_v40 = vunpack.i.h.bf16 %v5276_v30  ;;  %3890 = vmatprep.subr.mxu1 %v5621_v1  ;;  %v7305_v30 = vld [vmem:[%s7937_s14] ss:$0 sm:$0xff] }
 0x51f   : > { %v3285_v37 = vsel %vm2190_vm6, %v3277_v57, %v5272_v14  ;;  %v3286_v44 = vsel %vm2190_vm6, %v3278_v39, %v5273_v35  ;;  %3891 = vmatpush1.msra.mxu1 %v3854_v45  ;;  %v7313_v34 = vld [vmem:[%s7938_s15] ss:$0 sm:$0xff] }
 0x520   : > { %3416 = vmatmul.mubr.f32.gmra.mxu0 %v3285_v37  ;;  %v5281_v5 = vpop.permute.xlu0 %5280  ;;  %v3239_v26 = vsel %vm628_vm11, %v7142_v0, %v5277_v47  ;;  %v3240_v2 = vsel %vm628_vm11, %v7156_v58, %v5278_v40  ;;  %3892 = vmatprep.subr.mxu1 %v5621_v1  ;;  %v3848_v40 = vld [vmem:[%s7939_s16 + $0x30] sm:$0xff] }
 0x521   : > { %4731 = vmatprep.mubr.msk.f32.mxu0 %vm628_vm11, %v7162_v8  ;;  %v3158_v21 = vpop.permute.xlu1 %3157  ;;  %v5282_v59 = vunpack.i.l.bf16 %v5281_v5  ;;  %v5283_v32 = vunpack.i.h.bf16 %v5281_v5  ;;  %3893 = vmatpush1.msra.mxu1 %v3853_v51 }
 0x522   : > { %3894 = vmatprep.subr.mxu1 %v5621_v1 }
 0x523   : > { %v3247_v55 = vsel %vm1612_vm14, %v3239_v26, %v5282_v59  ;;  %v3248_v54 = vsel %vm1612_vm14, %v3240_v2, %v5283_v32  ;;  %3895 = vmatpush1.msra.mxu1 %v3852_v6  ;;  %v3847_v59 = vld [vmem:[%s7939_s16 + $0x28] sm:$0xff]  ;;  %v3846_v32 = vld [vmem:[%s7939_s16 + $0x20] sm:$0xff] }
 0x524   : > { %3421 = vmatmul.mubr.f32.gmra.mxu0 %v3286_v44  ;;  %v5291_v28 = vpop.permute.xlu0 %5290  ;;  %3896 = vmatprep.subr.mxu1 %v5621_v1 }
 0x525   : > { %4732 = vmatprep.mubr.msk.f32.mxu0 %vm628_vm11, %v7178_v4  ;;  %v5286_v29 = vpop.permute.xlu1 %5285  ;;  %v5292_v49 = vunpack.i.l.bf16 %v5291_v28  ;;  %v5293_v56 = vunpack.i.h.bf16 %v5291_v28  ;;  %3897 = vmatpush1.msra.mxu1 %v3851_v46  ;;  %v3845_v28 = vld [vmem:[%s7939_s16 + $0x18] sm:$0xff] }
 0x526   : > { %v5288_v13 = vunpack.i.h.bf16 %v5286_v29  ;;  %v5287_v8 = vunpack.i.l.bf16 %v5286_v29  ;;  %3898 = vmatprep.subr.mxu1 %v5621_v1 }
 0x527   : > { %3899 = vmatpush1.msra.mxu1 %v3850_v52 }
 0x528   : > { %v3255_v50 = vsel %vm1630_vm1, %v3247_v55, %v5287_v8  ;;  %v3190_v31 = vpop.permute.xlu0 %3189  ;;  %v3256_v41 = vsel %vm1630_vm1, %v3248_v54, %v5288_v13  ;;  %3900 = vmatprep.subr.mxu1 %v5621_v1  ;;  %v3844_v54 = vld [vmem:[%s7939_s16 + $0x10] sm:$0xff] }
 0x529   : > { %v3263_v23 = vsel %vm1648_vm3, %v3255_v50, %v5292_v49  ;;  %v3222_v4 = vpop.permute.xlu1 %3221  ;;  %v3264_v19 = vsel %vm1648_vm3, %v3256_v41, %v5293_v56 }
 0x52a   : > { %v3271_v0 = vsel %vm2172_vm0, %v3263_v23, %v3158_v21 }
 0x52b   : > { %v3279_v11 = vsel %vm2181_vm5, %v3271_v0, %v3190_v31 }
 0x52c   : > { %v3160_v58 = vpop.permute.xlu0 %3159  ;;  %v3287_v18 = vsel %vm2190_vm6, %v3279_v11, %v3222_v4 }
 0x52d   : > { %v3272_v17 = vsel %vm2172_vm0, %v3264_v19, %v3160_v58  ;;  %v3192_v22 = vpop.permute.xlu1 %3191  ;;  %3426 = vmatmul.mubr.f32.gmra.mxu0 %v3287_v18  ;;  %v3842_v19 = vld [vmem:[%s7939_s16] sm:$0xff] }
 0x52e   : > { %4733 = vmatprep.mubr.msk.f32.mxu0 %vm628_vm11, %v7261_v15  ;;  %v3280_v36 = vsel %vm2181_vm5, %v3272_v17, %v3192_v22  ;;  %v3859_v17 = vld [vmem:[%s7939_s16 + $0x88] sm:$0xff] }
 0x530   : > { %v3224_v24 = vpop.permute.xlu0 %3223 }
 0x531   : > { %v3288_v7 = vsel %vm2190_vm6, %v3280_v36, %v3224_v24  ;;  %v3858_v24 = vld [vmem:[%s7939_s16 + $0x80] sm:$0xff] }
 0x532   : > { %3431 = vmatmul.mubr.f32.gmra.mxu0 %v3288_v7 }
 0x5c2   : > { %v3397_v14 = vpop.f32.mrf.mxu0 }
 0x5c3   : > { %v7308_v60 = vadd.f32 %v3397_v14, %v6683_v63  ;;  %v3849_v63 = vld [vmem:[%s7939_s16 + $0x38] sm:$0xff] }
 0x5c4   : > { %v3399_v57 = vpop.f32.mrf.mxu0  ;;  %3901 = vmatpush1.msra.mxu1 %v3849_v63 }
 0x5c5   : > { %v3451_v35 = vmul.f32 %v7305_v30, %v7308_v60  ;;  %3902 = vmatprep.subr.mxu1 %v5621_v1 }
 0x5c6   : > { %v3402_v37 = vpop.f32.mrf.mxu0  ;;  %3903 = vmatpush1.msra.mxu1 %v3848_v40 }
 0x5c7   : > { %v3466_v53 = vadd.f32 %v7313_v34, %v3451_v35  ;;  %v7319_v5 = vadd.f32 %v3402_v37, %v6693_v38  ;;  %3904 = vmatprep.subr.mxu1 %v5621_v1 }
 0x5c8   : > { %v3404_v21 = vpop.f32.mrf.mxu0  ;;  %3905 = vmatpush1.msra.mxu1 %v3847_v59 }
 0x5c9   : > { %v3474_v47 = vmax.f32 %v3466_v53, 0.0  ;;  %v3452_v39 = vmul.f32 %v7305_v30, %v7319_v5  ;;  %3906 = vmatprep.subr.mxu1 %v5621_v1 }
 0x5ca   : > { %3907 = vmatpush1.msra.mxu1 %v3846_v32 }
 0x5cb   : > { %3482 = vst.msk [vmem:[#allocation3 + $0x11] sm:$0xff] %vm628_vm11, %v3474_v47  ;;  %v3467_v38 = vadd.f32 %v7313_v34, %v3452_v39  ;;  %3908 = vmatprep.subr.mxu1 %v5621_v1 }
 0x5cc   : > { %3909 = vmatpush1.msra.mxu1 %v3845_v28 }
 0x5cd   : > { %v3475_v44 = vmax.f32 %v3467_v38, 0.0  ;;  %3910 = vmatprep.subr.mxu1 %v5621_v1 }
 0x5ce   : > { %3911 = vmatpush1.msra.mxu1 %v3844_v54 }
 0x5cf   : > { %3483 = vst.msk [vmem:[#allocation3 + $0x21] sm:$0xff] %vm628_vm11, %v3475_v44  ;;  %3912 = vmatprep.subr.mxu1 %v5621_v1 }
 0x5d1   : > { %v3407_v29 = vpop.f32.mrf.mxu0 }
 0x5d2   : > { %v7346_v26 = vadd.f32 %v3407_v29, %v6769_v42  ;;  %v3507_v13 = vld [vmem:[#allocation3 + $0x12] sm:$0xff]  ;;  %v3843_v42 = vld [vmem:[%s7939_s16 + $0x8] sm:$0xff] }
 0x5d3   : > { %v3499_v8 = vld [vmem:[#allocation3 + $0x11] sm:$0xff]  ;;  %v3409_v2 = vpop.f32.mrf.mxu0  ;;  %v5299_v55 = vpack.i.bf16 %v3507_v13, %v7018_v16  ;;  %3913 = vmatpush1.msra.mxu1 %v3843_v42 }
 0x5d4   : > { %v5294_v49 = vpack.i.bf16 %v3499_v8, %v7020_v9  ;;  %v3453_v50 = vmul.f32 %v7305_v30, %v7346_v26  ;;  %v7361_v16 = vld [vmem:[#allocation3 + $0x10] sm:$0xff]  ;;  %3914 = vmatprep.subr.mxu1 %v5621_v1 }
 0x5d5   : > { %v3412_v31 = vpop.f32.mrf.mxu0  ;;  %5300 = vrot.lane.b32.xlu0 %v5299_v55, %s8005_s26  ;;  %3915 = vmatpush1.msra.mxu1 %v3842_v19 }
 0x5d6   : > { %5295 = vrot.lane.b32.xlu1 %v5294_v49, %s8004_s0  ;;  %v3468_v9 = vadd.f32 %v7313_v34, %v3453_v50  ;;  %v7365_v23 = vadd.f32 %v3412_v31, %v6783_v48  ;;  %v3554_v4 = vld [vmem:[#allocation3 + $0x22] sm:$0xff]  ;;  %3944 = vmatprep.subr.mxu1 %v5621_v1 }
 0x5d7   : > { %v3523_v41 = vld [vmem:[#allocation3 + $0x21] sm:$0xff]  ;;  %v3414_v0 = vpop.f32.mrf.mxu0  ;;  %4736 = vmatprep.mubr.msk.f32.mxu1 %vm628_vm11, %v3554_v4  ;;  %v5314_v36 = vpack.i.bf16 %v3554_v4, %v3507_v13  ;;  %3945 = vmatpush2.msra.mxu1 %v3859_v17 }
 0x5d8   : > { %v7367_v56 = vld [vmem:[#allocation3 + $0x20] sm:$0xff]  ;;  %v5309_v11 = vpack.i.bf16 %v3523_v41, %v3499_v8  ;;  %v3476_v48 = vmax.f32 %v3468_v9, 0.0  ;;  %v3454_v18 = vmul.f32 %v7305_v30, %v7365_v23  ;;  %3946 = vmatprep.subr.mxu1 %v5621_v1 }
 0x5d9   : > { %v5304_v58 = vpack.i.bf16 %v7367_v56, %v7361_v16  ;;  %3947 = vmatpush2.msra.mxu1 %v3858_v24 }
 0x5da   : > { %5310 = vrot.lane.b32.xlu0 %v5309_v11, %s8002_s24  ;;  %3484 = vst.msk [vmem:[#allocation3 + $0x31] sm:$0xff] %vm628_vm11, %v3476_v48  ;;  %v3469_v22 = vadd.f32 %v7313_v34, %v3454_v18  ;;  %4830 = vmatprep.subr.mxu1 %v5621_v1 }
 0x5db   : > { %5305 = vrot.lane.b32.xlu1 %v5304_v58, %s7998_s30 }
 0x5dc   : > { %v3477_v7 = vmax.f32 %v3469_v22, 0.0 }
 0x5de   : > { %3485 = vst.msk [vmem:[#allocation3 + $0x41] sm:$0xff] %vm628_vm11, %v3477_v7 }
 0x5df   : > { %5315 = vrot.lane.b32.xlu1 %v5314_v36, %s8003_s23 }
 0x5e0   : > { %v3417_v61 = vpop.f32.mrf.mxu0 }
 0x5e1   : > { %v7395_v10 = vadd.f32 %v3417_v61, %v6827_v20  ;;  %v7397_v25 = vld [vmem:[#allocation3 + $0x30] sm:$0xff] }
 0x5e2   : > { %v3547_v45 = vld [vmem:[#allocation3 + $0x31] sm:$0xff]  ;;  %v3419_v51 = vpop.f32.mrf.mxu0  ;;  %v5319_v6 = vpack.i.bf16 %v7397_v25, %v7367_v56 }
 0x5e3   : > { %v5324_v46 = vpack.i.bf16 %v3547_v45, %v3523_v41  ;;  %v3455_v52 = vmul.f32 %v7305_v30, %v7395_v10  ;;  %v7403_v14 = vld [vmem:[#allocation3 + $0x32] sm:$0xff] }
 0x5e4   : > { %v3422_v57 = vpop.f32.mrf.mxu0  ;;  %5320 = vrot.lane.b32.xlu0 %v5319_v6, %s8000_s25  ;;  %v5334_v53 = vpack.i.bf16 %v7403_v14, %v3554_v4 }
 0x5e5   : > { %5325 = vrot.lane.b32.xlu1 %v5324_v46, %s8001_s29  ;;  %v3470_v20 = vadd.f32 %v7313_v34, %v3455_v52  ;;  %v7409_v35 = vadd.f32 %v3422_v57, %v6834_v27  ;;  %v7414_v47 = vld [vmem:[#allocation3 + $0x40] sm:$0xff] }
 0x5e6   : > { %v3424_v37 = vpop.f32.mrf.mxu0  ;;  %v3525_v39 = vld [vmem:[#allocation3 + $0x41] sm:$0xff]  ;;  %v5339_v27 = vpack.i.bf16 %v7414_v47, %v7397_v25 }
 0x5e7   : > { %v3478_v21 = vmax.f32 %v3470_v20, 0.0  ;;  %v3456_v63 = vmul.f32 %v7305_v30, %v7409_v35  ;;  %v5344_v38 = vpack.i.bf16 %v3525_v39, %v3547_v45  ;;  %v7422_v44 = vld [vmem:[#allocation3 + $0x42] sm:$0xff] }
 0x5e8   : > { %5330 = vrot.lane.b32.xlu0 %v5324_v46, %s8004_s0  ;;  %v5349_v29 = vpack.i.bf16 %v7422_v44, %v7403_v14 }
 0x5e9   : > { %5335 = vrot.lane.b32.xlu1 %v5334_v53, %s8005_s26  ;;  %3486 = vst.msk [vmem:[#allocation3 + $0x51] sm:$0xff] %vm628_vm11, %v3478_v21  ;;  %v3471_v40 = vadd.f32 %v7313_v34, %v3456_v63 }
 0x5eb   : > { %v3479_v59 = vmax.f32 %v3471_v40, 0.0 }
 0x5ec   : > { %5340 = vrot.lane.b32.xlu0 %v5339_v27, %s7998_s30 }
 0x5ed   : > { %5345 = vrot.lane.b32.xlu1 %v5344_v38, %s8002_s24  ;;  %3487 = vst.msk [vmem:[#allocation3 + $0x61] sm:$0xff] %vm628_vm11, %v3479_v59  ;;  %v3427_v32 = vpop.f32.mrf.mxu0 }
 0x5ee   : > { %v7428_v28 = vadd.f32 %v3427_v32, %v6842_v33 }
 0x5ef   : > { %v3429_v13 = vpop.f32.mrf.mxu0 }
 0x5f0   : > { %v3457_v8 = vmul.f32 %v7305_v30, %v7428_v28  ;;  %5350 = vrot.lane.b32.xlu0 %v5349_v29, %s8003_s23  ;;  %v7435_v2 = vld [vmem:[#allocation3 + $0x50] sm:$0xff] }
 0x5f1   : > { %v3549_v55 = vld [vmem:[#allocation3 + $0x51] sm:$0xff]  ;;  %v5354_v49 = vpack.i.bf16 %v7435_v2, %v7414_v47 }
 0x5f2   : > { %v5359_v54 = vpack.i.bf16 %v3549_v55, %v3525_v39  ;;  %v3472_v50 = vadd.f32 %v7313_v34, %v3457_v8  ;;  %v3432_v33 = vpop.f32.mrf.mxu0  ;;  %v7444_v31 = vld [vmem:[#allocation3 + $0x52] sm:$0xff] }
 0x5f3   : > { %v7441_v42 = vadd.f32 %v3432_v33, %v6854_v43  ;;  %5355 = vrot.lane.b32.xlu1 %v5354_v49, %s8000_s25  ;;  %v5369_v0 = vpack.i.bf16 %v7444_v31, %v7422_v44 }
 0x5f4   : > { %v3480_v9 = vmax.f32 %v3472_v50, 0.0  ;;  %5360 = vrot.lane.b32.xlu0 %v5359_v54, %s8001_s29  ;;  %v3434_v4 = vpop.f32.mrf.mxu0  ;;  %v7452_v11 = vld [vmem:[#allocation3 + $0x60] sm:$0xff] }
 0x5f5   : > { %v3458_v41 = vmul.f32 %v7305_v30, %v7441_v42  ;;  %v3527_v58 = vld [vmem:[#allocation3 + $0x61] sm:$0xff]  ;;  %v5374_v48 = vpack.i.bf16 %v7452_v11, %v7435_v2 }
 0x5f6   : > { %3488 = vst.msk [vmem:[#allocation3 + $0x71] sm:$0xff] %vm628_vm11, %v3480_v9  ;;  %v5379_v18 = vpack.i.bf16 %v3527_v58, %v3549_v55  ;;  %v7459_v30 = vld [vmem:[#allocation3 + $0x62] sm:$0xff] }
 0x5f7   : > { %v3473_v43 = vadd.f32 %v7313_v34, %v3458_v41  ;;  %5365 = vrot.lane.b32.xlu1 %v5359_v54, %s8004_s0  ;;  %v5384_v34 = vpack.i.bf16 %v7459_v30, %v7444_v31 }
 0x5f8   : > { %5370 = vrot.lane.b32.xlu0 %v5369_v0, %s8005_s26 }
 0x5f9   : > { %v3481_v19 = vmax.f32 %v3473_v43, 0.0 }
 0x5fb   : > { %3489 = vst.msk [vmem:[#allocation3 + $0x81] sm:$0xff] %vm628_vm11, %v3481_v19  ;;  %5375 = vrot.lane.b32.xlu1 %v5374_v48, %s7998_s30 }
 0x5fc   : > { %5380 = vrot.lane.b32.xlu0 %v5379_v18, %s8002_s24 }
 0x5fd   : > { %v7466_v17 = vld [vmem:[#allocation3 + $0x70] sm:$0xff] }
 0x5fe   : > { %v5389_v22 = vpack.i.bf16 %v7466_v17, %v7452_v11  ;;  %v3551_v36 = vld [vmem:[#allocation3 + $0x71] sm:$0xff] }
 0x5ff   : > { %5385 = vrot.lane.b32.xlu1 %v5384_v34, %s8003_s23  ;;  %v5394_v24 = vpack.i.bf16 %v3551_v36, %v3527_v58  ;;  %v7472_v7 = vld [vmem:[#allocation3 + $0x72] sm:$0xff] }
 0x600   : > { %5390 = vrot.lane.b32.xlu0 %v5389_v22, %s8000_s25  ;;  %v5404_v61 = vpack.i.bf16 %v7472_v7, %v7459_v30 }
 0x602   : > { %v3529_v45 = vld [vmem:[#allocation3 + $0x81] sm:$0xff] }
 0x603   : > { %5395 = vrot.lane.b32.xlu1 %v5394_v24, %s8001_s29  ;;  %v3521_v51 = vld [vmem:[#allocation3 + $0x80] sm:$0xff]  ;;  %v5414_v6 = vpack.i.bf16 %v3529_v45, %v3551_v36 }
 0x604   : > { %5400 = vrot.lane.b32.xlu0 %v5394_v24, %s8004_s0  ;;  %v5409_v46 = vpack.i.bf16 %v3521_v51, %v7466_v17  ;;  %v7486_v52 = vld [vmem:[#allocation3 + $0x82] sm:$0xff] }
 0x607   : > { %5405 = vrot.lane.b32.xlu1 %v5404_v61, %s8005_s26 }
 0x608   : > { %3710 = vrot.lane.b32.xlu0 %v7472_v7, %s8003_s23 }
 0x60b   : > { %5415 = vrot.lane.b32.xlu1 %v5414_v6, %s8002_s24 }
 0x60c   : > { %5410 = vrot.lane.b32.xlu0 %v5409_v46, %s7998_s30 }
 0x60f   : > { %3742 = vrot.lane.b32.xlu1 %v3521_v51, %s8000_s25 }
 0x610   : > { %3774 = vrot.lane.b32.xlu0 %v3529_v45, %s8001_s29 }
 0x613   : > { %3712 = vrot.lane.b32.xlu1 %v7486_v52, %s8003_s23 }
 0x614   : > { %3744 = vrot.lane.b32.xlu0 %v7176_v3, %s8000_s25 }
 0x617   : > { %3776 = vrot.lane.b32.xlu1 %v7184_v12, %s8001_s29 }
 0x647   : > { %v5301_v20 = vpop.permute.xlu0 %5300 }
 0x648   : > { %v5296_v57 = vpop.permute.xlu1 %5295  ;;  %v5302_v63 = vunpack.i.l.bf16 %v5301_v20  ;;  %v5303_v38 = vunpack.i.h.bf16 %v5301_v20 }
 0x649   : > { %v5297_v53 = vunpack.i.l.bf16 %v5296_v57  ;;  %v5298_v21 = vunpack.i.h.bf16 %v5296_v57 }
 0x64b   : > { %v3786_v39 = vsel %vm628_vm11, %v7188_v62, %v5297_v53  ;;  %v3787_v32 = vsel %vm628_vm11, %v7361_v16, %v5298_v21 }
 0x64c   : > { %v5311_v40 = vpop.permute.xlu0 %5310  ;;  %v3794_v12 = vsel %vm1612_vm14, %v3786_v39, %v5302_v63  ;;  %v3795_v49 = vsel %vm1612_vm14, %v3787_v32, %v5303_v38 }
 0x64d   : > { %v5306_v37 = vpop.permute.xlu1 %5305  ;;  %v5312_v29 = vunpack.i.l.bf16 %v5311_v40  ;;  %v5313_v55 = vunpack.i.h.bf16 %v5311_v40 }
 0x64e   : > { %v5307_v27 = vunpack.i.l.bf16 %v5306_v37  ;;  %v5308_v3 = vunpack.i.h.bf16 %v5306_v37 }
 0x650   : > { %v3802_v13 = vsel %vm1630_vm1, %v3794_v12, %v5307_v27  ;;  %v3803_v54 = vsel %vm1630_vm1, %v3795_v49, %v5308_v3 }
 0x651   : > { %v5316_v59 = vpop.permute.xlu1 %5315  ;;  %v3810_v9 = vsel %vm1648_vm3, %v3802_v13, %v5312_v29  ;;  %v3811_v58 = vsel %vm1648_vm3, %v3803_v54, %v5313_v55 }
 0x652   : > { %v5317_v8 = vunpack.i.l.bf16 %v5316_v59  ;;  %v5318_v62 = vunpack.i.h.bf16 %v5316_v59 }
 0x654   : > { %v3818_v0 = vsel %vm2172_vm0, %v3810_v9, %v5317_v8  ;;  %v3819_v22 = vsel %vm2172_vm0, %v3811_v58, %v5318_v62 }
 0x656   : > { %v5321_v50 = vpop.permute.xlu0 %5320 }
 0x657   : > { %v5326_v33 = vpop.permute.xlu1 %5325  ;;  %v5323_v4 = vunpack.i.h.bf16 %v5321_v50  ;;  %v5322_v41 = vunpack.i.l.bf16 %v5321_v50 }
 0x658   : > { %v5327_v16 = vunpack.i.l.bf16 %v5326_v33  ;;  %v5328_v19 = vunpack.i.h.bf16 %v5326_v33 }
 0x659   : > { %v3826_v43 = vsel %vm2181_vm5, %v3818_v0, %v5322_v41  ;;  %v3827_v24 = vsel %vm2181_vm5, %v3819_v22, %v5323_v4 }
 0x65a   : > { %v5331_v48 = vpop.permute.xlu0 %5330  ;;  %v3834_v34 = vsel %vm2190_vm6, %v3826_v43, %v5327_v16  ;;  %v3835_v6 = vsel %vm2190_vm6, %v3827_v24, %v5328_v19 }
 0x65b   : > { %v5336_v18 = vpop.permute.xlu1 %5335  ;;  %v5332_v36 = vunpack.i.l.bf16 %v5331_v48  ;;  %3949 = vmatmul.mubr.f32.vlgmr.msra.gmra.mxu1 %v3834_v34  ;;  %v5333_v61 = vunpack.i.h.bf16 %v5331_v48 }
 0x65c   : > { %4737 = vmatprep.mubr.msk.f32.mxu1 %vm628_vm11, %v7403_v14  ;;  %v5337_v45 = vunpack.i.l.bf16 %v5336_v18  ;;  %v5338_v37 = vunpack.i.h.bf16 %v5336_v18 }
 0x65d   : > { %v3788_v46 = vsel %vm628_vm11, %v7367_v56, %v5332_v36  ;;  %v3789_v53 = vsel %vm628_vm11, %v7397_v25, %v5333_v61 }
 0x65e   : > { %v5341_v51 = vpop.permute.xlu0 %5340  ;;  %v3796_v14 = vsel %vm1612_vm14, %v3788_v46, %v5337_v45  ;;  %v3797_v56 = vsel %vm1612_vm14, %v3789_v53, %v5338_v37 }
 0x65f   : > { %v5342_v57 = vunpack.i.l.bf16 %v5341_v51  ;;  %v5346_v20 = vpop.permute.xlu1 %5345  ;;  %3954 = vmatmul.mubr.f32.gmra.mxu1 %v3835_v6  ;;  %v5343_v21 = vunpack.i.h.bf16 %v5341_v51 }
 0x660   : > { %4738 = vmatprep.mubr.msk.f32.mxu1 %vm628_vm11, %v7422_v44  ;;  %v5347_v63 = vunpack.i.l.bf16 %v5346_v20  ;;  %v5348_v38 = vunpack.i.h.bf16 %v5346_v20 }
 0x661   : > { %v3804_v40 = vsel %vm1630_vm1, %v3796_v14, %v5342_v57  ;;  %v3805_v59 = vsel %vm1630_vm1, %v3797_v56, %v5343_v21 }
 0x662   : > { %v5351_v39 = vpop.permute.xlu0 %5350  ;;  %v3812_v44 = vsel %vm1648_vm3, %v3804_v40, %v5347_v63  ;;  %v3813_v55 = vsel %vm1648_vm3, %v3805_v59, %v5348_v38 }
 0x663   : > { %v5352_v27 = vunpack.i.l.bf16 %v5351_v39  ;;  %v5353_v32 = vunpack.i.h.bf16 %v5351_v39 }
 0x665   : > { %v5356_v3 = vpop.permute.xlu1 %5355  ;;  %v3820_v8 = vsel %vm2172_vm0, %v3812_v44, %v5352_v27  ;;  %v3821_v33 = vsel %vm2172_vm0, %v3813_v55, %v5353_v32 }
 0x666   : > { %v5358_v29 = vunpack.i.h.bf16 %v5356_v3  ;;  %v5357_v12 = vunpack.i.l.bf16 %v5356_v3  ;;  %v5361_v25 = vpop.permute.xlu0 %5360 }
 0x667   : > { %v5362_v13 = vunpack.i.l.bf16 %v5361_v25  ;;  %v5363_v54 = vunpack.i.h.bf16 %v5361_v25 }
 0x668   : > { %v3828_v49 = vsel %vm2181_vm5, %v3820_v8, %v5357_v12  ;;  %v3829_v41 = vsel %vm2181_vm5, %v3821_v33, %v5358_v29 }
 0x669   : > { %v5366_v62 = vpop.permute.xlu1 %5365  ;;  %v3836_v50 = vsel %vm2190_vm6, %v3828_v49, %v5362_v13  ;;  %v3837_v19 = vsel %vm2190_vm6, %v3829_v41, %v5363_v54 }
 0x66a   : > { %v5367_v9 = vunpack.i.l.bf16 %v5366_v62  ;;  %v5371_v4 = vpop.permute.xlu0 %5370  ;;  %3959 = vmatmul.mubr.f32.gmra.mxu1 %v3836_v50  ;;  %v5368_v0 = vunpack.i.h.bf16 %v5366_v62 }
 0x66b   : > { %v5372_v16 = vunpack.i.l.bf16 %v5371_v4  ;;  %4739 = vmatprep.mubr.msk.f32.mxu1 %vm628_vm11, %v7444_v31  ;;  %v5373_v34 = vunpack.i.h.bf16 %v5371_v4 }
 0x66c   : > { %v3790_v43 = vsel %vm628_vm11, %v7414_v47, %v5367_v9  ;;  %v3791_v31 = vsel %vm628_vm11, %v7435_v2, %v5368_v0 }
 0x66d   : > { %v5376_v58 = vpop.permute.xlu1 %5375  ;;  %v3798_v22 = vsel %vm1612_vm14, %v3790_v43, %v5372_v16  ;;  %v3799_v6 = vsel %vm1612_vm14, %v3791_v31, %v5373_v34 }
 0x66e   : > { %v5377_v48 = vunpack.i.l.bf16 %v5376_v58  ;;  %v5381_v18 = vpop.permute.xlu0 %5380  ;;  %3964 = vmatmul.mubr.f32.gmra.mxu1 %v3837_v19  ;;  %v5378_v24 = vunpack.i.h.bf16 %v5376_v58 }
 0x66f   : > { %v5382_v36 = vunpack.i.l.bf16 %v5381_v18  ;;  %4740 = vmatprep.mubr.msk.f32.mxu1 %vm628_vm11, %v7459_v30  ;;  %v5383_v46 = vunpack.i.h.bf16 %v5381_v18 }
 0x670   : > { %v3806_v61 = vsel %vm1630_vm1, %v3798_v22, %v5377_v48  ;;  %v3807_v37 = vsel %vm1630_vm1, %v3799_v6, %v5378_v24  ;;  %v4402_v24 = vld [vmem:[%s7942_s19 + $0x78] sm:$0xff]  ;;  %v4396_v6 = vld [vmem:[%s7942_s19 + $0x48] sm:$0xff] }
 0x671   : > { %v5386_v47 = vpop.permute.xlu1 %5385  ;;  %v3814_v57 = vsel %vm1648_vm3, %v3806_v61, %v5382_v36  ;;  %v3815_v63 = vsel %vm1648_vm3, %v3807_v37, %v5383_v46  ;;  %v4401_v61 = vld [vmem:[%s7942_s19 + $0x70] sm:$0xff]  ;;  %4430 = vmatpush1.msra.mxu0 %v4402_v24  ;;  %4848 = vmatpush1.msra.mxu1 %v4402_v24  ;;  %v4395_v46 = vld [vmem:[%s7942_s19 + $0x40] sm:$0xff] }
 0x672   : > { %v5387_v45 = vunpack.i.l.bf16 %v5386_v47  ;;  %v5391_v51 = vpop.permute.xlu0 %5390  ;;  %v5388_v53 = vunpack.i.h.bf16 %v5386_v47  ;;  %4431 = vmatprep.subr.mxu0 %v5621_v1  ;;  %4831 = vmatprep.subr.mxu1 %v5621_v1  ;;  %v4399_v47 = vld [vmem:[%s7942_s19 + $0x60] sm:$0xff] }
 0x673   : > { %v5392_v20 = vunpack.i.l.bf16 %v5391_v51  ;;  %v5393_v39 = vunpack.i.h.bf16 %v5391_v51  ;;  %4432 = vmatpush1.msra.mxu0 %v4401_v61  ;;  %4849 = vmatpush1.msra.mxu1 %v4401_v61  ;;  %v4397_v51 = vld [vmem:[%s7942_s19 + $0x50] sm:$0xff]  ;;  %v7620_v37 = vld [vmem:[%s7941_s18] ss:$0 sm:$0xff] }
 0x674   : > { %v3822_v30 = vsel %vm2172_vm0, %v3814_v57, %v5387_v45  ;;  %v3823_v38 = vsel %vm2172_vm0, %v3815_v63, %v5388_v53  ;;  %4433 = vmatprep.subr.mxu0 %v5621_v1  ;;  %4832 = vmatprep.subr.mxu1 %v5621_v1  ;;  %v4398_v45 = vld [vmem:[%s7942_s19 + $0x58] sm:$0xff]  ;;  %v7615_v57 = vld [vmem:[%s7940_s17] ss:$0 sm:$0xff] }
 0x675   : > { %v5396_v21 = vpop.permute.xlu1 %5395  ;;  %v3830_v40 = vsel %vm2181_vm5, %v3822_v30, %v5392_v20  ;;  %v3831_v44 = vsel %vm2181_vm5, %v3823_v38, %v5393_v39  ;;  %v4392_v38 = vld [vmem:[%s7942_s19 + $0x28] sm:$0xff] }
 0x676   : > { %v5397_v14 = vunpack.i.l.bf16 %v5396_v21  ;;  %v5401_v2 = vpop.permute.xlu0 %5400  ;;  %v5398_v27 = vunpack.i.h.bf16 %v5396_v21 }
 0x677   : > { %v5402_v3 = vunpack.i.l.bf16 %v5401_v2  ;;  %v5403_v29 = vunpack.i.h.bf16 %v5401_v2  ;;  %v4394_v2 = vld [vmem:[%s7942_s19 + $0x38] sm:$0xff] }
 0x678   : > { %v3838_v56 = vsel %vm2190_vm6, %v3830_v40, %v5397_v14  ;;  %v3839_v25 = vsel %vm2190_vm6, %v3831_v44, %v5398_v27  ;;  %v4393_v27 = vld [vmem:[%s7942_s19 + $0x30] sm:$0xff]  ;;  %v4043_v44 = vld [vmem:[#allocation3 + $0x1] sm:$0xff] }
 0x679   : > { %3969 = vmatmul.mubr.f32.gmra.mxu1 %v3838_v56  ;;  %v5406_v59 = vpop.permute.xlu1 %5405  ;;  %v3792_v49 = vsel %vm628_vm11, %v7452_v11, %v5402_v3  ;;  %v3793_v62 = vsel %vm628_vm11, %v7466_v17, %v5403_v29  ;;  %v4051_v3 = vld [vmem:[#allocation3 + $0x2] sm:$0xff]  ;;  %v4390_v29 = vld [vmem:[%s7942_s19 + $0x18] sm:$0xff] }
 0x67a   : > { %4741 = vmatprep.mubr.msk.f32.mxu1 %vm628_vm11, %v7472_v7  ;;  %v3711_v32 = vpop.permute.xlu0 %3710  ;;  %v5407_v12 = vunpack.i.l.bf16 %v5406_v59  ;;  %v5408_v13 = vunpack.i.h.bf16 %v5406_v59 }
 0x67c   : > { %v3800_v50 = vsel %vm1612_vm14, %v3792_v49, %v5407_v12  ;;  %v3801_v9 = vsel %vm1612_vm14, %v3793_v62, %v5408_v13  ;;  %v4389_v49 = vld [vmem:[%s7942_s19 + $0x10] sm:$0xff] }
 0x67d   : > { %3974 = vmatmul.mubr.f32.gmra.mxu1 %v3839_v25  ;;  %v5416_v8 = vpop.permute.xlu1 %5415 }
 0x67e   : > { %4742 = vmatprep.mubr.msk.f32.mxu1 %vm628_vm11, %v7486_v52  ;;  %v5411_v55 = vpop.permute.xlu0 %5410  ;;  %v5417_v33 = vunpack.i.l.bf16 %v5416_v8  ;;  %v5418_v43 = vunpack.i.h.bf16 %v5416_v8 }
 0x67f   : > { %v5413_v54 = vunpack.i.h.bf16 %v5411_v55  ;;  %v5412_v7 = vunpack.i.l.bf16 %v5411_v55 }
 0x681   : > { %v3808_v4 = vsel %vm1630_vm1, %v3800_v50, %v5412_v7  ;;  %v3743_v41 = vpop.permute.xlu1 %3742  ;;  %v3809_v0 = vsel %vm1630_vm1, %v3801_v9, %v5413_v54  ;;  %v4388_v7 = vld [vmem:[%s7942_s19 + $0x8] sm:$0xff] }
 0x682   : > { %v3816_v16 = vsel %vm1648_vm3, %v3808_v4, %v5417_v33  ;;  %v3775_v52 = vpop.permute.xlu0 %3774  ;;  %v3817_v17 = vsel %vm1648_vm3, %v3809_v0, %v5418_v43  ;;  %v4387_v43 = vld [vmem:[%s7942_s19] sm:$0xff] }
 0x683   : > { %v3824_v11 = vsel %vm2172_vm0, %v3816_v16, %v3711_v32  ;;  %v4391_v32 = vld [vmem:[%s7942_s19 + $0x20] sm:$0xff] }
 0x684   : > { %v3832_v58 = vsel %vm2181_vm5, %v3824_v11, %v3743_v41 }
 0x685   : > { %v3713_v19 = vpop.permute.xlu1 %3712  ;;  %v3840_v48 = vsel %vm2190_vm6, %v3832_v58, %v3775_v52 }
 0x686   : > { %v3825_v18 = vsel %vm2172_vm0, %v3817_v17, %v3713_v19  ;;  %v3745_v34 = vpop.permute.xlu0 %3744  ;;  %3979 = vmatmul.mubr.f32.gmra.mxu1 %v3840_v48  ;;  %v4404_v17 = vld [vmem:[%s7942_s19 + $0x88] sm:$0xff] }
 0x687   : > { %4743 = vmatprep.mubr.msk.f32.mxu1 %vm628_vm11, %v7261_v15  ;;  %v3833_v22 = vsel %vm2181_vm5, %v3825_v18, %v3745_v34  ;;  %v4400_v15 = vld [vmem:[%s7942_s19 + $0x68] sm:$0xff]  ;;  %v4403_v34 = vld [vmem:[%s7942_s19 + $0x80] sm:$0xff] }
 0x688   : > { %4434 = vmatpush1.msra.mxu0 %v4400_v15  ;;  %4850 = vmatpush1.msra.mxu1 %v4400_v15 }
 0x689   : > { %v3777_v36 = vpop.permute.xlu1 %3776  ;;  %4435 = vmatprep.subr.mxu0 %v5621_v1  ;;  %4833 = vmatprep.subr.mxu1 %v5621_v1 }
 0x68a   : > { %v3841_v31 = vsel %vm2190_vm6, %v3833_v22, %v3777_v36  ;;  %4436 = vmatpush1.msra.mxu0 %v4399_v47  ;;  %4851 = vmatpush1.msra.mxu1 %v4399_v47 }
 0x68b   : > { %3984 = vmatmul.mubr.f32.gmra.mxu1 %v3841_v31  ;;  %4437 = vmatprep.subr.mxu0 %v5621_v1 }
 0x68c   : > { %4834 = vmatprep.subr.mxu1 %v5621_v1  ;;  %4438 = vmatpush1.msra.mxu0 %v4398_v45 }
 0x68d   : > { %4852 = vmatpush1.msra.mxu1 %v4398_v45  ;;  %4439 = vmatprep.subr.mxu0 %v5621_v1 }
 0x68e   : > { %4835 = vmatprep.subr.mxu1 %v5621_v1  ;;  %4440 = vmatpush1.msra.mxu0 %v4397_v51 }
 0x68f   : > { %4853 = vmatpush1.msra.mxu1 %v4397_v51  ;;  %4441 = vmatprep.subr.mxu0 %v5621_v1 }
 0x690   : > { %4836 = vmatprep.subr.mxu1 %v5621_v1  ;;  %4442 = vmatpush1.msra.mxu0 %v4396_v6 }
 0x691   : > { %4854 = vmatpush1.msra.mxu1 %v4396_v6  ;;  %4443 = vmatprep.subr.mxu0 %v5621_v1 }
 0x692   : > { %4837 = vmatprep.subr.mxu1 %v5621_v1  ;;  %4444 = vmatpush1.msra.mxu0 %v4395_v46 }
 0x693   : > { %4855 = vmatpush1.msra.mxu1 %v4395_v46  ;;  %4445 = vmatprep.subr.mxu0 %v5621_v1 }
 0x694   : > { %4838 = vmatprep.subr.mxu1 %v5621_v1  ;;  %4446 = vmatpush1.msra.mxu0 %v4394_v2 }
 0x695   : > { %4856 = vmatpush1.msra.mxu1 %v4394_v2  ;;  %4447 = vmatprep.subr.mxu0 %v5621_v1 }
 0x696   : > { %4839 = vmatprep.subr.mxu1 %v5621_v1  ;;  %4448 = vmatpush1.msra.mxu0 %v4393_v27 }
 0x697   : > { %4857 = vmatpush1.msra.mxu1 %v4393_v27  ;;  %4449 = vmatprep.subr.mxu0 %v5621_v1 }
 0x698   : > { %4840 = vmatprep.subr.mxu1 %v5621_v1  ;;  %4450 = vmatpush1.msra.mxu0 %v4392_v38 }
 0x699   : > { %4858 = vmatpush1.msra.mxu1 %v4392_v38  ;;  %4451 = vmatprep.subr.mxu0 %v5621_v1 }
 0x69a   : > { %4841 = vmatprep.subr.mxu1 %v5621_v1  ;;  %4452 = vmatpush1.msra.mxu0 %v4391_v32 }
 0x69b   : > { %4859 = vmatpush1.msra.mxu1 %v4391_v32  ;;  %4453 = vmatprep.subr.mxu0 %v5621_v1 }
 0x69c   : > { %4842 = vmatprep.subr.mxu1 %v5621_v1  ;;  %4454 = vmatpush1.msra.mxu0 %v4390_v29 }
 0x69d   : > { %4860 = vmatpush1.msra.mxu1 %v4390_v29  ;;  %4455 = vmatprep.subr.mxu0 %v5621_v1 }
 0x69e   : > { %4843 = vmatprep.subr.mxu1 %v5621_v1  ;;  %4456 = vmatpush1.msra.mxu0 %v4389_v49 }
 0x69f   : > { %4861 = vmatpush1.msra.mxu1 %v4389_v49  ;;  %4457 = vmatprep.subr.mxu0 %v5621_v1 }
 0x6a0   : > { %4844 = vmatprep.subr.mxu1 %v5621_v1  ;;  %4458 = vmatpush1.msra.mxu0 %v4388_v7 }
 0x6a1   : > { %4459 = vmatprep.subr.mxu0 %v5621_v1  ;;  %4862 = vmatpush1.msra.mxu1 %v4388_v7 }
 0x6a2   : > { %4460 = vmatpush1.msra.mxu0 %v4387_v43  ;;  %4845 = vmatprep.subr.mxu1 %v5621_v1 }
 0x6a3   : > { %4489 = vmatprep.subr.mxu0 %v5621_v1  ;;  %4863 = vmatpush1.msra.mxu1 %v4387_v43 }
 0x6a4   : > { %4490 = vmatpush2.msra.mxu0 %v4404_v17  ;;  %4846 = vmatprep.subr.mxu1 %v5621_v1 }
 0x6a5   : > { %4491 = vmatprep.subr.mxu0 %v5621_v1  ;;  %4864 = vmatpush2.msra.mxu1 %v4404_v17 }
 0x6a6   : > { %4492 = vmatpush2.msra.mxu0 %v4403_v34  ;;  %4847 = vmatprep.subr.mxu1 %v5621_v1 }
 0x6a7   : > { %4865 = vmatpush2.msra.mxu1 %v4403_v34 }
 0x71b   : > { %v3950_v20 = vpop.f32.mrf.mxu1 }
 0x71c   : > { %v3996_v53 = vmul.f32 %v7615_v57, %v3950_v20 }
 0x71d   : > { %v3952_v30 = vpop.f32.mrf.mxu1 }
 0x71e   : > { %v4011_v21 = vadd.f32 %v7620_v37, %v3996_v53 }
 0x71f   : > { %v3955_v14 = vpop.f32.mrf.mxu1 }
 0x720   : > { %v4019_v63 = vmax.f32 %v4011_v21, 0.0  ;;  %v3997_v39 = vmul.f32 %v7615_v57, %v3955_v14 }
 0x721   : > { %v3957_v40 = vpop.f32.mrf.mxu1 }
 0x722   : > { %4027 = vst.msk [vmem:[#allocation3 + $0x11] sm:$0xff] %vm628_vm11, %v4019_v63  ;;  %v4012_v56 = vadd.f32 %v7620_v37, %v3997_v39 }
 0x724   : > { %v4020_v59 = vmax.f32 %v4012_v56, 0.0 }
 0x726   : > { %4028 = vst.msk [vmem:[#allocation3 + $0x21] sm:$0xff] %vm628_vm11, %v4020_v59 }
 0x729   : > { %v4052_v12 = vld [vmem:[#allocation3 + $0x12] sm:$0xff] }
 0x72a   : > { %v4044_v25 = vld [vmem:[#allocation3 + $0x11] sm:$0xff]  ;;  %v3960_v13 = vpop.f32.mrf.mxu1  ;;  %v5424_v8 = vpack.i.bf16 %v4052_v12, %v4051_v3 }
 0x72b   : > { %v5419_v55 = vpack.i.bf16 %v4044_v25, %v4043_v44  ;;  %v3998_v54 = vmul.f32 %v7615_v57, %v3960_v13  ;;  %v7662_v50 = vld [vmem:[#allocation3 + $0x10] sm:$0xff] }
 0x72c   : > { %5425 = vrot.lane.b32.xlu1 %v5424_v8, %s8005_s26  ;;  %v3962_v62 = vpop.f32.mrf.mxu1 }
 0x72d   : > { %5420 = vrot.lane.b32.xlu0 %v5419_v55, %s8004_s0  ;;  %v4013_v33 = vadd.f32 %v7620_v37, %v3998_v54  ;;  %v4099_v9 = vld [vmem:[#allocation3 + $0x22] sm:$0xff] }
 0x72e   : > { %v4068_v4 = vld [vmem:[#allocation3 + $0x21] sm:$0xff]  ;;  %v3965_v16 = vpop.f32.mrf.mxu1  ;;  %4746 = vmatprep.mubr.msk.f32.mxu0 %vm628_vm11, %v4099_v9  ;;  %v5439_v18 = vpack.i.bf16 %v4099_v9, %v4052_v12 }
 0x72f   : > { %v7665_v41 = vld [vmem:[#allocation3 + $0x20] sm:$0xff]  ;;  %v5434_v52 = vpack.i.bf16 %v4068_v4, %v4044_v25  ;;  %v4021_v11 = vmax.f32 %v4013_v33, 0.0  ;;  %v3999_v58 = vmul.f32 %v7615_v57, %v3965_v16 }
 0x730   : > { %v5429_v0 = vpack.i.bf16 %v7665_v41, %v7662_v50  ;;  %v3967_v19 = vpop.f32.mrf.mxu1 }
 0x731   : > { %5435 = vrot.lane.b32.xlu1 %v5434_v52, %s8002_s24  ;;  %4029 = vst.msk [vmem:[#allocation3 + $0x31] sm:$0xff] %vm628_vm11, %v4021_v11  ;;  %v4014_v48 = vadd.f32 %v7620_v37, %v3999_v58 }
 0x732   : > { %5430 = vrot.lane.b32.xlu0 %v5429_v0, %s7998_s30 }
 0x733   : > { %v4022_v22 = vmax.f32 %v4014_v48, 0.0 }
 0x735   : > { %4030 = vst.msk [vmem:[#allocation3 + $0x41] sm:$0xff] %vm628_vm11, %v4022_v22 }
 0x736   : > { %5440 = vrot.lane.b32.xlu0 %v5439_v18, %s8003_s23 }
 0x738   : > { %v4092_v36 = vld [vmem:[#allocation3 + $0x31] sm:$0xff] }
 0x739   : > { %v7694_v31 = vld [vmem:[#allocation3 + $0x30] sm:$0xff]  ;;  %v3970_v24 = vpop.f32.mrf.mxu1  ;;  %v5449_v61 = vpack.i.bf16 %v4092_v36, %v4068_v4 }
 0x73a   : > { %v5444_v15 = vpack.i.bf16 %v7694_v31, %v7665_v41  ;;  %v4000_v47 = vmul.f32 %v7615_v57, %v3970_v24  ;;  %v7699_v45 = vld [vmem:[#allocation3 + $0x32] sm:$0xff] }
 0x73b   : > { %5450 = vrot.lane.b32.xlu0 %v5449_v61, %s8001_s29  ;;  %v3972_v51 = vpop.f32.mrf.mxu1  ;;  %v5459_v46 = vpack.i.bf16 %v7699_v45, %v4099_v9  ;;  %v4090_v24 = vld [vmem:[#allocation3 + $0x90] sm:$0xff] }
 0x73c   : > { %5445 = vrot.lane.b32.xlu1 %v5444_v15, %s8000_s25  ;;  %v4015_v1 = vadd.f32 %v7620_v37, %v4000_v47  ;;  %v4070_v30 = vld [vmem:[#allocation3 + $0x41] sm:$0xff] }
 0x73d   : > { %v3975_v6 = vpop.f32.mrf.mxu1  ;;  %v7706_v21 = vld [vmem:[#allocation3 + $0x40] sm:$0xff]  ;;  %v5469_v63 = vpack.i.bf16 %v4070_v30, %v4092_v36  ;;  %v4098_v36 = vld [vmem:[#allocation3 + $0x91] sm:$0xff] }
 0x73e   : > { %v4023_v20 = vmax.f32 %v4015_v1, 0.0  ;;  %v4001_v53 = vmul.f32 %v7615_v57, %v3975_v6  ;;  %v5464_v39 = vpack.i.bf16 %v7706_v21, %v7694_v31  ;;  %v7714_v27 = vld [vmem:[#allocation3 + $0x42] sm:$0xff] }
 0x73f   : > { %5460 = vrot.lane.b32.xlu0 %v5459_v46, %s8005_s26  ;;  %v3977_v14 = vpop.f32.mrf.mxu1  ;;  %v5474_v56 = vpack.i.bf16 %v7714_v27, %v7699_v45  ;;  %v4035_v46 = vld [vmem:[#allocation3] sm:$0xff] }
 0x740   : > { %5455 = vrot.lane.b32.xlu1 %v5449_v61, %s8004_s0  ;;  %4031 = vst.msk [vmem:[#allocation3 + $0x51] sm:$0xff] %vm628_vm11, %v4023_v20  ;;  %v4016_v2 = vadd.f32 %v7620_v37, %v4001_v53 }
 0x742   : > { %v4024_v40 = vmax.f32 %v4016_v2, 0.0 }
 0x743   : > { %5470 = vrot.lane.b32.xlu0 %v5469_v63, %s8002_s24 }
 0x744   : > { %5465 = vrot.lane.b32.xlu1 %v5464_v39, %s7998_s30  ;;  %4032 = vst.msk [vmem:[#allocation3 + $0x61] sm:$0xff] %vm628_vm11, %v4024_v40 }
 0x746   : > { %v3980_v38 = vpop.f32.mrf.mxu1 }
 0x747   : > { %v4002_v59 = vmul.f32 %v7615_v57, %v3980_v38  ;;  %v7723_v32 = vld [vmem:[#allocation3 + $0x50] sm:$0xff] }
 0x748   : > { %5475 = vrot.lane.b32.xlu1 %v5474_v56, %s8003_s23  ;;  %v4094_v3 = vld [vmem:[#allocation3 + $0x51] sm:$0xff]  ;;  %v3982_v44 = vpop.f32.mrf.mxu1  ;;  %v5479_v29 = vpack.i.bf16 %v7723_v32, %v7706_v21 }
 0x749   : > { %v5484_v12 = vpack.i.bf16 %v4094_v3, %v4070_v30  ;;  %v4017_v25 = vadd.f32 %v7620_v37, %v4002_v59 }
 0x74a   : > { %5480 = vrot.lane.b32.xlu0 %v5479_v29, %s8000_s25 }
 0x74b   : > { %v4025_v13 = vmax.f32 %v4017_v25, 0.0  ;;  %v3985_v8 = vpop.f32.mrf.mxu1  ;;  %v4049_v55 = vld [vmem:[#allocation3 + $0x61] sm:$0xff] }
 0x74c   : > { %5485 = vrot.lane.b32.xlu1 %v5484_v12, %s8001_s29  ;;  %v7730_v49 = vld [vmem:[#allocation3 + $0x62] sm:$0xff]  ;;  %v4003_v54 = vmul.f32 %v7615_v57, %v3985_v8  ;;  %v5489_v7 = vpack.i.bf16 %v4049_v55, %v4070_v30 }
 0x74d   : > { %v5494_v62 = vpack.i.bf16 %v7730_v49, %v7714_v27  ;;  %4033 = vst.msk [vmem:[#allocation3 + $0x71] sm:$0xff] %vm628_vm11, %v4025_v13  ;;  %v3987_v33 = vpop.f32.mrf.mxu1  ;;  %v7755_v17 = vld [vmem:[#allocation3 + $0x60] sm:$0xff] }
 0x74e   : > { %v4018_v9 = vadd.f32 %v7620_v37, %v4003_v54  ;;  %5490 = vrot.lane.b32.xlu0 %v5489_v7, %s8004_s0  ;;  %v7748_v37 = vld [vmem:[#allocation3 + $0x52] sm:$0xff] }
 0x750   : > { %5495 = vrot.lane.b32.xlu1 %v5494_v62, %s8005_s26  ;;  %v4026_v4 = vmax.f32 %v4018_v9, 0.0 }
 0x752   : > { %4034 = vst.msk [vmem:[#allocation3 + $0x81] sm:$0xff] %vm628_vm11, %v4026_v4 }
 0x754   : > { %v4073_v16 = vld [vmem:[#allocation3 + $0x71] sm:$0xff] }
 0x755   : > { %v7740_v52 = vld [vmem:[#allocation3 + $0x70] sm:$0xff]  ;;  %v5504_v57 = vpack.i.bf16 %v4073_v16, %v4094_v3  ;;  %v5554_v61 = vpack.i.bf16 %v4098_v36, %v4073_v16 }
 0x756   : > { %v5499_v0 = vpack.i.bf16 %v7740_v52, %v7723_v32  ;;  %v7744_v43 = vld [vmem:[#allocation3 + $0x72] sm:$0xff]  ;;  %v5549_v15 = vpack.i.bf16 %v4090_v24, %v7740_v52 }
 0x757   : > { %5505 = vrot.lane.b32.xlu1 %v5504_v57, %s8002_s24  ;;  %v5514_v58 = vpack.i.bf16 %v7744_v43, %v7748_v37 }
 0x758   : > { %5500 = vrot.lane.b32.xlu0 %v5499_v0, %s7998_s30 }
 0x759   : > { %v4105_v11 = vld [vmem:[#allocation3 + $0x82] sm:$0xff] }
 0x75a   : > { %4752 = vmatprep.mubr.msk.f32.mxu1 %vm628_vm11, %v4105_v11  ;;  %v4089_v19 = vld [vmem:[#allocation3 + $0x80] sm:$0xff]  ;;  %v5544_v22 = vpack.i.bf16 %v4105_v11, %v7730_v49 }
 0x75b   : > { %5515 = vrot.lane.b32.xlu1 %v5514_v58, %s8003_s23  ;;  %v5524_v48 = vpack.i.bf16 %v4089_v19, %v7755_v17  ;;  %v4097_v18 = vld [vmem:[#allocation3 + $0x81] sm:$0xff] }
 0x75c   : > { %5510 = vrot.lane.b32.xlu0 %v5504_v57, %s8004_s0  ;;  %v5534_v34 = vpack.i.bf16 %v4097_v18, %v4049_v55 }
 0x75f   : > { %5525 = vrot.lane.b32.xlu1 %v5524_v48, %s8000_s25 }
 0x760   : > { %5520 = vrot.lane.b32.xlu0 %v5514_v58, %s8005_s26 }
 0x763   : > { %5535 = vrot.lane.b32.xlu1 %v5534_v34, %s8001_s29 }
 0x764   : > { %5530 = vrot.lane.b32.xlu0 %v5524_v48, %s7998_s30  ;;  %s620_s30 = sand.u32 1, %s5611_s22  }
 0x767   : > { %5545 = vrot.lane.b32.xlu1 %v5544_v22, %s8003_s23 }
 0x768   : > { %5540 = vrot.lane.b32.xlu0 %v5534_v34, %s8002_s24  ;;  %s4759_s24 = sshll.u32 %s5761_s2, 10  ;;  %s7882_s2 = scalar_lea.sflag [#allocation5], %s620_s30 }
 0x769   : > { %s7870_s1 = scalar_lea.hbm %s7943_s20, %s4759_s24 }
 0x76b   : > { %5555 = vrot.lane.b32.xlu1 %v5554_v61, %s8001_s29 }
 0x76c   : > { %5550 = vrot.lane.b32.xlu0 %v5549_v15, %s8000_s25  ;;  %s4630_s25 = sshll.u32 %s620_s30, 6 }
 0x76d   : > { %s7846_s29 = scalar_lea.vmem [#allocation4], %s4630_s25 }
 0x76e   : > { %s4564_s23 = sshll.u32 %s7846_s29, 4  ;;  %s7874_s23 = int_to_ptr.vmem [resolvable:$true] %s4564_s23 }
 0x76f   : > { %s5559_s27 = scalar_lea.vmem %s7874_s23, 1024  ;;  %p5566_p0 = scmp.lt.s32.totalorder %s7874_s23, %s5564_s5 }
 0x770   : > { %p5560_p11 = scmp.ne.s32.totalorder %s7874_s23, %s5559_s27  ;;  %p5567_p1 = scmp.lt.s32.totalorder %s5565_s6, %s5559_s27 }
 0x772   : > { %p5561_p12 = pnand %p5560_p11, %p5778_p5  ;;  %p5568_p2 = por %p5567_p1, %p5566_p0 }
 0x774   : > { %p5562_p13 = pneg %p5561_p12 }
 0x776   : > { %p5569_p3 = pnand %p5568_p2, %p5562_p13 }
 0x79e   : > { %v5426_v51 = vpop.permute.xlu1 %5425 }
 0x79f   : > { %v5421_v47 = vpop.permute.xlu0 %5420  ;;  %v5427_v53 = vunpack.i.l.bf16 %v5426_v51  ;;  %v5428_v63 = vunpack.i.h.bf16 %v5426_v51 }
 0x7a0   : > { %v5422_v6 = vunpack.i.l.bf16 %v5421_v47  ;;  %v5423_v20 = vunpack.i.h.bf16 %v5421_v47 }
 0x7a2   : > { %v4331_v30 = vsel %vm628_vm11, %v4035_v46, %v5422_v6  ;;  %v4332_v40 = vsel %vm628_vm11, %v7662_v50, %v5423_v20 }
 0x7a3   : > { %v5436_v14 = vpop.permute.xlu1 %5435  ;;  %v4339_v59 = vsel %vm1612_vm14, %v4331_v30, %v5427_v53  ;;  %v4340_v12 = vsel %vm1612_vm14, %v4332_v40, %v5428_v63 }
 0x7a4   : > { %v5431_v1 = vpop.permute.xlu0 %5430  ;;  %v5437_v38 = vunpack.i.l.bf16 %v5436_v14  ;;  %v5438_v29 = vunpack.i.h.bf16 %v5436_v14 }
 0x7a5   : > { %v5432_v2 = vunpack.i.l.bf16 %v5431_v1  ;;  %v5433_v56 = vunpack.i.h.bf16 %v5431_v1 }
 0x7a7   : > { %v4347_v3 = vsel %vm1630_vm1, %v4339_v59, %v5432_v2  ;;  %v4348_v25 = vsel %vm1630_vm1, %v4340_v12, %v5433_v56 }
 0x7a8   : > { %v5441_v39 = vpop.permute.xlu0 %5440  ;;  %v4355_v54 = vsel %vm1648_vm3, %v4347_v3, %v5437_v38  ;;  %v4356_v4 = vsel %vm1648_vm3, %v4348_v25, %v5438_v29 }
 0x7a9   : > { %v5442_v44 = vunpack.i.l.bf16 %v5441_v39  ;;  %v5443_v13 = vunpack.i.h.bf16 %v5441_v39 }
 0x7ab   : > { %v4363_v33 = vsel %vm2172_vm0, %v4355_v54, %v5442_v44  ;;  %v4364_v58 = vsel %vm2172_vm0, %v4356_v4, %v5443_v13 }
 0x7ad   : > { %v5451_v8 = vpop.permute.xlu0 %5450 }
 0x7ae   : > { %v5446_v55 = vpop.permute.xlu1 %5445  ;;  %v5452_v7 = vunpack.i.l.bf16 %v5451_v8  ;;  %v5453_v16 = vunpack.i.h.bf16 %v5451_v8 }
 0x7af   : > { %v5448_v62 = vunpack.i.h.bf16 %v5446_v55  ;;  %v5447_v50 = vunpack.i.l.bf16 %v5446_v55 }
 0x7b1   : > { %v4371_v9 = vsel %vm2181_vm5, %v4363_v33, %v5447_v50  ;;  %v5461_v57 = vpop.permute.xlu0 %5460  ;;  %v4372_v48 = vsel %vm2181_vm5, %v4364_v58, %v5448_v62 }
 0x7b2   : > { %v5456_v0 = vpop.permute.xlu1 %5455  ;;  %v4379_v11 = vsel %vm2190_vm6, %v4371_v9, %v5452_v7  ;;  %v5462_v34 = vunpack.i.l.bf16 %v5461_v57  ;;  %v4380_v36 = vsel %vm2190_vm6, %v4372_v48, %v5453_v16  ;;  %v5463_v47 = vunpack.i.h.bf16 %v5461_v57 }
 0x7b3   : > { %v5457_v19 = vunpack.i.l.bf16 %v5456_v0  ;;  %4494 = vmatmul.mubr.f32.vlgmr.msra.gmra.mxu0 %v4379_v11  ;;  %v5458_v18 = vunpack.i.h.bf16 %v5456_v0 }
 0x7b4   : > { %4747 = vmatprep.mubr.msk.f32.mxu0 %vm628_vm11, %v7699_v45 }
 0x7b5   : > { %v4333_v24 = vsel %vm628_vm11, %v7665_v41, %v5457_v19  ;;  %v5471_v61 = vpop.permute.xlu0 %5470  ;;  %v4334_v51 = vsel %vm628_vm11, %v7694_v31, %v5458_v18 }
 0x7b6   : > { %v5466_v22 = vpop.permute.xlu1 %5465  ;;  %v5472_v45 = vunpack.i.l.bf16 %v5471_v61  ;;  %v4341_v6 = vsel %vm1612_vm14, %v4333_v24, %v5462_v34  ;;  %v5473_v30 = vunpack.i.h.bf16 %v5471_v61  ;;  %v4342_v41 = vsel %vm1612_vm14, %v4334_v51, %v5463_v47 }
 0x7b7   : > { %v5467_v15 = vunpack.i.l.bf16 %v5466_v22  ;;  %4499 = vmatmul.mubr.f32.gmra.mxu0 %v4380_v36  ;;  %v5468_v1 = vunpack.i.h.bf16 %v5466_v22 }
 0x7b8   : > { %4748 = vmatprep.mubr.msk.f32.mxu0 %vm628_vm11, %v7714_v27 }
 0x7b9   : > { %v4349_v20 = vsel %vm1630_vm1, %v4341_v6, %v5467_v15  ;;  %v4350_v14 = vsel %vm1630_vm1, %v4342_v41, %v5468_v1 }
 0x7ba   : > { %v5476_v46 = vpop.permute.xlu1 %5475  ;;  %v4357_v31 = vsel %vm1648_vm3, %v4349_v20, %v5472_v45  ;;  %v4358_v3 = vsel %vm1648_vm3, %v4350_v14, %v5473_v30 }
 0x7bb   : > { %v5477_v53 = vunpack.i.l.bf16 %v5476_v46  ;;  %v5478_v2 = vunpack.i.h.bf16 %v5476_v46 }
 0x7bc   : > { %v5481_v63 = vpop.permute.xlu0 %5480 }
 0x7bd   : > { %v5483_v39 = vunpack.i.h.bf16 %v5481_v63  ;;  %v5482_v27 = vunpack.i.l.bf16 %v5481_v63  ;;  %v4365_v38 = vsel %vm2172_vm0, %v4357_v31, %v5477_v53  ;;  %v4366_v12 = vsel %vm2172_vm0, %v4358_v3, %v5478_v2 }
 0x7be   : > { %v5486_v40 = vpop.permute.xlu1 %5485 }
 0x7bf   : > { %v5487_v56 = vunpack.i.l.bf16 %v5486_v40  ;;  %v4373_v59 = vsel %vm2181_vm5, %v4365_v38, %v5482_v27  ;;  %v5488_v44 = vunpack.i.h.bf16 %v5486_v40  ;;  %v4374_v25 = vsel %vm2181_vm5, %v4366_v12, %v5483_v39  ;;  %v4106_v40 = vld [vmem:[#allocation3 + $0x92] sm:$0xff] }
 0x7c0   : > { %v5491_v8 = vpop.permute.xlu0 %5490 }
 0x7c1   : > { %v4381_v29 = vsel %vm2190_vm6, %v4373_v59, %v5487_v56  ;;  %v4382_v13 = vsel %vm2190_vm6, %v4374_v25, %v5488_v44  ;;  %v5493_v54 = vunpack.i.h.bf16 %v5491_v8  ;;  %v5492_v7 = vunpack.i.l.bf16 %v5491_v8 }
 0x7c2   : > { %4504 = vmatmul.mubr.f32.gmra.mxu0 %v4381_v29  ;;  %v5496_v55 = vpop.permute.xlu1 %5495 }
 0x7c3   : > { %4749 = vmatprep.mubr.msk.f32.mxu0 %vm628_vm11, %v7748_v37  ;;  %v5498_v33 = vunpack.i.h.bf16 %v5496_v55  ;;  %v5497_v9 = vunpack.i.l.bf16 %v5496_v55  ;;  %v4335_v4 = vsel %vm628_vm11, %v7706_v21, %v5492_v7  ;;  %v4337_v37 = vsel %vm628_vm11, %v7755_v17, %v5493_v54 }
 0x7c5   : > { %v4343_v58 = vsel %vm1612_vm14, %v4335_v4, %v5497_v9 }
 0x7c6   : > { %4509 = vmatmul.mubr.f32.gmra.mxu0 %v4382_v13 }
 0x7c7   : > { %4750 = vmatprep.mubr.msk.f32.mxu0 %vm628_vm11, %v7730_v49  ;;  %v4345_v49 = vsel %vm1612_vm14, %v4337_v37, %v5498_v33 }
 0x7c9   : > { %v5506_v62 = vpop.permute.xlu1 %5505 }
 0x7ca   : > { %v5501_v50 = vpop.permute.xlu0 %5500  ;;  %v5508_v19 = vunpack.i.h.bf16 %v5506_v62  ;;  %v5507_v48 = vunpack.i.l.bf16 %v5506_v62 }
 0x7cb   : > { %v5503_v16 = vunpack.i.h.bf16 %v5501_v50  ;;  %v5502_v57 = vunpack.i.l.bf16 %v5501_v50 }
 0x7cd   : > { %v5516_v0 = vpop.permute.xlu1 %5515  ;;  %v4353_v18 = vsel %vm1630_vm1, %v4345_v49, %v5503_v16  ;;  %v4351_v34 = vsel %vm1630_vm1, %v4343_v58, %v5502_v57 }
 0x7ce   : > { %v5511_v11 = vpop.permute.xlu0 %5510  ;;  %v5518_v22 = vunpack.i.h.bf16 %v5516_v0  ;;  %v5517_v36 = vunpack.i.l.bf16 %v5516_v0  ;;  %v4361_v15 = vsel %vm1648_vm3, %v4353_v18, %v5508_v19  ;;  %v4359_v47 = vsel %vm1648_vm3, %v4351_v34, %v5507_v48 }
 0x7cf   : > { %v5513_v1 = vunpack.i.h.bf16 %v5511_v11  ;;  %v5512_v45 = vunpack.i.l.bf16 %v5511_v11 }
 0x7d0   : > { %v4369_v51 = vsel %vm2172_vm0, %v4361_v15, %v5518_v22  ;;  %v4367_v20 = vsel %vm2172_vm0, %v4359_v47, %v5517_v36 }
 0x7d1   : > { %v5526_v24 = vpop.permute.xlu1 %5525  ;;  %v4336_v38 = vsel %vm628_vm11, %v7723_v32, %v5512_v45  ;;  %v4338_v59 = vsel %vm628_vm11, %v7740_v52, %v5513_v1 }
 0x7d2   : > { %v5521_v21 = vpop.permute.xlu0 %5520  ;;  %v5528_v61 = vunpack.i.h.bf16 %v5526_v24  ;;  %v5527_v17 = vunpack.i.l.bf16 %v5526_v24 }
 0x7d3   : > { %v5523_v53 = vunpack.i.h.bf16 %v5521_v21  ;;  %v5522_v30 = vunpack.i.l.bf16 %v5521_v21 }
 0x7d4   : > { %v4377_v2 = vsel %vm2181_vm5, %v4369_v51, %v5528_v61  ;;  %v4375_v27 = vsel %vm2181_vm5, %v4367_v20, %v5527_v17 }
 0x7d5   : > { %v5536_v6 = vpop.permute.xlu1 %5535  ;;  %v4344_v29 = vsel %vm1612_vm14, %v4336_v38, %v5522_v30  ;;  %v4346_v12 = vsel %vm1612_vm14, %v4338_v59, %v5523_v53 }
 0x7d6   : > { %v5531_v46 = vpop.permute.xlu0 %5530  ;;  %v5538_v41 = vunpack.i.h.bf16 %v5536_v6  ;;  %v5537_v14 = vunpack.i.l.bf16 %v5536_v6 }
 0x7d7   : > { %v5533_v63 = vunpack.i.h.bf16 %v5531_v46  ;;  %v5532_v39 = vunpack.i.l.bf16 %v5531_v46 }
 0x7d8   : > { %v4383_v31 = vsel %vm2190_vm6, %v4375_v27, %v5537_v14  ;;  %v4385_v56 = vsel %vm2190_vm6, %v4377_v2, %v5538_v41 }
 0x7d9   : > { %4514 = vmatmul.mubr.f32.gmra.mxu0 %v4383_v31  ;;  %4524 = vmatmul.mubr.f32.vlgmr.msra.gmra.mxu1 %v4385_v56  ;;  %v5546_v3 = vpop.permute.xlu1 %5545  ;;  %v4354_v32 = vsel %vm1630_vm1, %v4346_v12, %v5533_v63  ;;  %v4352_v8 = vsel %vm1630_vm1, %v4344_v29, %v5532_v39 }
 0x7da   : > { %v5541_v44 = vpop.permute.xlu0 %5540  ;;  %4751 = vmatprep.mubr.msk.f32.mxu0 %vm628_vm11, %v7744_v43  ;;  %4753 = vmatprep.mubr.msk.f32.mxu1 %vm628_vm11, %v4106_v40  ;;  %v5548_v52 = vunpack.i.h.bf16 %v5546_v3  ;;  %v5547_v55 = vunpack.i.l.bf16 %v5546_v3 }
 0x7db   : > { %v5543_v25 = vunpack.i.h.bf16 %v5541_v44  ;;  %v5542_v13 = vunpack.i.l.bf16 %v5541_v44 }
 0x7dd   : > { %v4360_v54 = vsel %vm1648_vm3, %v4352_v8, %v5542_v13  ;;  %v4362_v7 = vsel %vm1648_vm3, %v4354_v32, %v5543_v25  ;;  %v5556_v62 = vpop.permute.xlu1 %5555 }
 0x7de   : > { %v5551_v50 = vpop.permute.xlu0 %5550  ;;  %v5558_v33 = vunpack.i.h.bf16 %v5556_v62  ;;  %v5557_v9 = vunpack.i.l.bf16 %v5556_v62  ;;  %v4368_v37 = vsel %vm2172_vm0, %v4360_v54, %v5547_v55  ;;  %v4370_v16 = vsel %vm2172_vm0, %v4362_v7, %v5548_v52 }
 0x7df   : > { %v5553_v4 = vunpack.i.h.bf16 %v5551_v50  ;;  %v5552_v43 = vunpack.i.l.bf16 %v5551_v50 }
 0x7e1   : > { %v4376_v57 = vsel %vm2181_vm5, %v4368_v37, %v5552_v43  ;;  %v4378_v0 = vsel %vm2181_vm5, %v4370_v16, %v5553_v4 }
 0x7e2   : > { %v4384_v11 = vsel %vm2190_vm6, %v4376_v57, %v5557_v9  ;;  %v4386_v58 = vsel %vm2190_vm6, %v4378_v0, %v5558_v33 }
 0x7e3   : > { %4519 = vmatmul.mubr.f32.gmra.mxu0 %v4384_v11  ;;  %4529 = vmatmul.mubr.f32.gmra.mxu1 %v4386_v58 }
 0x873   : > { %v4495_v49 = vpop.f32.mrf.mxu0 }
 0x874   : > { %v4534_v19 = vadd.f32 %v4495_v49, %v7308_v60 }
 0x875   : > { %v4497_v48 = vpop.f32.mrf.mxu0 }
 0x876   : > { %4542 = vst.msk [vmem:[%s7846_s29] sm:$0xff] %vm628_vm11, %v4534_v19 }
 0x877   : > { %v4500_v18 = vpop.f32.mrf.mxu0 }
 0x878   : > { %v4535_v34 = vadd.f32 %v4500_v18, %v7319_v5 }
 0x879   : > { %v4502_v22 = vpop.f32.mrf.mxu0 }
 0x87a   : > { %4543 = vst.msk [vmem:[%s7846_s29 + $0x8] sm:$0xff] %vm628_vm11, %v4535_v34 }
 0x882   : > { %v4505_v36 = vpop.f32.mrf.mxu0 }
 0x883   : > { %v4536_v60 = vadd.f32 %v4505_v36, %v7346_v26 }
 0x884   : > { %v4507_v21 = vpop.f32.mrf.mxu0 }
 0x885   : > { %4544 = vst.msk [vmem:[%s7846_s29 + $0x10] sm:$0xff] %vm628_vm11, %v4536_v60 }
 0x886   : > { %v4510_v24 = vpop.f32.mrf.mxu0 }
 0x887   : > { %v4537_v61 = vadd.f32 %v4510_v24, %v7365_v23 }
 0x888   : > { %v4512_v17 = vpop.f32.mrf.mxu0 }
 0x889   : > { %4545 = vst.msk [vmem:[%s7846_s29 + $0x18] sm:$0xff] %vm628_vm11, %v4537_v61 }
 0x899   : > { %v4515_v5 = vpop.f32.mrf.mxu0  ;;  %v4525_v15 = vpop.f32.mrf.mxu1 }
 0x89a   : > { %v4538_v47 = vadd.f32 %v4515_v5, %v7395_v10  ;;  %v4540_v51 = vadd.f32 %v4525_v15, %v7428_v28 }
 0x89b   : > { %v4517_v1 = vpop.f32.mrf.mxu0  ;;  %v4527_v26 = vpop.f32.mrf.mxu1 }
 0x89c   : > { %4546 = vst.msk [vmem:[%s7846_s29 + $0x20] sm:$0xff] %vm628_vm11, %v4538_v47  ;;  %4548 = vst.msk [vmem:[%s7846_s29 + $0x30] sm:$0xff] %vm628_vm11, %v4540_v51 }
 0x8a3   : > { %v4520_v23 = vpop.f32.mrf.mxu0  ;;  %v4530_v45 = vpop.f32.mrf.mxu1 }
 0x8a4   : > { %v4539_v10 = vadd.f32 %v4520_v23, %v7409_v35  ;;  %v4541_v28 = vadd.f32 %v4530_v45, %v7441_v42 }
 0x8a5   : > { %v4522_v6 = vpop.f32.mrf.mxu0  ;;  %v4532_v46 = vpop.f32.mrf.mxu1 }
 0x8a6   : > { %4547 = vst.msk [vmem:[%s7846_s29 + $0x28] sm:$0xff] %vm628_vm11, %v4539_v10  ;;  %4549 = vst.msk [vmem:[%s7846_s29 + $0x38] sm:$0xff] %vm628_vm11, %v4541_v28 }
 0x8a7   : > { %5572 = shalt.err (!%p5569_p3)
}
 0x8a8   : > { %s5573_s7 = scalar_lea.hbm %s7870_s1, 1024  ;;  %s5577_s30 = scalar_lea.hbm %s7943_s20, 2048 }
 0x8a9   : > { %p5574_p4 = scmp.ne.s32.totalorder %s7870_s1, %s5573_s7  ;;  %p5578_p9 = scmp.lt.s32.totalorder %s7870_s1, %s7943_s20 }
 0x8aa   : > { %p5579_p10 = scmp.lt.s32.totalorder %s5577_s30, %s5573_s7 }
 0x8ab   : > { %p5575_p7 = pnand %p5574_p4, %p5778_p5 }
 0x8ac   : > { %p5580_p11 = por %p5579_p10, %p5578_p9 }
 0x8ad   : > { %p5576_p8 = pneg %p5575_p7 }
 0x8af   : > { %p5581_p12 = pnand %p5580_p11, %p5576_p8 }
 0x8b1   : > { %5584 = shalt.err (!%p5581_p12)
}
 0x8b2   : > { %s5634_s24 = smov 128   ;;  %s8006_s0 = smov 8  }
 0x8b3   : > { %4867 = dma.vmem_to_hbm [thread:$0]  (%p5778_p5), %s7874_s23, 1024, %s7870_s1, %s7882_s2, %s5634_s24, %s5634_s24, %s8006_s0  }
 0x8b4 PF: > { %s8007_s26 = sld [smem:[#allocation9_spill]] }
 0x8b5   : > { %s8008_s27 = sld [smem:[#allocation7_spill]] }
 0x8ba   : > { %p4873_p13 = scmp.ge.s32.totalorder %s8007_s26, 2 }
 0x8bb   : > { %s4579_s5 = sand.u32 1, %s8008_s27  }
 0x8bc   : > { %p4870_p0 = pnand %p4873_p13, %p5782_p6  ;;  %s4580_s6 = scalar_lea.sflag [#allocation5], %s4579_s5 }
 0x8be   : > { %p4871_p1 = pneg %p4870_p0 }
 0x8c0   : > { %5602 = dma.done.wait (%p4871_p1), %s4580_s6, 1024  }
 0x8c1   : > { %5604 = vsyncadd (%p4871_p1), %s4580_s6, 4294966272  ;;  %s8010_s24 = sld [smem:[#allocation10_spill]]  ;;  %s8013_s1 = smov %s5611_s22 }
 0x8c2   : > { %s8011_s4 = sld [smem:[#allocation8_spill]] }
 0x8c3   : > { %s8012_s23 = sld [smem:[#allocation11_spill]] }
 0x8c7   : > { %p30_p2 = scmp.ge.s32.totalorder %s8010_s24, 4  }
 0x8c8   : > { %s8014_s22 = smov %s8011_s4 }
 0x8c9   :  { %32 = sbr.rel (!%p30_p2) target bundleno = 13 (0xd), region = 145 }
 0x8ce   :  { %4585 = vsyncpa [#allocation5], 1 }
 0x8cf   :  { %4587 = vsyncpa [#allocation5 + $0x1], 1 }

</bundles_post_ra>
